<compile_context>
chip_gen: v6e
topology: v6e:2x2x1
jax: 0.10.0
libtpu: 0.0.40
codegen_flags: <defaults>
</compile_context>

<pallas_src>
import functools
import math

import jax
import jax.numpy as jnp
from jax import lax
from jax.experimental import pallas as pl
from jax.experimental.pallas import tpu as pltpu

NEG_INF = -1e30


# ------------------------------ tiling helper -------------------------------

def _row_tile(m, cap=512):
    """Largest row tile: full M if small, else a multiple-of-8 divisor <= cap."""
    if m <= cap:
        return m
    for t in range(cap, 7, -8):
        if m % t == 0:
            return t
    return m


# ------------------------------ Pallas kernels ------------------------------

def _linear_kernel(x_ref, w_ref, b_ref, o_ref, *, activation):
    x = x_ref[...].astype(jnp.bfloat16)
    w = w_ref[...].astype(jnp.bfloat16)
    y = jnp.dot(x, w, preferred_element_type=jnp.float32) + b_ref[...]
    if activation == "relu":
        y = jnp.maximum(y, 0.0)
    o_ref[...] = y


def pallas_linear(x, w_t, b, activation=None):
    """x: (M, K) f32, w_t: (K, N) pre-transposed, b: (N,) -> (M, N) f32."""
    M, K = x.shape
    N = w_t.shape[1]
    tm = _row_tile(M)
    return pl.pallas_call(
        functools.partial(_linear_kernel, activation=activation),
        out_shape=jax.ShapeDtypeStruct((M, N), jnp.float32),
        grid=(M // tm,),
        in_specs=[
            pl.BlockSpec((tm, K), lambda i: (i, 0)),
            pl.BlockSpec((K, N), lambda i: (0, 0)),
            pl.BlockSpec((1, N), lambda i: (0, 0)),
        ],
        out_specs=pl.BlockSpec((tm, N), lambda i: (i, 0)),
        compiler_params=pltpu.CompilerParams(dimension_semantics=("parallel",)),
    )(x, w_t, b.reshape(1, N))


def _layernorm(y, g, b, eps):
    mu = jnp.mean(y, axis=-1, keepdims=True)
    yc = y - mu
    var = jnp.mean(yc * yc, axis=-1, keepdims=True)
    return yc * lax.rsqrt(var + eps) * g + b


def _proj_add_ln_kernel(x_ref, r_ref, w_ref, b_ref, g_ref, bb_ref, o_ref, *, eps):
    # LayerNorm(residual + x @ W + b)
    x = x_ref[...].astype(jnp.bfloat16)
    w = w_ref[...].astype(jnp.bfloat16)
    y = jnp.dot(x, w, preferred_element_type=jnp.float32) + b_ref[...] + r_ref[...]
    o_ref[...] = _layernorm(y, g_ref[...], bb_ref[...], eps)


def pallas_proj_add_layernorm(x, residual, w_t, b, g, beta, eps=1e-5):
    M, K = x.shape
    N = w_t.shape[1]
    tm = _row_tile(M)
    return pl.pallas_call(
        functools.partial(_proj_add_ln_kernel, eps=eps),
        out_shape=jax.ShapeDtypeStruct((M, N), jnp.float32),
        grid=(M // tm,),
        in_specs=[
            pl.BlockSpec((tm, K), lambda i: (i, 0)),
            pl.BlockSpec((tm, N), lambda i: (i, 0)),
            pl.BlockSpec((K, N), lambda i: (0, 0)),
            pl.BlockSpec((1, N), lambda i: (0, 0)),
            pl.BlockSpec((1, N), lambda i: (0, 0)),
            pl.BlockSpec((1, N), lambda i: (0, 0)),
        ],
        out_specs=pl.BlockSpec((tm, N), lambda i: (i, 0)),
        compiler_params=pltpu.CompilerParams(dimension_semantics=("parallel",)),
    )(x, residual, w_t, b.reshape(1, N), g.reshape(1, N), beta.reshape(1, N))


def _ffn_add_ln_kernel(x_ref, w1_ref, b1_ref, w2_ref, b2_ref, g_ref, bb_ref,
                       o_ref, *, eps):
    # LayerNorm(x + lin2(relu(lin1(x))))
    xf = x_ref[...]
    h = jnp.dot(xf.astype(jnp.bfloat16), w1_ref[...].astype(jnp.bfloat16),
                preferred_element_type=jnp.float32) + b1_ref[...]
    h = jnp.maximum(h, 0.0)
    y = jnp.dot(h.astype(jnp.bfloat16), w2_ref[...].astype(jnp.bfloat16),
                preferred_element_type=jnp.float32) + b2_ref[...] + xf
    o_ref[...] = _layernorm(y, g_ref[...], bb_ref[...], eps)


def pallas_ffn_add_layernorm(x, w1_t, b1, w2_t, b2, g, beta, eps=1e-5):
    M, E = x.shape
    FF = w1_t.shape[1]
    tm = _row_tile(M)
    return pl.pallas_call(
        functools.partial(_ffn_add_ln_kernel, eps=eps),
        out_shape=jax.ShapeDtypeStruct((M, E), jnp.float32),
        grid=(M // tm,),
        in_specs=[
            pl.BlockSpec((tm, E), lambda i: (i, 0)),
            pl.BlockSpec((E, FF), lambda i: (0, 0)),
            pl.BlockSpec((1, FF), lambda i: (0, 0)),
            pl.BlockSpec((FF, E), lambda i: (0, 0)),
            pl.BlockSpec((1, E), lambda i: (0, 0)),
            pl.BlockSpec((1, E), lambda i: (0, 0)),
            pl.BlockSpec((1, E), lambda i: (0, 0)),
        ],
        out_specs=pl.BlockSpec((tm, E), lambda i: (i, 0)),
        compiler_params=pltpu.CompilerParams(dimension_semantics=("parallel",)),
    )(x, w1_t, b1.reshape(1, FF), w2_t, b2.reshape(1, E),
      g.reshape(1, E), beta.reshape(1, E))


def _ln_kernel(x_ref, g_ref, b_ref, o_ref, *, eps):
    o_ref[...] = _layernorm(x_ref[...], g_ref[...], b_ref[...], eps)


def pallas_layernorm(x, g, b, eps=1e-5):
    M, E = x.shape
    tm = _row_tile(M)
    return pl.pallas_call(
        functools.partial(_ln_kernel, eps=eps),
        out_shape=jax.ShapeDtypeStruct((M, E), jnp.float32),
        grid=(M // tm,),
        in_specs=[
            pl.BlockSpec((tm, E), lambda i: (i, 0)),
            pl.BlockSpec((1, E), lambda i: (0, 0)),
            pl.BlockSpec((1, E), lambda i: (0, 0)),
        ],
        out_specs=pl.BlockSpec((tm, E), lambda i: (i, 0)),
        compiler_params=pltpu.CompilerParams(dimension_semantics=("parallel",)),
    )(x, g.reshape(1, E), b.reshape(1, E))


# ------------------------------ attention kernels ----------------------------

def _attn_core(q, k, v, pad, num_heads, scale, causal):
    """q: (Lq, E), k/v: (Lk, E), pad: (1, Lk) with 1.0 = padded key."""
    Lq, E = q.shape
    Lk = k.shape[0]
    Dh = E // num_heads

    # Mask built in-kernel (single NEG_INF, no -2e30 double masking).
    bias = jnp.where(pad > 0.5, NEG_INF, 0.0)                    # (1, Lk)
    if causal:
        row = lax.broadcasted_iota(jnp.int32, (Lq, Lk), 0)
        col = lax.broadcasted_iota(jnp.int32, (Lq, Lk), 1)
        bias = jnp.where(col > row, NEG_INF, bias)               # (Lq, Lk)

    outs = []
    for h in range(num_heads):                                   # static unroll
        sl = slice(h * Dh, (h + 1) * Dh)
        qh = (q[:, sl] * scale).astype(jnp.bfloat16)             # scale folded into q
        kh = k[:, sl].astype(jnp.bfloat16)
        vh = v[:, sl].astype(jnp.bfloat16)
        s = lax.dot_general(qh, kh, (((1,), (1,)), ((), ())),
                            preferred_element_type=jnp.float32)
        s = s + bias
        m = jnp.max(s, axis=-1, keepdims=True)
        p = jnp.exp(s - m)
        inv = pl.reciprocal(jnp.sum(p, axis=-1, keepdims=True), approx=True)
        outs.append(jnp.dot(p.astype(jnp.bfloat16), vh,
                            preferred_element_type=jnp.float32) * inv)
    # single lane-dense (Lq, E) store instead of per-head Dh-wide stores
    return jnp.concatenate(outs, axis=-1)


def _self_mha_kernel(qkv_ref, pad_ref, o_ref, *, num_heads, scale, causal):
    x = qkv_ref[0]                                               # (L, 3E)
    E = x.shape[-1] // 3
    o_ref[0] = _attn_core(x[:, :E], x[:, E:2 * E], x[:, 2 * E:],
                          pad_ref[0], num_heads, scale, causal)


def _cross_mha_kernel(q_ref, kv_ref, pad_ref, o_ref, *, num_heads, scale, causal):
    q = q_ref[0]                                                 # (Lq, E)
    kv = kv_ref[0]                                               # (Lk, 2E)
    E = q.shape[-1]
    o_ref[0] = _attn_core(q, kv[:, :E], kv[:, E:],
                          pad_ref[0], num_heads, scale, causal)


# TODO(synk): for long sequences (encMaxLen up to 4000) the (Lq, Lk) score tile
# should be flash-tiled over Lk with online softmax; at these model sizes the
# full score matrix fits VMEM so it is computed per batch element in one shot.
def pallas_self_mha(qkv, pad, num_heads, causal):
    """qkv: (B, L, 3E) packed projections, pad: (B, 1, L) f32 (1=padded)."""
    B, L, threeE = qkv.shape
    E = threeE // 3
    scale = 1.0 / math.sqrt(E // num_heads)
    return pl.pallas_call(
        functools.partial(_self_mha_kernel, num_heads=num_heads,
                          scale=scale, causal=causal),
        out_shape=jax.ShapeDtypeStruct((B, L, E), jnp.float32),
        grid=(B,),
        in_specs=[
            pl.BlockSpec((1, L, threeE), lambda b: (b, 0, 0)),
            pl.BlockSpec((1, 1, L), lambda b: (b, 0, 0)),
        ],
        out_specs=pl.BlockSpec((1, L, E), lambda b: (b, 0, 0)),
        compiler_params=pltpu.CompilerParams(dimension_semantics=("parallel",)),
    )(qkv, pad)


def pallas_cross_mha(q, kv, pad, num_heads, causal):
    """q: (B, Lq, E), kv: (B, Lk, 2E) packed K/V, pad: (B, 1, Lk)."""
    B, Lq, E = q.shape
    Lk = kv.shape[1]
    scale = 1.0 / math.sqrt(E // num_heads)
    return pl.pallas_call(
        functools.partial(_cross_mha_kernel, num_heads=num_heads,
                          scale=scale, causal=causal),
        out_shape=jax.ShapeDtypeStruct((B, Lq, E), jnp.float32),
        grid=(B,),
        in_specs=[
            pl.BlockSpec((1, Lq, E), lambda b: (b, 0, 0)),
            pl.BlockSpec((1, Lk, 2 * E), lambda b: (b, 0, 0)),
            pl.BlockSpec((1, 1, Lk), lambda b: (b, 0, 0)),
        ],
        out_specs=pl.BlockSpec((1, Lq, E), lambda b: (b, 0, 0)),
        compiler_params=pltpu.CompilerParams(dimension_semantics=("parallel",)),
    )(q, kv, pad)


# --------------------------- model building blocks ---------------------------

def positional_encoding(d_model, max_len):
    pos = jnp.arange(max_len, dtype=jnp.float32)[:, None]
    div = 10000.0 ** (2.0 * jnp.arange(0, d_model, 2, dtype=jnp.float32) / d_model)
    arg = pos / div[None, :]
    pe = jnp.zeros((max_len, d_model), jnp.float32)
    pe = pe.at[:, 0::2].set(jnp.sin(arg))
    pe = pe.at[:, 1::2].set(jnp.cos(arg))
    return pe


def encoder_layer(x, p, num_heads, src_pad):
    B, L, E = x.shape
    x2 = x.reshape(B * L, E)
    qkv = pallas_linear(x2, p["sa_in_w_t"], p["sa_in_b"])           # fused Q/K/V
    attn = pallas_self_mha(qkv.reshape(B, L, 3 * E), src_pad, num_heads, causal=False)
    x2 = pallas_proj_add_layernorm(attn.reshape(B * L, E), x2,
                                   p["sa_out_w_t"], p["sa_out_b"],
                                   p["norm1_w"], p["norm1_b"])
    x2 = pallas_ffn_add_layernorm(x2, p["lin1_w_t"], p["lin1_b"],
                                  p["lin2_w_t"], p["lin2_b"],
                                  p["norm2_w"], p["norm2_b"])
    return x2.reshape(B, L, E)


def decoder_layer(y, memory, p, num_heads, tgt_pad, mem_pad):
    B, T, E = y.shape
    S = memory.shape[1]
    y2 = y.reshape(B * T, E)
    # --- masked (causal) self-attention ---
    qkv = pallas_linear(y2, p["sa_in_w_t"], p["sa_in_b"])
    attn = pallas_self_mha(qkv.reshape(B, T, 3 * E), tgt_pad, num_heads, causal=True)
    y2 = pallas_proj_add_layernorm(attn.reshape(B * T, E), y2,
                                   p["sa_out_w_t"], p["sa_out_b"],
                                   p["norm1_w"], p["norm1_b"])
    # --- cross-attention over encoder memory ---
    q = pallas_linear(y2, p["ca_q_w_t"], p["ca_q_b"])
    kv = pallas_linear(memory.reshape(B * S, E), p["ca_kv_w_t"], p["ca_kv_b"])
    attn = pallas_cross_mha(q.reshape(B, T, E), kv.reshape(B, S, 2 * E),
                            mem_pad, num_heads, causal=False)
    y2 = pallas_proj_add_layernorm(attn.reshape(B * T, E), y2,
                                   p["ca_out_w_t"], p["ca_out_b"],
                                   p["norm2_w"], p["norm2_b"])
    # --- feed-forward ---
    y2 = pallas_ffn_add_layernorm(y2, p["lin1_w_t"], p["lin1_b"],
                                  p["lin2_w_t"], p["lin2_b"],
                                  p["norm3_w"], p["norm3_b"])
    return y2.reshape(B, T, E)


def seq2seq_forward(params, x, y, num_heads):
    """x: (B, Ldesc) int32, y: (B, Labs) int32 -> (B, absVocabSize, Labs) f32."""
    E = params["encEmbedding"].shape[1]
    B, S = x.shape
    T = y.shape[1]

    xmask = (x != 0)
    src = (params["encEmbedding"][x] + params["pe_enc"][:S][None, :, :]) \
        * xmask[..., None].astype(jnp.float32)                      # (B, S, E)
    src_pad = jnp.logical_not(xmask).astype(jnp.float32).reshape(B, 1, S)

    ymask = (y != 0)
    tgt = (params["decEmbedding"][y] + params["pe_dec"][:T][None, :, :]) \
        * ymask[..., None].astype(jnp.float32)                      # (B, T, E)
    tgt_pad = jnp.logical_not(ymask).astype(jnp.float32).reshape(B, 1, T)

    h = src
    for lp in params["enc_layers"]:
        h = encoder_layer(h, lp, num_heads, src_pad)
    memory = pallas_layernorm(h.reshape(B * S, E),
                              params["enc_norm_w"],
                              params["enc_norm_b"]).reshape(B, S, E)

    o = tgt
    for lp in params["dec_layers"]:
        o = decoder_layer(o, memory, lp, num_heads, tgt_pad, src_pad)
    o = pallas_layernorm(o.reshape(B * T, E),
                         params["dec_norm_w"], params["dec_norm_b"])

    logits = pallas_linear(o, params["out_w_t"], params["out_b"])   # (B*T, V)
    V = params["out_b"].shape[0]
    return logits.reshape(B, T, V).transpose(0, 2, 1)               # (B, V, T)


# ------------------------------ parameter init -------------------------------

def init_model(seed, desc_vocab, abs_vocab, hidden, num_layers, num_heads):
    d, ff = hidden, hidden                       # dim_feedforward == hiddenDim
    keys = iter(jax.random.split(jax.random.PRNGKey(seed), 1024))

    def xavier(shape):                           # shape = (out, in) like torch
        fan_out, fan_in = shape
        lim = math.sqrt(6.0 / (fan_in + fan_out))
        return jax.random.uniform(next(keys), shape, jnp.float32, -lim, lim)

    def add_self_attn(p):
        in_w = xavier((3 * d, d))
        p["sa_in_w_t"] = in_w.T                                   # (E, 3E) pre-transposed
        p["sa_in_b"] = jnp.zeros((3 * d,), jnp.float32)
        p["sa_out_w_t"] = xavier((d, d)).T
        p["sa_out_b"] = jnp.zeros((d,), jnp.float32)

    def add_cross_attn(p):
        in_w = xavier((3 * d, d))
        p["ca_q_w_t"] = in_w[:d].T                                # (E, E)
        p["ca_q_b"] = jnp.zeros((d,), jnp.float32)
        p["ca_kv_w_t"] = in_w[d:].T                               # (E, 2E)
        p["ca_kv_b"] = jnp.zeros((2 * d,), jnp.float32)
        p["ca_out_w_t"] = xavier((d, d)).T
        p["ca_out_b"] = jnp.zeros((d,), jnp.float32)

    def add_ffn_norms(p, n_norms):
        p["lin1_w_t"] = xavier((ff, d)).T                         # (E, FF)
        p["lin1_b"] = jnp.zeros((ff,), jnp.float32)
        p["lin2_w_t"] = xavier((d, ff)).T                         # (FF, E)
        p["lin2_b"] = jnp.zeros((d,), jnp.float32)
        for i in range(1, n_norms + 1):
            p[f"norm{i}_w"] = jnp.ones((d,), jnp.float32)
            p[f"norm{i}_b"] = jnp.zeros((d,), jnp.float32)

    def enc_layer():
        p = {}
        add_self_attn(p)
        add_ffn_norms(p, 2)
        return p

    def dec_layer():
        p = {}
        add_self_attn(p)
        add_cross_attn(p)
        add_ffn_norms(p, 3)
        return p

    params = dict(
        encEmbedding=jax.random.normal(next(keys), (desc_vocab, d),
                                       jnp.float32).at[0].set(0.0),  # padding_idx=0
        decEmbedding=jax.random.normal(next(keys), (abs_vocab, d),
                                       jnp.float32).at[0].set(0.0),
        enc_layers=[enc_layer() for _ in range(num_layers)],
        dec_layers=[dec_layer() for _ in range(num_layers)],
        enc_norm_w=jnp.ones((d,), jnp.float32), enc_norm_b=jnp.zeros((d,), jnp.float32),
        dec_norm_w=jnp.ones((d,), jnp.float32), dec_norm_b=jnp.zeros((d,), jnp.float32),
        out_w_t=xavier((abs_vocab, d)).T, out_b=jnp.zeros((abs_vocab,), jnp.float32),
        pe_enc=positional_encoding(d, 4000),    # encMaxLen
        pe_dec=positional_encoding(d, 150),     # predMaxLen
    )
    return params


# ----------------------------------- main ------------------------------------

if __name__ == "__main__":
    desc_vocab, abs_vocab = 20, 18
    hidden, num_layers, num_heads = 32, 2, 4
    B, Lenc, Labs = 2, 16, 8

    kx, ky = jax.random.split(jax.random.PRNGKey(0))
    x = jax.random.randint(kx, (B, Lenc), 1, desc_vocab, dtype=jnp.int32)
    x = x.at[:, 14:].set(0)          # pad tokens at the tail of the source
    y = jax.random.randint(ky, (B, Labs), 1, abs_vocab, dtype=jnp.int32)
    y = y.at[:, 6:].set(0)           # pad tokens at the tail of the target

    params = init_model(0, desc_vocab, abs_vocab, hidden, num_layers, num_heads)

    fwd = jax.jit(functools.partial(seq2seq_forward, num_heads=num_heads))
    out = jax.block_until_ready(fwd(params, x, y))

    assert out.shape == (B, abs_vocab, Labs), out.shape
    assert bool(jnp.all(jnp.isfinite(out)))
    # TODO(synk): evaluate()/beam-search autoregressive inference path not implemented.
    print("KERNEL_OK")
</pallas_src>

<mosaic_0001>
module attributes {stable_mosaic.version = 11 : i64} {
  func.func @_proj_add_ln_kernel(%arg0: i32, %arg1: memref<32x32xf32, #tpu.memory_space<vmem>>, %arg2: memref<32x32xf32, #tpu.memory_space<vmem>>, %arg3: memref<32x32xf32, #tpu.memory_space<vmem>>, %arg4: memref<1x32xf32, #tpu.memory_space<vmem>>, %arg5: memref<1x32xf32, #tpu.memory_space<vmem>>, %arg6: memref<1x32xf32, #tpu.memory_space<vmem>>, %arg7: memref<32x32xf32, #tpu.memory_space<vmem>>) attributes {dimension_semantics = [#tpu.dimension_semantics<parallel>], iteration_bounds = array<i64: 1>, scalar_prefetch = 0 : i64, scratch_operands = 0 : i64, tpu.core_type = #tpu.core_type<tc>, window_params = [{transform_indices = @transform_0, window_bounds = array<i64: 32, 32>}, {transform_indices = @transform_1, window_bounds = array<i64: 32, 32>}, {pipeline_mode = #tpu.pipeline_mode<synchronous>, transform_indices = @transform_2, window_bounds = array<i64: 32, 32>}, {pipeline_mode = #tpu.pipeline_mode<synchronous>, transform_indices = @transform_3, window_bounds = array<i64: 1, 32>}, {pipeline_mode = #tpu.pipeline_mode<synchronous>, transform_indices = @transform_4, window_bounds = array<i64: 1, 32>}, {pipeline_mode = #tpu.pipeline_mode<synchronous>, transform_indices = @transform_5, window_bounds = array<i64: 1, 32>}, {transform_indices = @transform_6, window_bounds = array<i64: 32, 32>}]} {
    %c0 = arith.constant 0 : index
    %c0_0 = arith.constant 0 : index
    %0 = vector.load %arg1[%c0, %c0_0] : memref<32x32xf32, #tpu.memory_space<vmem>>, vector<32x32xf32>
    %1 = arith.truncf %0 : vector<32x32xf32> to vector<32x32xbf16>
    %c0_1 = arith.constant 0 : index
    %c0_2 = arith.constant 0 : index
    %2 = vector.load %arg3[%c0_1, %c0_2] : memref<32x32xf32, #tpu.memory_space<vmem>>, vector<32x32xf32>
    %3 = arith.truncf %2 : vector<32x32xf32> to vector<32x32xbf16>
    %cst = arith.constant dense<0.000000e+00> : vector<32x32xf32>
    %4 = tpu.matmul %1, %3, %cst {dimension_numbers = #tpu.dot_dimension_numbers<[1], [0], [0], [1], [0, 0, 1, 1], [], []>} : vector<32x32xbf16>, vector<32x32xbf16>, vector<32x32xf32> -> vector<32x32xf32>
    %c0_3 = arith.constant 0 : index
    %c0_4 = arith.constant 0 : index
    %5 = vector.load %arg4[%c0_3, %c0_4] : memref<1x32xf32, #tpu.memory_space<vmem>>, vector<1x32xf32>
    %6 = vector.broadcast %5 : vector<1x32xf32> to vector<32x32xf32>
    %7 = arith.addf %4, %6 : vector<32x32xf32>
    %c0_5 = arith.constant 0 : index
    %c0_6 = arith.constant 0 : index
    %8 = vector.load %arg2[%c0_5, %c0_6] : memref<32x32xf32, #tpu.memory_space<vmem>>, vector<32x32xf32>
    %9 = arith.addf %7, %8 : vector<32x32xf32>
    %c0_7 = arith.constant 0 : index
    %c0_8 = arith.constant 0 : index
    %10 = vector.load %arg5[%c0_7, %c0_8] : memref<1x32xf32, #tpu.memory_space<vmem>>, vector<1x32xf32>
    %c0_9 = arith.constant 0 : index
    %c0_10 = arith.constant 0 : index
    %11 = vector.load %arg6[%c0_9, %c0_10] : memref<1x32xf32, #tpu.memory_space<vmem>>, vector<1x32xf32>
    %cst_11 = arith.constant dense<0.000000e+00> : vector<32xf32>
    %12 = vector.multi_reduction <add>, %9, %cst_11 [1] : vector<32x32xf32> to vector<32xf32>
    %13 = vector.shape_cast %12 : vector<32xf32> to vector<32x1xf32>
    %cst_12 = arith.constant 3.200000e+01 : f32
    %14 = vector.broadcast %cst_12 : f32 to vector<32x1xf32>
    %15 = arith.divf %13, %14 : vector<32x1xf32>
    %16 = vector.broadcast %15 : vector<32x1xf32> to vector<32x32xf32>
    %17 = arith.subf %9, %16 : vector<32x32xf32>
    %18 = arith.mulf %17, %17 : vector<32x32xf32>
    %cst_13 = arith.constant dense<0.000000e+00> : vector<32xf32>
    %19 = vector.multi_reduction <add>, %18, %cst_13 [1] : vector<32x32xf32> to vector<32xf32>
    %20 = vector.shape_cast %19 : vector<32xf32> to vector<32x1xf32>
    %cst_14 = arith.constant 3.200000e+01 : f32
    %21 = vector.broadcast %cst_14 : f32 to vector<32x1xf32>
    %22 = arith.divf %20, %21 : vector<32x1xf32>
    %cst_15 = arith.constant 9.99999974E-6 : f32
    %23 = vector.broadcast %cst_15 : f32 to vector<32x1xf32>
    %24 = arith.addf %22, %23 : vector<32x1xf32>
    %25 = math.rsqrt %24 : vector<32x1xf32>
    %26 = vector.broadcast %25 : vector<32x1xf32> to vector<32x32xf32>
    %27 = arith.mulf %17, %26 : vector<32x32xf32>
    %28 = vector.broadcast %10 : vector<1x32xf32> to vector<32x32xf32>
    %29 = arith.mulf %27, %28 : vector<32x32xf32>
    %30 = vector.broadcast %11 : vector<1x32xf32> to vector<32x32xf32>
    %31 = arith.addf %29, %30 : vector<32x32xf32>
    %c0_16 = arith.constant 0 : index
    %c0_17 = arith.constant 0 : index
    %32 = vector.load %arg7[%c0_16, %c0_17] : memref<32x32xf32, #tpu.memory_space<vmem>>, vector<32x32xf32>
    tpu.vector_store %arg7[%c0_16, %c0_17], %31 {strides = array<i32>} : memref<32x32xf32, #tpu.memory_space<vmem>>, vector<32x32xf32>,
    return
  }
  func.func @transform_0(%arg0: i32) -> (i32, i32) {
    %c0_i32 = arith.constant 0 : i32
    %c0_i32_0 = arith.constant 0 : i32
    return %arg0, %c0_i32 : i32, i32
  }
  func.func @transform_1(%arg0: i32) -> (i32, i32) {
    %c0_i32 = arith.constant 0 : i32
    %c0_i32_0 = arith.constant 0 : i32
    return %arg0, %c0_i32 : i32, i32
  }
  func.func @transform_2(%arg0: i32) -> (i32, i32) {
    %c0_i32 = arith.constant 0 : i32
    %c0_i32_0 = arith.constant 0 : i32
    %c0_i32_1 = arith.constant 0 : i32
    return %c0_i32, %c0_i32_0 : i32, i32
  }
  func.func @transform_3(%arg0: i32) -> (i32, i32) {
    %c0_i32 = arith.constant 0 : i32
    %c0_i32_0 = arith.constant 0 : i32
    %c0_i32_1 = arith.constant 0 : i32
    return %c0_i32, %c0_i32_0 : i32, i32
  }
  func.func @transform_4(%arg0: i32) -> (i32, i32) {
    %c0_i32 = arith.constant 0 : i32
    %c0_i32_0 = arith.constant 0 : i32
    %c0_i32_1 = arith.constant 0 : i32
    return %c0_i32, %c0_i32_0 : i32, i32
  }
  func.func @transform_5(%arg0: i32) -> (i32, i32) {
    %c0_i32 = arith.constant 0 : i32
    %c0_i32_0 = arith.constant 0 : i32
    %c0_i32_1 = arith.constant 0 : i32
    return %c0_i32, %c0_i32_0 : i32, i32
  }
  func.func @transform_6(%arg0: i32) -> (i32, i32) {
    %c0_i32 = arith.constant 0 : i32
    %c0_i32_0 = arith.constant 0 : i32
    return %arg0, %c0_i32 : i32, i32
  }
}

module attributes {stable_mosaic.version = 11 : i64} {
  func.func @_ffn_add_ln_kernel(%arg0: i32, %arg1: memref<32x32xf32, #tpu.memory_space<vmem>>, %arg2: memref<32x32xf32, #tpu.memory_space<vmem>>, %arg3: memref<1x32xf32, #tpu.memory_space<vmem>>, %arg4: memref<32x32xf32, #tpu.memory_space<vmem>>, %arg5: memref<1x32xf32, #tpu.memory_space<vmem>>, %arg6: memref<1x32xf32, #tpu.memory_space<vmem>>, %arg7: memref<1x32xf32, #tpu.memory_space<vmem>>, %arg8: memref<32x32xf32, #tpu.memory_space<vmem>>) attributes {dimension_semantics = [#tpu.dimension_semantics<parallel>], iteration_bounds = array<i64: 1>, scalar_prefetch = 0 : i64, scratch_operands = 0 : i64, tpu.core_type = #tpu.core_type<tc>, window_params = [{transform_indices = @transform_0, window_bounds = array<i64: 32, 32>}, {pipeline_mode = #tpu.pipeline_mode<synchronous>, transform_indices = @transform_1, window_bounds = array<i64: 32, 32>}, {pipeline_mode = #tpu.pipeline_mode<synchronous>, transform_indices = @transform_2, window_bounds = array<i64: 1, 32>}, {pipeline_mode = #tpu.pipeline_mode<synchronous>, transform_indices = @transform_3, window_bounds = array<i64: 32, 32>}, {pipeline_mode = #tpu.pipeline_mode<synchronous>, transform_indices = @transform_4, window_bounds = array<i64: 1, 32>}, {pipeline_mode = #tpu.pipeline_mode<synchronous>, transform_indices = @transform_5, window_bounds = array<i64: 1, 32>}, {pipeline_mode = #tpu.pipeline_mode<synchronous>, transform_indices = @transform_6, window_bounds = array<i64: 1, 32>}, {transform_indices = @transform_7, window_bounds = array<i64: 32, 32>}]} {
    %c0 = arith.constant 0 : index
    %c0_0 = arith.constant 0 : index
    %0 = vector.load %arg1[%c0, %c0_0] : memref<32x32xf32, #tpu.memory_space<vmem>>, vector<32x32xf32>
    %1 = arith.truncf %0 : vector<32x32xf32> to vector<32x32xbf16>
    %c0_1 = arith.constant 0 : index
    %c0_2 = arith.constant 0 : index
    %2 = vector.load %arg2[%c0_1, %c0_2] : memref<32x32xf32, #tpu.memory_space<vmem>>, vector<32x32xf32>
    %3 = arith.truncf %2 : vector<32x32xf32> to vector<32x32xbf16>
    %cst = arith.constant dense<0.000000e+00> : vector<32x32xf32>
    %4 = tpu.matmul %1, %3, %cst {dimension_numbers = #tpu.dot_dimension_numbers<[1], [0], [0], [1], [0, 0, 1, 1], [], []>} : vector<32x32xbf16>, vector<32x32xbf16>, vector<32x32xf32> -> vector<32x32xf32>
    %c0_3 = arith.constant 0 : index
    %c0_4 = arith.constant 0 : index
    %5 = vector.load %arg3[%c0_3, %c0_4] : memref<1x32xf32, #tpu.memory_space<vmem>>, vector<1x32xf32>
    %6 = vector.broadcast %5 : vector<1x32xf32> to vector<32x32xf32>
    %7 = arith.addf %4, %6 : vector<32x32xf32>
    %cst_5 = arith.constant 0.000000e+00 : f32
    %8 = vector.broadcast %cst_5 : f32 to vector<32x32xf32>
    %9 = arith.maximumf %7, %8 : vector<32x32xf32>
    %10 = arith.truncf %9 : vector<32x32xf32> to vector<32x32xbf16>
    %c0_6 = arith.constant 0 : index
    %c0_7 = arith.constant 0 : index
    %11 = vector.load %arg4[%c0_6, %c0_7] : memref<32x32xf32, #tpu.memory_space<vmem>>, vector<32x32xf32>
    %12 = arith.truncf %11 : vector<32x32xf32> to vector<32x32xbf16>
    %cst_8 = arith.constant dense<0.000000e+00> : vector<32x32xf32>
    %13 = tpu.matmul %10, %12, %cst_8 {dimension_numbers = #tpu.dot_dimension_numbers<[1], [0], [0], [1], [0, 0, 1, 1], [], []>} : vector<32x32xbf16>, vector<32x32xbf16>, vector<32x32xf32> -> vector<32x32xf32>
    %c0_9 = arith.constant 0 : index
    %c0_10 = arith.constant 0 : index
    %14 = vector.load %arg5[%c0_9, %c0_10] : memref<1x32xf32, #tpu.memory_space<vmem>>, vector<1x32xf32>
    %15 = vector.broadcast %14 : vector<1x32xf32> to vector<32x32xf32>
    %16 = arith.addf %13, %15 : vector<32x32xf32>
    %17 = arith.addf %16, %0 : vector<32x32xf32>
    %c0_11 = arith.constant 0 : index
    %c0_12 = arith.constant 0 : index
    %18 = vector.load %arg6[%c0_11, %c0_12] : memref<1x32xf32, #tpu.memory_space<vmem>>, vector<1x32xf32>
    %c0_13 = arith.constant 0 : index
    %c0_14 = arith.constant 0 : index
    %19 = vector.load %arg7[%c0_13, %c0_14] : memref<1x32xf32, #tpu.memory_space<vmem>>, vector<1x32xf32>
    %cst_15 = arith.constant dense<0.000000e+00> : vector<32xf32>
    %20 = vector.multi_reduction <add>, %17, %cst_15 [1] : vector<32x32xf32> to vector<32xf32>
    %21 = vector.shape_cast %20 : vector<32xf32> to vector<32x1xf32>
    %cst_16 = arith.constant 3.200000e+01 : f32
    %22 = vector.broadcast %cst_16 : f32 to vector<32x1xf32>
    %23 = arith.divf %21, %22 : vector<32x1xf32>
    %24 = vector.broadcast %23 : vector<32x1xf32> to vector<32x32xf32>
    %25 = arith.subf %17, %24 : vector<32x32xf32>
    %26 = arith.mulf %25, %25 : vector<32x32xf32>
    %cst_17 = arith.constant dense<0.000000e+00> : vector<32xf32>
    %27 = vector.multi_reduction <add>, %26, %cst_17 [1] : vector<32x32xf32> to vector<32xf32>
    %28 = vector.shape_cast %27 : vector<32xf32> to vector<32x1xf32>
    %cst_18 = arith.constant 3.200000e+01 : f32
    %29 = vector.broadcast %cst_18 : f32 to vector<32x1xf32>
    %30 = arith.divf %28, %29 : vector<32x1xf32>
    %cst_19 = arith.constant 9.99999974E-6 : f32
    %31 = vector.broadcast %cst_19 : f32 to vector<32x1xf32>
    %32 = arith.addf %30, %31 : vector<32x1xf32>
    %33 = math.rsqrt %32 : vector<32x1xf32>
    %34 = vector.broadcast %33 : vector<32x1xf32> to vector<32x32xf32>
    %35 = arith.mulf %25, %34 : vector<32x32xf32>
    %36 = vector.broadcast %18 : vector<1x32xf32> to vector<32x32xf32>
    %37 = arith.mulf %35, %36 : vector<32x32xf32>
    %38 = vector.broadcast %19 : vector<1x32xf32> to vector<32x32xf32>
    %39 = arith.addf %37, %38 : vector<32x32xf32>
    %c0_20 = arith.constant 0 : index
    %c0_21 = arith.constant 0 : index
    %40 = vector.load %arg8[%c0_20, %c0_21] : memref<32x32xf32, #tpu.memory_space<vmem>>, vector<32x32xf32>
    tpu.vector_store %arg8[%c0_20, %c0_21], %39 {strides = array<i32>} : memref<32x32xf32, #tpu.memory_space<vmem>>, vector<32x32xf32>,
    return
  }
  func.func @transform_0(%arg0: i32) -> (i32, i32) {
    %c0_i32 = arith.constant 0 : i32
    %c0_i32_0 = arith.constant 0 : i32
    return %arg0, %c0_i32 : i32, i32
  }
  func.func @transform_1(%arg0: i32) -> (i32, i32) {
    %c0_i32 = arith.constant 0 : i32
    %c0_i32_0 = arith.constant 0 : i32
    %c0_i32_1 = arith.constant 0 : i32
    return %c0_i32, %c0_i32_0 : i32, i32
  }
  func.func @transform_2(%arg0: i32) -> (i32, i32) {
    %c0_i32 = arith.constant 0 : i32
    %c0_i32_0 = arith.constant 0 : i32
    %c0_i32_1 = arith.constant 0 : i32
    return %c0_i32, %c0_i32_0 : i32, i32
  }
  func.func @transform_3(%arg0: i32) -> (i32, i32) {
    %c0_i32 = arith.constant 0 : i32
    %c0_i32_0 = arith.constant 0 : i32
    %c0_i32_1 = arith.constant 0 : i32
    return %c0_i32, %c0_i32_0 : i32, i32
  }
  func.func @transform_4(%arg0: i32) -> (i32, i32) {
    %c0_i32 = arith.constant 0 : i32
    %c0_i32_0 = arith.constant 0 : i32
    %c0_i32_1 = arith.constant 0 : i32
    return %c0_i32, %c0_i32_0 : i32, i32
  }
  func.func @transform_5(%arg0: i32) -> (i32, i32) {
    %c0_i32 = arith.constant 0 : i32
    %c0_i32_0 = arith.constant 0 : i32
    %c0_i32_1 = arith.constant 0 : i32
    return %c0_i32, %c0_i32_0 : i32, i32
  }
  func.func @transform_6(%arg0: i32) -> (i32, i32) {
    %c0_i32 = arith.constant 0 : i32
    %c0_i32_0 = arith.constant 0 : i32
    %c0_i32_1 = arith.constant 0 : i32
    return %c0_i32, %c0_i32_0 : i32, i32
  }
  func.func @transform_7(%arg0: i32) -> (i32, i32) {
    %c0_i32 = arith.constant 0 : i32
    %c0_i32_0 = arith.constant 0 : i32
    return %arg0, %c0_i32 : i32, i32
  }
}

module attributes {stable_mosaic.version = 11 : i64} {
  func.func @_self_mha_kernel(%arg0: i32, %arg1: memref<1x16x96xf32, #tpu.memory_space<vmem>>, %arg2: memref<1x1x16xf32, #tpu.memory_space<vmem>>, %arg3: memref<1x16x32xf32, #tpu.memory_space<vmem>>) attributes {dimension_semantics = [#tpu.dimension_semantics<parallel>], iteration_bounds = array<i64: 2>, scalar_prefetch = 0 : i64, scratch_operands = 0 : i64, tpu.core_type = #tpu.core_type<tc>, window_params = [{transform_indices = @transform_0, window_bounds = array<i64: 1, 16, 96>}, {transform_indices = @transform_1, window_bounds = array<i64: 1, 1, 16>}, {transform_indices = @transform_2, window_bounds = array<i64: 1, 16, 32>}]} {
    %c0 = arith.constant 0 : index
    %c0_0 = arith.constant 0 : index
    %c0_1 = arith.constant 0 : index
    %0 = vector.load %arg1[%c0, %c0_0, %c0_1] : memref<1x16x96xf32, #tpu.memory_space<vmem>>, vector<1x16x96xf32>
    %1 = vector.shape_cast %0 : vector<1x16x96xf32> to vector<16x96xf32>
    %2 = vector.extract_strided_slice %1 {offsets = [0, 0], sizes = [16, 32], strides = [1, 1]} : vector<16x96xf32> to vector<16x32xf32>
    %3 = vector.extract_strided_slice %1 {offsets = [0, 32], sizes = [16, 32], strides = [1, 1]} : vector<16x96xf32> to vector<16x32xf32>
    %4 = vector.extract_strided_slice %1 {offsets = [0, 64], sizes = [16, 32], strides = [1, 1]} : vector<16x96xf32> to vector<16x32xf32>
    %c0_2 = arith.constant 0 : index
    %c0_3 = arith.constant 0 : index
    %c0_4 = arith.constant 0 : index
    %5 = vector.load %arg2[%c0_2, %c0_3, %c0_4] : memref<1x1x16xf32, #tpu.memory_space<vmem>>, vector<1x1x16xf32>
    %6 = vector.shape_cast %5 : vector<1x1x16xf32> to vector<1x16xf32>
    %cst = arith.constant 5.000000e-01 : f32
    %7 = vector.broadcast %cst : f32 to vector<1x16xf32>
    %8 = arith.cmpf ogt, %6, %7 : vector<1x16xf32>
    %cst_5 = arith.constant -1.000000e+30 : f32
    %cst_6 = arith.constant 0.000000e+00 : f32
    %9 = vector.broadcast %cst_5 : f32 to vector<1x16xf32>
    %10 = vector.broadcast %cst_6 : f32 to vector<1x16xf32>
    %11 = arith.select %8, %9, %10 : vector<1x16xi1>, vector<1x16xf32>
    %12 = vector.extract_strided_slice %2 {offsets = [0, 0], sizes = [16, 8], strides = [1, 1]} : vector<16x32xf32> to vector<16x8xf32>
    %cst_7 = arith.constant 0.353553385 : f32
    %13 = vector.broadcast %cst_7 : f32 to vector<16x8xf32>
    %14 = arith.mulf %12, %13 : vector<16x8xf32>
    %15 = arith.truncf %14 : vector<16x8xf32> to vector<16x8xbf16>
    %16 = vector.extract_strided_slice %3 {offsets = [0, 0], sizes = [16, 8], strides = [1, 1]} : vector<16x32xf32> to vector<16x8xf32>
    %17 = arith.truncf %16 : vector<16x8xf32> to vector<16x8xbf16>
    %18 = vector.extract_strided_slice %4 {offsets = [0, 0], sizes = [16, 8], strides = [1, 1]} : vector<16x32xf32> to vector<16x8xf32>
    %19 = arith.truncf %18 : vector<16x8xf32> to vector<16x8xbf16>
    %cst_8 = arith.constant dense<0.000000e+00> : vector<16x16xf32>
    %20 = tpu.matmul %15, %17, %cst_8 {dimension_numbers = #tpu.dot_dimension_numbers<[1], [1], [0], [0], [0, 0, 1, 0], [], []>} : vector<16x8xbf16>, vector<16x8xbf16>, vector<16x16xf32> -> vector<16x16xf32>
    %21 = vector.broadcast %11 : vector<1x16xf32> to vector<16x16xf32>
    %22 = arith.addf %20, %21 : vector<16x16xf32>
    %cst_9 = arith.constant dense<0xFF800000> : vector<16xf32>
    %23 = vector.multi_reduction <maximumf>, %22, %cst_9 [1] : vector<16x16xf32> to vector<16xf32>
    %24 = vector.shape_cast %23 : vector<16xf32> to vector<16x1xf32>
    %25 = vector.broadcast %24 : vector<16x1xf32> to vector<16x16xf32>
    %26 = arith.subf %22, %25 : vector<16x16xf32>
    %27 = math.exp %26 : vector<16x16xf32>
    %cst_10 = arith.constant dense<0.000000e+00> : vector<16xf32>
    %28 = vector.multi_reduction <add>, %27, %cst_10 [1] : vector<16x16xf32> to vector<16xf32>
    %29 = vector.shape_cast %28 : vector<16xf32> to vector<16x1xf32>
    %30 = tpu.reciprocal %29 {approx = true} : vector<16x1xf32> -> vector<16x1xf32>
    %31 = arith.truncf %27 : vector<16x16xf32> to vector<16x16xbf16>
    %cst_11 = arith.constant dense<0.000000e+00> : vector<16x8xf32>
    %32 = tpu.matmul %31, %19, %cst_11 {dimension_numbers = #tpu.dot_dimension_numbers<[1], [0], [0], [1], [0, 0, 1, 1], [], []>} : vector<16x16xbf16>, vector<16x8xbf16>, vector<16x8xf32> -> vector<16x8xf32>
    %33 = vector.broadcast %30 : vector<16x1xf32> to vector<16x8xf32>
    %34 = arith.mulf %32, %33 : vector<16x8xf32>
    %35 = vector.extract_strided_slice %2 {offsets = [0, 8], sizes = [16, 8], strides = [1, 1]} : vector<16x32xf32> to vector<16x8xf32>
    %cst_12 = arith.constant 0.353553385 : f32
    %36 = vector.broadcast %cst_12 : f32 to vector<16x8xf32>
    %37 = arith.mulf %35, %36 : vector<16x8xf32>
    %38 = arith.truncf %37 : vector<16x8xf32> to vector<16x8xbf16>
    %39 = vector.extract_strided_slice %3 {offsets = [0, 8], sizes = [16, 8], strides = [1, 1]} : vector<16x32xf32> to vector<16x8xf32>
    %40 = arith.truncf %39 : vector<16x8xf32> to vector<16x8xbf16>
    %41 = vector.extract_strided_slice %4 {offsets = [0, 8], sizes = [16, 8], strides = [1, 1]} : vector<16x32xf32> to vector<16x8xf32>
    %42 = arith.truncf %41 : vector<16x8xf32> to vector<16x8xbf16>
    %cst_13 = arith.constant dense<0.000000e+00> : vector<16x16xf32>
    %43 = tpu.matmul %38, %40, %cst_13 {dimension_numbers = #tpu.dot_dimension_numbers<[1], [1], [0], [0], [0, 0, 1, 0], [], []>} : vector<16x8xbf16>, vector<16x8xbf16>, vector<16x16xf32> -> vector<16x16xf32>
    %44 = vector.broadcast %11 : vector<1x16xf32> to vector<16x16xf32>
    %45 = arith.addf %43, %44 : vector<16x16xf32>
    %cst_14 = arith.constant dense<0xFF800000> : vector<16xf32>
    %46 = vector.multi_reduction <maximumf>, %45, %cst_14 [1] : vector<16x16xf32> to vector<16xf32>
    %47 = vector.shape_cast %46 : vector<16xf32> to vector<16x1xf32>
    %48 = vector.broadcast %47 : vector<16x1xf32> to vector<16x16xf32>
    %49 = arith.subf %45, %48 : vector<16x16xf32>
    %50 = math.exp %49 : vector<16x16xf32>
    %cst_15 = arith.constant dense<0.000000e+00> : vector<16xf32>
    %51 = vector.multi_reduction <add>, %50, %cst_15 [1] : vector<16x16xf32> to vector<16xf32>
    %52 = vector.shape_cast %51 : vector<16xf32> to vector<16x1xf32>
    %53 = tpu.reciprocal %52 {approx = true} : vector<16x1xf32> -> vector<16x1xf32>
    %54 = arith.truncf %50 : vector<16x16xf32> to vector<16x16xbf16>
    %cst_16 = arith.constant dense<0.000000e+00> : vector<16x8xf32>
    %55 = tpu.matmul %54, %42, %cst_16 {dimension_numbers = #tpu.dot_dimension_numbers<[1], [0], [0], [1], [0, 0, 1, 1], [], []>} : vector<16x16xbf16>, vector<16x8xbf16>, vector<16x8xf32> -> vector<16x8xf32>
    %56 = vector.broadcast %53 : vector<16x1xf32> to vector<16x8xf32>
    %57 = arith.mulf %55, %56 : vector<16x8xf32>
    %58 = vector.extract_strided_slice %2 {offsets = [0, 16], sizes = [16, 8], strides = [1, 1]} : vector<16x32xf32> to vector<16x8xf32>
    %cst_17 = arith.constant 0.353553385 : f32
    %59 = vector.broadcast %cst_17 : f32 to vector<16x8xf32>
    %60 = arith.mulf %58, %59 : vector<16x8xf32>
    %61 = arith.truncf %60 : vector<16x8xf32> to vector<16x8xbf16>
    %62 = vector.extract_strided_slice %3 {offsets = [0, 16], sizes = [16, 8], strides = [1, 1]} : vector<16x32xf32> to vector<16x8xf32>
    %63 = arith.truncf %62 : vector<16x8xf32> to vector<16x8xbf16>
    %64 = vector.extract_strided_slice %4 {offsets = [0, 16], sizes = [16, 8], strides = [1, 1]} : vector<16x32xf32> to vector<16x8xf32>
    %65 = arith.truncf %64 : vector<16x8xf32> to vector<16x8xbf16>
    %cst_18 = arith.constant dense<0.000000e+00> : vector<16x16xf32>
    %66 = tpu.matmul %61, %63, %cst_18 {dimension_numbers = #tpu.dot_dimension_numbers<[1], [1], [0], [0], [0, 0, 1, 0], [], []>} : vector<16x8xbf16>, vector<16x8xbf16>, vector<16x16xf32> -> vector<16x16xf32>
    %67 = vector.broadcast %11 : vector<1x16xf32> to vector<16x16xf32>
    %68 = arith.addf %66, %67 : vector<16x16xf32>
    %cst_19 = arith.constant dense<0xFF800000> : vector<16xf32>
    %69 = vector.multi_reduction <maximumf>, %68, %cst_19 [1] : vector<16x16xf32> to vector<16xf32>
    %70 = vector.shape_cast %69 : vector<16xf32> to vector<16x1xf32>
    %71 = vector.broadcast %70 : vector<16x1xf32> to vector<16x16xf32>
    %72 = arith.subf %68, %71 : vector<16x16xf32>
    %73 = math.exp %72 : vector<16x16xf32>
    %cst_20 = arith.constant dense<0.000000e+00> : vector<16xf32>
    %74 = vector.multi_reduction <add>, %73, %cst_20 [1] : vector<16x16xf32> to vector<16xf32>
    %75 = vector.shape_cast %74 : vector<16xf32> to vector<16x1xf32>
    %76 = tpu.reciprocal %75 {approx = true} : vector<16x1xf32> -> vector<16x1xf32>
    %77 = arith.truncf %73 : vector<16x16xf32> to vector<16x16xbf16>
    %cst_21 = arith.constant dense<0.000000e+00> : vector<16x8xf32>
    %78 = tpu.matmul %77, %65, %cst_21 {dimension_numbers = #tpu.dot_dimension_numbers<[1], [0], [0], [1], [0, 0, 1, 1], [], []>} : vector<16x16xbf16>, vector<16x8xbf16>, vector<16x8xf32> -> vector<16x8xf32>
    %79 = vector.broadcast %76 : vector<16x1xf32> to vector<16x8xf32>
    %80 = arith.mulf %78, %79 : vector<16x8xf32>
    %81 = vector.extract_strided_slice %2 {offsets = [0, 24], sizes = [16, 8], strides = [1, 1]} : vector<16x32xf32> to vector<16x8xf32>
    %cst_22 = arith.constant 0.353553385 : f32
    %82 = vector.broadcast %cst_22 : f32 to vector<16x8xf32>
    %83 = arith.mulf %81, %82 : vector<16x8xf32>
    %84 = arith.truncf %83 : vector<16x8xf32> to vector<16x8xbf16>
    %85 = vector.extract_strided_slice %3 {offsets = [0, 24], sizes = [16, 8], strides = [1, 1]} : vector<16x32xf32> to vector<16x8xf32>
    %86 = arith.truncf %85 : vector<16x8xf32> to vector<16x8xbf16>
    %87 = vector.extract_strided_slice %4 {offsets = [0, 24], sizes = [16, 8], strides = [1, 1]} : vector<16x32xf32> to vector<16x8xf32>
    %88 = arith.truncf %87 : vector<16x8xf32> to vector<16x8xbf16>
    %cst_23 = arith.constant dense<0.000000e+00> : vector<16x16xf32>
    %89 = tpu.matmul %84, %86, %cst_23 {dimension_numbers = #tpu.dot_dimension_numbers<[1], [1], [0], [0], [0, 0, 1, 0], [], []>} : vector<16x8xbf16>, vector<16x8xbf16>, vector<16x16xf32> -> vector<16x16xf32>
    %90 = vector.broadcast %11 : vector<1x16xf32> to vector<16x16xf32>
    %91 = arith.addf %89, %90 : vector<16x16xf32>
    %cst_24 = arith.constant dense<0xFF800000> : vector<16xf32>
    %92 = vector.multi_reduction <maximumf>, %91, %cst_24 [1] : vector<16x16xf32> to vector<16xf32>
    %93 = vector.shape_cast %92 : vector<16xf32> to vector<16x1xf32>
    %94 = vector.broadcast %93 : vector<16x1xf32> to vector<16x16xf32>
    %95 = arith.subf %91, %94 : vector<16x16xf32>
    %96 = math.exp %95 : vector<16x16xf32>
    %cst_25 = arith.constant dense<0.000000e+00> : vector<16xf32>
    %97 = vector.multi_reduction <add>, %96, %cst_25 [1] : vector<16x16xf32> to vector<16xf32>
    %98 = vector.shape_cast %97 : vector<16xf32> to vector<16x1xf32>
    %99 = tpu.reciprocal %98 {approx = true} : vector<16x1xf32> -> vector<16x1xf32>
    %100 = arith.truncf %96 : vector<16x16xf32> to vector<16x16xbf16>
    %cst_26 = arith.constant dense<0.000000e+00> : vector<16x8xf32>
    %101 = tpu.matmul %100, %88, %cst_26 {dimension_numbers = #tpu.dot_dimension_numbers<[1], [0], [0], [1], [0, 0, 1, 1], [], []>} : vector<16x16xbf16>, vector<16x8xbf16>, vector<16x8xf32> -> vector<16x8xf32>
    %102 = vector.broadcast %99 : vector<16x1xf32> to vector<16x8xf32>
    %103 = arith.mulf %101, %102 : vector<16x8xf32>
    %104 = tpu.concatenate %34, %57, %80, %103 in 1 : vector<16x8xf32>, vector<16x8xf32>, vector<16x8xf32>, vector<16x8xf32> -> vector<16x32xf32>
    %c0_27 = arith.constant 0 : index
    %c0_28 = arith.constant 0 : index
    %c0_29 = arith.constant 0 : index
    %105 = vector.load %arg3[%c0_27, %c0_28, %c0_29] : memref<1x16x32xf32, #tpu.memory_space<vmem>>, vector<1x16x32xf32>
    %106 = vector.shape_cast %105 : vector<1x16x32xf32> to vector<16x32xf32>
    %107 = vector.shape_cast %104 : vector<16x32xf32> to vector<1x16x32xf32>
    tpu.vector_store %arg3[%c0_27, %c0_28, %c0_29], %107 {strides = array<i32>} : memref<1x16x32xf32, #tpu.memory_space<vmem>>, vector<1x16x32xf32>,
    return
  }
  func.func @transform_0(%arg0: i32) -> (i32, i32, i32) {
    %c0_i32 = arith.constant 0 : i32
    %c0_i32_0 = arith.constant 0 : i32
    %c0_i32_1 = arith.constant 0 : i32
    return %arg0, %c0_i32, %c0_i32_0 : i32, i32, i32
  }
  func.func @transform_1(%arg0: i32) -> (i32, i32, i32) {
    %c0_i32 = arith.constant 0 : i32
    %c0_i32_0 = arith.constant 0 : i32
    %c0_i32_1 = arith.constant 0 : i32
    return %arg0, %c0_i32, %c0_i32_0 : i32, i32, i32
  }
  func.func @transform_2(%arg0: i32) -> (i32, i32, i32) {
    %c0_i32 = arith.constant 0 : i32
    %c0_i32_0 = arith.constant 0 : i32
    %c0_i32_1 = arith.constant 0 : i32
    return %arg0, %c0_i32, %c0_i32_0 : i32, i32, i32
  }
}

module attributes {stable_mosaic.version = 11 : i64} {
  func.func @_linear_kernel(%arg0: i32, %arg1: memref<32x32xf32, #tpu.memory_space<vmem>>, %arg2: memref<32x96xf32, #tpu.memory_space<vmem>>, %arg3: memref<1x96xf32, #tpu.memory_space<vmem>>, %arg4: memref<32x96xf32, #tpu.memory_space<vmem>>) attributes {dimension_semantics = [#tpu.dimension_semantics<parallel>], iteration_bounds = array<i64: 1>, scalar_prefetch = 0 : i64, scratch_operands = 0 : i64, tpu.core_type = #tpu.core_type<tc>, window_params = [{transform_indices = @transform_0, window_bounds = array<i64: 32, 32>}, {pipeline_mode = #tpu.pipeline_mode<synchronous>, transform_indices = @transform_1, window_bounds = array<i64: 32, 96>}, {pipeline_mode = #tpu.pipeline_mode<synchronous>, transform_indices = @transform_2, window_bounds = array<i64: 1, 96>}, {transform_indices = @transform_3, window_bounds = array<i64: 32, 96>}]} {
    %c0 = arith.constant 0 : index
    %c0_0 = arith.constant 0 : index
    %0 = vector.load %arg1[%c0, %c0_0] : memref<32x32xf32, #tpu.memory_space<vmem>>, vector<32x32xf32>
    %1 = arith.truncf %0 : vector<32x32xf32> to vector<32x32xbf16>
    %c0_1 = arith.constant 0 : index
    %c0_2 = arith.constant 0 : index
    %2 = vector.load %arg2[%c0_1, %c0_2] : memref<32x96xf32, #tpu.memory_space<vmem>>, vector<32x96xf32>
    %3 = arith.truncf %2 : vector<32x96xf32> to vector<32x96xbf16>
    %cst = arith.constant dense<0.000000e+00> : vector<32x96xf32>
    %4 = tpu.matmul %1, %3, %cst {dimension_numbers = #tpu.dot_dimension_numbers<[1], [0], [0], [1], [0, 0, 1, 1], [], []>} : vector<32x32xbf16>, vector<32x96xbf16>, vector<32x96xf32> -> vector<32x96xf32>
    %c0_3 = arith.constant 0 : index
    %c0_4 = arith.constant 0 : index
    %5 = vector.load %arg3[%c0_3, %c0_4] : memref<1x96xf32, #tpu.memory_space<vmem>>, vector<1x96xf32>
    %6 = vector.broadcast %5 : vector<1x96xf32> to vector<32x96xf32>
    %7 = arith.addf %4, %6 : vector<32x96xf32>
    %c0_5 = arith.constant 0 : index
    %c0_6 = arith.constant 0 : index
    %8 = vector.load %arg4[%c0_5, %c0_6] : memref<32x96xf32, #tpu.memory_space<vmem>>, vector<32x96xf32>
    tpu.vector_store %arg4[%c0_5, %c0_6], %7 {strides = array<i32>} : memref<32x96xf32, #tpu.memory_space<vmem>>, vector<32x96xf32>,
    return
  }
  func.func @transform_0(%arg0: i32) -> (i32, i32) {
    %c0_i32 = arith.constant 0 : i32
    %c0_i32_0 = arith.constant 0 : i32
    return %arg0, %c0_i32 : i32, i32
  }
  func.func @transform_1(%arg0: i32) -> (i32, i32) {
    %c0_i32 = arith.constant 0 : i32
    %c0_i32_0 = arith.constant 0 : i32
    %c0_i32_1 = arith.constant 0 : i32
    return %c0_i32, %c0_i32_0 : i32, i32
  }
  func.func @transform_2(%arg0: i32) -> (i32, i32) {
    %c0_i32 = arith.constant 0 : i32
    %c0_i32_0 = arith.constant 0 : i32
    %c0_i32_1 = arith.constant 0 : i32
    return %c0_i32, %c0_i32_0 : i32, i32
  }
  func.func @transform_3(%arg0: i32) -> (i32, i32) {
    %c0_i32 = arith.constant 0 : i32
    %c0_i32_0 = arith.constant 0 : i32
    return %arg0, %c0_i32 : i32, i32
  }
}

module attributes {stable_mosaic.version = 11 : i64} {
  func.func @_linear_kernel(%arg0: i32, %arg1: memref<32x32xf32, #tpu.memory_space<vmem>>, %arg2: memref<32x64xf32, #tpu.memory_space<vmem>>, %arg3: memref<1x64xf32, #tpu.memory_space<vmem>>, %arg4: memref<32x64xf32, #tpu.memory_space<vmem>>) attributes {dimension_semantics = [#tpu.dimension_semantics<parallel>], iteration_bounds = array<i64: 1>, scalar_prefetch = 0 : i64, scratch_operands = 0 : i64, tpu.core_type = #tpu.core_type<tc>, window_params = [{transform_indices = @transform_0, window_bounds = array<i64: 32, 32>}, {pipeline_mode = #tpu.pipeline_mode<synchronous>, transform_indices = @transform_1, window_bounds = array<i64: 32, 64>}, {pipeline_mode = #tpu.pipeline_mode<synchronous>, transform_indices = @transform_2, window_bounds = array<i64: 1, 64>}, {transform_indices = @transform_3, window_bounds = array<i64: 32, 64>}]} {
    %c0 = arith.constant 0 : index
    %c0_0 = arith.constant 0 : index
    %0 = vector.load %arg1[%c0, %c0_0] : memref<32x32xf32, #tpu.memory_space<vmem>>, vector<32x32xf32>
    %1 = arith.truncf %0 : vector<32x32xf32> to vector<32x32xbf16>
    %c0_1 = arith.constant 0 : index
    %c0_2 = arith.constant 0 : index
    %2 = vector.load %arg2[%c0_1, %c0_2] : memref<32x64xf32, #tpu.memory_space<vmem>>, vector<32x64xf32>
    %3 = arith.truncf %2 : vector<32x64xf32> to vector<32x64xbf16>
    %cst = arith.constant dense<0.000000e+00> : vector<32x64xf32>
    %4 = tpu.matmul %1, %3, %cst {dimension_numbers = #tpu.dot_dimension_numbers<[1], [0], [0], [1], [0, 0, 1, 1], [], []>} : vector<32x32xbf16>, vector<32x64xbf16>, vector<32x64xf32> -> vector<32x64xf32>
    %c0_3 = arith.constant 0 : index
    %c0_4 = arith.constant 0 : index
    %5 = vector.load %arg3[%c0_3, %c0_4] : memref<1x64xf32, #tpu.memory_space<vmem>>, vector<1x64xf32>
    %6 = vector.broadcast %5 : vector<1x64xf32> to vector<32x64xf32>
    %7 = arith.addf %4, %6 : vector<32x64xf32>
    %c0_5 = arith.constant 0 : index
    %c0_6 = arith.constant 0 : index
    %8 = vector.load %arg4[%c0_5, %c0_6] : memref<32x64xf32, #tpu.memory_space<vmem>>, vector<32x64xf32>
    tpu.vector_store %arg4[%c0_5, %c0_6], %7 {strides = array<i32>} : memref<32x64xf32, #tpu.memory_space<vmem>>, vector<32x64xf32>,
    return
  }
  func.func @transform_0(%arg0: i32) -> (i32, i32) {
    %c0_i32 = arith.constant 0 : i32
    %c0_i32_0 = arith.constant 0 : i32
    return %arg0, %c0_i32 : i32, i32
  }
  func.func @transform_1(%arg0: i32) -> (i32, i32) {
    %c0_i32 = arith.constant 0 : i32
    %c0_i32_0 = arith.constant 0 : i32
    %c0_i32_1 = arith.constant 0 : i32
    return %c0_i32, %c0_i32_0 : i32, i32
  }
  func.func @transform_2(%arg0: i32) -> (i32, i32) {
    %c0_i32 = arith.constant 0 : i32
    %c0_i32_0 = arith.constant 0 : i32
    %c0_i32_1 = arith.constant 0 : i32
    return %c0_i32, %c0_i32_0 : i32, i32
  }
  func.func @transform_3(%arg0: i32) -> (i32, i32) {
    %c0_i32 = arith.constant 0 : i32
    %c0_i32_0 = arith.constant 0 : i32
    return %arg0, %c0_i32 : i32, i32
  }
}

module attributes {stable_mosaic.version = 11 : i64} {
  func.func @_ln_kernel(%arg0: i32, %arg1: memref<32x32xf32, #tpu.memory_space<vmem>>, %arg2: memref<1x32xf32, #tpu.memory_space<vmem>>, %arg3: memref<1x32xf32, #tpu.memory_space<vmem>>, %arg4: memref<32x32xf32, #tpu.memory_space<vmem>>) attributes {dimension_semantics = [#tpu.dimension_semantics<parallel>], iteration_bounds = array<i64: 1>, scalar_prefetch = 0 : i64, scratch_operands = 0 : i64, tpu.core_type = #tpu.core_type<tc>, window_params = [{transform_indices = @transform_0, window_bounds = array<i64: 32, 32>}, {pipeline_mode = #tpu.pipeline_mode<synchronous>, transform_indices = @transform_1, window_bounds = array<i64: 1, 32>}, {pipeline_mode = #tpu.pipeline_mode<synchronous>, transform_indices = @transform_2, window_bounds = array<i64: 1, 32>}, {transform_indices = @transform_3, window_bounds = array<i64: 32, 32>}]} {
    %c0 = arith.constant 0 : index
    %c0_0 = arith.constant 0 : index
    %0 = vector.load %arg1[%c0, %c0_0] : memref<32x32xf32, #tpu.memory_space<vmem>>, vector<32x32xf32>
    %c0_1 = arith.constant 0 : index
    %c0_2 = arith.constant 0 : index
    %1 = vector.load %arg2[%c0_1, %c0_2] : memref<1x32xf32, #tpu.memory_space<vmem>>, vector<1x32xf32>
    %c0_3 = arith.constant 0 : index
    %c0_4 = arith.constant 0 : index
    %2 = vector.load %arg3[%c0_3, %c0_4] : memref<1x32xf32, #tpu.memory_space<vmem>>, vector<1x32xf32>
    %cst = arith.constant dense<0.000000e+00> : vector<32xf32>
    %3 = vector.multi_reduction <add>, %0, %cst [1] : vector<32x32xf32> to vector<32xf32>
    %4 = vector.shape_cast %3 : vector<32xf32> to vector<32x1xf32>
    %cst_5 = arith.constant 3.200000e+01 : f32
    %5 = vector.broadcast %cst_5 : f32 to vector<32x1xf32>
    %6 = arith.divf %4, %5 : vector<32x1xf32>
    %7 = vector.broadcast %6 : vector<32x1xf32> to vector<32x32xf32>
    %8 = arith.subf %0, %7 : vector<32x32xf32>
    %9 = arith.mulf %8, %8 : vector<32x32xf32>
    %cst_6 = arith.constant dense<0.000000e+00> : vector<32xf32>
    %10 = vector.multi_reduction <add>, %9, %cst_6 [1] : vector<32x32xf32> to vector<32xf32>
    %11 = vector.shape_cast %10 : vector<32xf32> to vector<32x1xf32>
    %cst_7 = arith.constant 3.200000e+01 : f32
    %12 = vector.broadcast %cst_7 : f32 to vector<32x1xf32>
    %13 = arith.divf %11, %12 : vector<32x1xf32>
    %cst_8 = arith.constant 9.99999974E-6 : f32
    %14 = vector.broadcast %cst_8 : f32 to vector<32x1xf32>
    %15 = arith.addf %13, %14 : vector<32x1xf32>
    %16 = math.rsqrt %15 : vector<32x1xf32>
    %17 = vector.broadcast %16 : vector<32x1xf32> to vector<32x32xf32>
    %18 = arith.mulf %8, %17 : vector<32x32xf32>
    %19 = vector.broadcast %1 : vector<1x32xf32> to vector<32x32xf32>
    %20 = arith.mulf %18, %19 : vector<32x32xf32>
    %21 = vector.broadcast %2 : vector<1x32xf32> to vector<32x32xf32>
    %22 = arith.addf %20, %21 : vector<32x32xf32>
    %c0_9 = arith.constant 0 : index
    %c0_10 = arith.constant 0 : index
    %23 = vector.load %arg4[%c0_9, %c0_10] : memref<32x32xf32, #tpu.memory_space<vmem>>, vector<32x32xf32>
    tpu.vector_store %arg4[%c0_9, %c0_10], %22 {strides = array<i32>} : memref<32x32xf32, #tpu.memory_space<vmem>>, vector<32x32xf32>,
    return
  }
  func.func @transform_0(%arg0: i32) -> (i32, i32) {
    %c0_i32 = arith.constant 0 : i32
    %c0_i32_0 = arith.constant 0 : i32
    return %arg0, %c0_i32 : i32, i32
  }
  func.func @transform_1(%arg0: i32) -> (i32, i32) {
    %c0_i32 = arith.constant 0 : i32
    %c0_i32_0 = arith.constant 0 : i32
    %c0_i32_1 = arith.constant 0 : i32
    return %c0_i32, %c0_i32_0 : i32, i32
  }
  func.func @transform_2(%arg0: i32) -> (i32, i32) {
    %c0_i32 = arith.constant 0 : i32
    %c0_i32_0 = arith.constant 0 : i32
    %c0_i32_1 = arith.constant 0 : i32
    return %c0_i32, %c0_i32_0 : i32, i32
  }
  func.func @transform_3(%arg0: i32) -> (i32, i32) {
    %c0_i32 = arith.constant 0 : i32
    %c0_i32_0 = arith.constant 0 : i32
    return %arg0, %c0_i32 : i32, i32
  }
}

module attributes {stable_mosaic.version = 11 : i64} {
  func.func @_linear_kernel(%arg0: i32, %arg1: memref<16x32xf32, #tpu.memory_space<vmem>>, %arg2: memref<32x96xf32, #tpu.memory_space<vmem>>, %arg3: memref<1x96xf32, #tpu.memory_space<vmem>>, %arg4: memref<16x96xf32, #tpu.memory_space<vmem>>) attributes {dimension_semantics = [#tpu.dimension_semantics<parallel>], iteration_bounds = array<i64: 1>, scalar_prefetch = 0 : i64, scratch_operands = 0 : i64, tpu.core_type = #tpu.core_type<tc>, window_params = [{transform_indices = @transform_0, window_bounds = array<i64: 16, 32>}, {pipeline_mode = #tpu.pipeline_mode<synchronous>, transform_indices = @transform_1, window_bounds = array<i64: 32, 96>}, {pipeline_mode = #tpu.pipeline_mode<synchronous>, transform_indices = @transform_2, window_bounds = array<i64: 1, 96>}, {transform_indices = @transform_3, window_bounds = array<i64: 16, 96>}]} {
    %c0 = arith.constant 0 : index
    %c0_0 = arith.constant 0 : index
    %0 = vector.load %arg1[%c0, %c0_0] : memref<16x32xf32, #tpu.memory_space<vmem>>, vector<16x32xf32>
    %1 = arith.truncf %0 : vector<16x32xf32> to vector<16x32xbf16>
    %c0_1 = arith.constant 0 : index
    %c0_2 = arith.constant 0 : index
    %2 = vector.load %arg2[%c0_1, %c0_2] : memref<32x96xf32, #tpu.memory_space<vmem>>, vector<32x96xf32>
    %3 = arith.truncf %2 : vector<32x96xf32> to vector<32x96xbf16>
    %cst = arith.constant dense<0.000000e+00> : vector<16x96xf32>
    %4 = tpu.matmul %1, %3, %cst {dimension_numbers = #tpu.dot_dimension_numbers<[1], [0], [0], [1], [0, 0, 1, 1], [], []>} : vector<16x32xbf16>, vector<32x96xbf16>, vector<16x96xf32> -> vector<16x96xf32>
    %c0_3 = arith.constant 0 : index
    %c0_4 = arith.constant 0 : index
    %5 = vector.load %arg3[%c0_3, %c0_4] : memref<1x96xf32, #tpu.memory_space<vmem>>, vector<1x96xf32>
    %6 = vector.broadcast %5 : vector<1x96xf32> to vector<16x96xf32>
    %7 = arith.addf %4, %6 : vector<16x96xf32>
    %c0_5 = arith.constant 0 : index
    %c0_6 = arith.constant 0 : index
    %8 = vector.load %arg4[%c0_5, %c0_6] : memref<16x96xf32, #tpu.memory_space<vmem>>, vector<16x96xf32>
    tpu.vector_store %arg4[%c0_5, %c0_6], %7 {strides = array<i32>} : memref<16x96xf32, #tpu.memory_space<vmem>>, vector<16x96xf32>,
    return
  }
  func.func @transform_0(%arg0: i32) -> (i32, i32) {
    %c0_i32 = arith.constant 0 : i32
    %c0_i32_0 = arith.constant 0 : i32
    return %arg0, %c0_i32 : i32, i32
  }
  func.func @transform_1(%arg0: i32) -> (i32, i32) {
    %c0_i32 = arith.constant 0 : i32
    %c0_i32_0 = arith.constant 0 : i32
    %c0_i32_1 = arith.constant 0 : i32
    return %c0_i32, %c0_i32_0 : i32, i32
  }
  func.func @transform_2(%arg0: i32) -> (i32, i32) {
    %c0_i32 = arith.constant 0 : i32
    %c0_i32_0 = arith.constant 0 : i32
    %c0_i32_1 = arith.constant 0 : i32
    return %c0_i32, %c0_i32_0 : i32, i32
  }
  func.func @transform_3(%arg0: i32) -> (i32, i32) {
    %c0_i32 = arith.constant 0 : i32
    %c0_i32_0 = arith.constant 0 : i32
    return %arg0, %c0_i32 : i32, i32
  }
}

module attributes {stable_mosaic.version = 11 : i64} {
  func.func @_self_mha_kernel(%arg0: i32, %arg1: memref<1x8x96xf32, #tpu.memory_space<vmem>>, %arg2: memref<1x1x8xf32, #tpu.memory_space<vmem>>, %arg3: memref<1x8x32xf32, #tpu.memory_space<vmem>>) attributes {dimension_semantics = [#tpu.dimension_semantics<parallel>], iteration_bounds = array<i64: 2>, scalar_prefetch = 0 : i64, scratch_operands = 0 : i64, tpu.core_type = #tpu.core_type<tc>, window_params = [{transform_indices = @transform_0, window_bounds = array<i64: 1, 8, 96>}, {transform_indices = @transform_1, window_bounds = array<i64: 1, 1, 8>}, {transform_indices = @transform_2, window_bounds = array<i64: 1, 8, 32>}]} {
    %c0 = arith.constant 0 : index
    %c0_0 = arith.constant 0 : index
    %c0_1 = arith.constant 0 : index
    %0 = vector.load %arg1[%c0, %c0_0, %c0_1] : memref<1x8x96xf32, #tpu.memory_space<vmem>>, vector<1x8x96xf32>
    %1 = vector.shape_cast %0 : vector<1x8x96xf32> to vector<8x96xf32>
    %2 = vector.extract_strided_slice %1 {offsets = [0, 0], sizes = [8, 32], strides = [1, 1]} : vector<8x96xf32> to vector<8x32xf32>
    %3 = vector.extract_strided_slice %1 {offsets = [0, 32], sizes = [8, 32], strides = [1, 1]} : vector<8x96xf32> to vector<8x32xf32>
    %4 = vector.extract_strided_slice %1 {offsets = [0, 64], sizes = [8, 32], strides = [1, 1]} : vector<8x96xf32> to vector<8x32xf32>
    %c0_2 = arith.constant 0 : index
    %c0_3 = arith.constant 0 : index
    %c0_4 = arith.constant 0 : index
    %5 = vector.load %arg2[%c0_2, %c0_3, %c0_4] : memref<1x1x8xf32, #tpu.memory_space<vmem>>, vector<1x1x8xf32>
    %6 = vector.shape_cast %5 : vector<1x1x8xf32> to vector<1x8xf32>
    %cst = arith.constant 5.000000e-01 : f32
    %7 = vector.broadcast %cst : f32 to vector<1x8xf32>
    %8 = arith.cmpf ogt, %6, %7 : vector<1x8xf32>
    %cst_5 = arith.constant -1.000000e+30 : f32
    %cst_6 = arith.constant 0.000000e+00 : f32
    %9 = vector.broadcast %cst_5 : f32 to vector<1x8xf32>
    %10 = vector.broadcast %cst_6 : f32 to vector<1x8xf32>
    %11 = arith.select %8, %9, %10 : vector<1x8xi1>, vector<1x8xf32>
    %12 = tpu.iota {dimensions = array<i32: 0>} : vector<8x8xi32>
    %13 = tpu.iota {dimensions = array<i32: 1>} : vector<8x8xi32>
    %14 = arith.cmpi sgt, %13, %12 : vector<8x8xi32>
    %cst_7 = arith.constant -1.000000e+30 : f32
    %15 = vector.broadcast %cst_7 : f32 to vector<8x8xf32>
    %16 = vector.shape_cast %11 : vector<1x8xf32> to vector<1x8xf32>
    %17 = vector.broadcast %16 : vector<1x8xf32> to vector<8x8xf32>
    %18 = arith.select %14, %15, %17 : vector<8x8xi1>, vector<8x8xf32>
    %19 = vector.extract_strided_slice %2 {offsets = [0, 0], sizes = [8, 8], strides = [1, 1]} : vector<8x32xf32> to vector<8x8xf32>
    %cst_8 = arith.constant 0.353553385 : f32
    %20 = vector.broadcast %cst_8 : f32 to vector<8x8xf32>
    %21 = arith.mulf %19, %20 : vector<8x8xf32>
    %22 = arith.truncf %21 : vector<8x8xf32> to vector<8x8xbf16>
    %23 = vector.extract_strided_slice %3 {offsets = [0, 0], sizes = [8, 8], strides = [1, 1]} : vector<8x32xf32> to vector<8x8xf32>
    %24 = arith.truncf %23 : vector<8x8xf32> to vector<8x8xbf16>
    %25 = vector.extract_strided_slice %4 {offsets = [0, 0], sizes = [8, 8], strides = [1, 1]} : vector<8x32xf32> to vector<8x8xf32>
    %26 = arith.truncf %25 : vector<8x8xf32> to vector<8x8xbf16>
    %cst_9 = arith.constant dense<0.000000e+00> : vector<8x8xf32>
    %27 = tpu.matmul %22, %24, %cst_9 {dimension_numbers = #tpu.dot_dimension_numbers<[1], [1], [0], [0], [0, 0, 1, 0], [], []>} : vector<8x8xbf16>, vector<8x8xbf16>, vector<8x8xf32> -> vector<8x8xf32>
    %28 = arith.addf %27, %18 : vector<8x8xf32>
    %cst_10 = arith.constant dense<0xFF800000> : vector<8xf32>
    %29 = vector.multi_reduction <maximumf>, %28, %cst_10 [1] : vector<8x8xf32> to vector<8xf32>
    %30 = vector.shape_cast %29 : vector<8xf32> to vector<8x1xf32>
    %31 = vector.broadcast %30 : vector<8x1xf32> to vector<8x8xf32>
    %32 = arith.subf %28, %31 : vector<8x8xf32>
    %33 = math.exp %32 : vector<8x8xf32>
    %cst_11 = arith.constant dense<0.000000e+00> : vector<8xf32>
    %34 = vector.multi_reduction <add>, %33, %cst_11 [1] : vector<8x8xf32> to vector<8xf32>
    %35 = vector.shape_cast %34 : vector<8xf32> to vector<8x1xf32>
    %36 = tpu.reciprocal %35 {approx = true} : vector<8x1xf32> -> vector<8x1xf32>
    %37 = arith.truncf %33 : vector<8x8xf32> to vector<8x8xbf16>
    %cst_12 = arith.constant dense<0.000000e+00> : vector<8x8xf32>
    %38 = tpu.matmul %37, %26, %cst_12 {dimension_numbers = #tpu.dot_dimension_numbers<[1], [0], [0], [1], [0, 0, 1, 1], [], []>} : vector<8x8xbf16>, vector<8x8xbf16>, vector<8x8xf32> -> vector<8x8xf32>
    %39 = vector.broadcast %36 : vector<8x1xf32> to vector<8x8xf32>
    %40 = arith.mulf %38, %39 : vector<8x8xf32>
    %41 = vector.extract_strided_slice %2 {offsets = [0, 8], sizes = [8, 8], strides = [1, 1]} : vector<8x32xf32> to vector<8x8xf32>
    %cst_13 = arith.constant 0.353553385 : f32
    %42 = vector.broadcast %cst_13 : f32 to vector<8x8xf32>
    %43 = arith.mulf %41, %42 : vector<8x8xf32>
    %44 = arith.truncf %43 : vector<8x8xf32> to vector<8x8xbf16>
    %45 = vector.extract_strided_slice %3 {offsets = [0, 8], sizes = [8, 8], strides = [1, 1]} : vector<8x32xf32> to vector<8x8xf32>
    %46 = arith.truncf %45 : vector<8x8xf32> to vector<8x8xbf16>
    %47 = vector.extract_strided_slice %4 {offsets = [0, 8], sizes = [8, 8], strides = [1, 1]} : vector<8x32xf32> to vector<8x8xf32>
    %48 = arith.truncf %47 : vector<8x8xf32> to vector<8x8xbf16>
    %cst_14 = arith.constant dense<0.000000e+00> : vector<8x8xf32>
    %49 = tpu.matmul %44, %46, %cst_14 {dimension_numbers = #tpu.dot_dimension_numbers<[1], [1], [0], [0], [0, 0, 1, 0], [], []>} : vector<8x8xbf16>, vector<8x8xbf16>, vector<8x8xf32> -> vector<8x8xf32>
    %50 = arith.addf %49, %18 : vector<8x8xf32>
    %cst_15 = arith.constant dense<0xFF800000> : vector<8xf32>
    %51 = vector.multi_reduction <maximumf>, %50, %cst_15 [1] : vector<8x8xf32> to vector<8xf32>
    %52 = vector.shape_cast %51 : vector<8xf32> to vector<8x1xf32>
    %53 = vector.broadcast %52 : vector<8x1xf32> to vector<8x8xf32>
    %54 = arith.subf %50, %53 : vector<8x8xf32>
    %55 = math.exp %54 : vector<8x8xf32>
    %cst_16 = arith.constant dense<0.000000e+00> : vector<8xf32>
    %56 = vector.multi_reduction <add>, %55, %cst_16 [1] : vector<8x8xf32> to vector<8xf32>
    %57 = vector.shape_cast %56 : vector<8xf32> to vector<8x1xf32>
    %58 = tpu.reciprocal %57 {approx = true} : vector<8x1xf32> -> vector<8x1xf32>
    %59 = arith.truncf %55 : vector<8x8xf32> to vector<8x8xbf16>
    %cst_17 = arith.constant dense<0.000000e+00> : vector<8x8xf32>
    %60 = tpu.matmul %59, %48, %cst_17 {dimension_numbers = #tpu.dot_dimension_numbers<[1], [0], [0], [1], [0, 0, 1, 1], [], []>} : vector<8x8xbf16>, vector<8x8xbf16>, vector<8x8xf32> -> vector<8x8xf32>
    %61 = vector.broadcast %58 : vector<8x1xf32> to vector<8x8xf32>
    %62 = arith.mulf %60, %61 : vector<8x8xf32>
    %63 = vector.extract_strided_slice %2 {offsets = [0, 16], sizes = [8, 8], strides = [1, 1]} : vector<8x32xf32> to vector<8x8xf32>
    %cst_18 = arith.constant 0.353553385 : f32
    %64 = vector.broadcast %cst_18 : f32 to vector<8x8xf32>
    %65 = arith.mulf %63, %64 : vector<8x8xf32>
    %66 = arith.truncf %65 : vector<8x8xf32> to vector<8x8xbf16>
    %67 = vector.extract_strided_slice %3 {offsets = [0, 16], sizes = [8, 8], strides = [1, 1]} : vector<8x32xf32> to vector<8x8xf32>
    %68 = arith.truncf %67 : vector<8x8xf32> to vector<8x8xbf16>
    %69 = vector.extract_strided_slice %4 {offsets = [0, 16], sizes = [8, 8], strides = [1, 1]} : vector<8x32xf32> to vector<8x8xf32>
    %70 = arith.truncf %69 : vector<8x8xf32> to vector<8x8xbf16>
    %cst_19 = arith.constant dense<0.000000e+00> : vector<8x8xf32>
    %71 = tpu.matmul %66, %68, %cst_19 {dimension_numbers = #tpu.dot_dimension_numbers<[1], [1], [0], [0], [0, 0, 1, 0], [], []>} : vector<8x8xbf16>, vector<8x8xbf16>, vector<8x8xf32> -> vector<8x8xf32>
    %72 = arith.addf %71, %18 : vector<8x8xf32>
    %cst_20 = arith.constant dense<0xFF800000> : vector<8xf32>
    %73 = vector.multi_reduction <maximumf>, %72, %cst_20 [1] : vector<8x8xf32> to vector<8xf32>
    %74 = vector.shape_cast %73 : vector<8xf32> to vector<8x1xf32>
    %75 = vector.broadcast %74 : vector<8x1xf32> to vector<8x8xf32>
    %76 = arith.subf %72, %75 : vector<8x8xf32>
    %77 = math.exp %76 : vector<8x8xf32>
    %cst_21 = arith.constant dense<0.000000e+00> : vector<8xf32>
    %78 = vector.multi_reduction <add>, %77, %cst_21 [1] : vector<8x8xf32> to vector<8xf32>
    %79 = vector.shape_cast %78 : vector<8xf32> to vector<8x1xf32>
    %80 = tpu.reciprocal %79 {approx = true} : vector<8x1xf32> -> vector<8x1xf32>
    %81 = arith.truncf %77 : vector<8x8xf32> to vector<8x8xbf16>
    %cst_22 = arith.constant dense<0.000000e+00> : vector<8x8xf32>
    %82 = tpu.matmul %81, %70, %cst_22 {dimension_numbers = #tpu.dot_dimension_numbers<[1], [0], [0], [1], [0, 0, 1, 1], [], []>} : vector<8x8xbf16>, vector<8x8xbf16>, vector<8x8xf32> -> vector<8x8xf32>
    %83 = vector.broadcast %80 : vector<8x1xf32> to vector<8x8xf32>
    %84 = arith.mulf %82, %83 : vector<8x8xf32>
    %85 = vector.extract_strided_slice %2 {offsets = [0, 24], sizes = [8, 8], strides = [1, 1]} : vector<8x32xf32> to vector<8x8xf32>
    %cst_23 = arith.constant 0.353553385 : f32
    %86 = vector.broadcast %cst_23 : f32 to vector<8x8xf32>
    %87 = arith.mulf %85, %86 : vector<8x8xf32>
    %88 = arith.truncf %87 : vector<8x8xf32> to vector<8x8xbf16>
    %89 = vector.extract_strided_slice %3 {offsets = [0, 24], sizes = [8, 8], strides = [1, 1]} : vector<8x32xf32> to vector<8x8xf32>
    %90 = arith.truncf %89 : vector<8x8xf32> to vector<8x8xbf16>
    %91 = vector.extract_strided_slice %4 {offsets = [0, 24], sizes = [8, 8], strides = [1, 1]} : vector<8x32xf32> to vector<8x8xf32>
    %92 = arith.truncf %91 : vector<8x8xf32> to vector<8x8xbf16>
    %cst_24 = arith.constant dense<0.000000e+00> : vector<8x8xf32>
    %93 = tpu.matmul %88, %90, %cst_24 {dimension_numbers = #tpu.dot_dimension_numbers<[1], [1], [0], [0], [0, 0, 1, 0], [], []>} : vector<8x8xbf16>, vector<8x8xbf16>, vector<8x8xf32> -> vector<8x8xf32>
    %94 = arith.addf %93, %18 : vector<8x8xf32>
    %cst_25 = arith.constant dense<0xFF800000> : vector<8xf32>
    %95 = vector.multi_reduction <maximumf>, %94, %cst_25 [1] : vector<8x8xf32> to vector<8xf32>
    %96 = vector.shape_cast %95 : vector<8xf32> to vector<8x1xf32>
    %97 = vector.broadcast %96 : vector<8x1xf32> to vector<8x8xf32>
    %98 = arith.subf %94, %97 : vector<8x8xf32>
    %99 = math.exp %98 : vector<8x8xf32>
    %cst_26 = arith.constant dense<0.000000e+00> : vector<8xf32>
    %100 = vector.multi_reduction <add>, %99, %cst_26 [1] : vector<8x8xf32> to vector<8xf32>
    %101 = vector.shape_cast %100 : vector<8xf32> to vector<8x1xf32>
    %102 = tpu.reciprocal %101 {approx = true} : vector<8x1xf32> -> vector<8x1xf32>
    %103 = arith.truncf %99 : vector<8x8xf32> to vector<8x8xbf16>
    %cst_27 = arith.constant dense<0.000000e+00> : vector<8x8xf32>
    %104 = tpu.matmul %103, %92, %cst_27 {dimension_numbers = #tpu.dot_dimension_numbers<[1], [0], [0], [1], [0, 0, 1, 1], [], []>} : vector<8x8xbf16>, vector<8x8xbf16>, vector<8x8xf32> -> vector<8x8xf32>
    %105 = vector.broadcast %102 : vector<8x1xf32> to vector<8x8xf32>
    %106 = arith.mulf %104, %105 : vector<8x8xf32>
    %107 = tpu.concatenate %40, %62, %84, %106 in 1 : vector<8x8xf32>, vector<8x8xf32>, vector<8x8xf32>, vector<8x8xf32> -> vector<8x32xf32>
    %c0_28 = arith.constant 0 : index
    %c0_29 = arith.constant 0 : index
    %c0_30 = arith.constant 0 : index
    %108 = vector.load %arg3[%c0_28, %c0_29, %c0_30] : memref<1x8x32xf32, #tpu.memory_space<vmem>>, vector<1x8x32xf32>
    %109 = vector.shape_cast %108 : vector<1x8x32xf32> to vector<8x32xf32>
    %110 = vector.shape_cast %107 : vector<8x32xf32> to vector<1x8x32xf32>
    tpu.vector_store %arg3[%c0_28, %c0_29, %c0_30], %110 {strides = array<i32>} : memref<1x8x32xf32, #tpu.memory_space<vmem>>, vector<1x8x32xf32>,
    return
  }
  func.func @transform_0(%arg0: i32) -> (i32, i32, i32) {
    %c0_i32 = arith.constant 0 : i32
    %c0_i32_0 = arith.constant 0 : i32
    %c0_i32_1 = arith.constant 0 : i32
    return %arg0, %c0_i32, %c0_i32_0 : i32, i32, i32
  }
  func.func @transform_1(%arg0: i32) -> (i32, i32, i32) {
    %c0_i32 = arith.constant 0 : i32
    %c0_i32_0 = arith.constant 0 : i32
    %c0_i32_1 = arith.constant 0 : i32
    return %arg0, %c0_i32, %c0_i32_0 : i32, i32, i32
  }
  func.func @transform_2(%arg0: i32) -> (i32, i32, i32) {
    %c0_i32 = arith.constant 0 : i32
    %c0_i32_0 = arith.constant 0 : i32
    %c0_i32_1 = arith.constant 0 : i32
    return %arg0, %c0_i32, %c0_i32_0 : i32, i32, i32
  }
}

module attributes {stable_mosaic.version = 11 : i64} {
  func.func @_proj_add_ln_kernel(%arg0: i32, %arg1: memref<16x32xf32, #tpu.memory_space<vmem>>, %arg2: memref<16x32xf32, #tpu.memory_space<vmem>>, %arg3: memref<32x32xf32, #tpu.memory_space<vmem>>, %arg4: memref<1x32xf32, #tpu.memory_space<vmem>>, %arg5: memref<1x32xf32, #tpu.memory_space<vmem>>, %arg6: memref<1x32xf32, #tpu.memory_space<vmem>>, %arg7: memref<16x32xf32, #tpu.memory_space<vmem>>) attributes {dimension_semantics = [#tpu.dimension_semantics<parallel>], iteration_bounds = array<i64: 1>, scalar_prefetch = 0 : i64, scratch_operands = 0 : i64, tpu.core_type = #tpu.core_type<tc>, window_params = [{transform_indices = @transform_0, window_bounds = array<i64: 16, 32>}, {transform_indices = @transform_1, window_bounds = array<i64: 16, 32>}, {pipeline_mode = #tpu.pipeline_mode<synchronous>, transform_indices = @transform_2, window_bounds = array<i64: 32, 32>}, {pipeline_mode = #tpu.pipeline_mode<synchronous>, transform_indices = @transform_3, window_bounds = array<i64: 1, 32>}, {pipeline_mode = #tpu.pipeline_mode<synchronous>, transform_indices = @transform_4, window_bounds = array<i64: 1, 32>}, {pipeline_mode = #tpu.pipeline_mode<synchronous>, transform_indices = @transform_5, window_bounds = array<i64: 1, 32>}, {transform_indices = @transform_6, window_bounds = array<i64: 16, 32>}]} {
    %c0 = arith.constant 0 : index
    %c0_0 = arith.constant 0 : index
    %0 = vector.load %arg1[%c0, %c0_0] : memref<16x32xf32, #tpu.memory_space<vmem>>, vector<16x32xf32>
    %1 = arith.truncf %0 : vector<16x32xf32> to vector<16x32xbf16>
    %c0_1 = arith.constant 0 : index
    %c0_2 = arith.constant 0 : index
    %2 = vector.load %arg3[%c0_1, %c0_2] : memref<32x32xf32, #tpu.memory_space<vmem>>, vector<32x32xf32>
    %3 = arith.truncf %2 : vector<32x32xf32> to vector<32x32xbf16>
    %cst = arith.constant dense<0.000000e+00> : vector<16x32xf32>
    %4 = tpu.matmul %1, %3, %cst {dimension_numbers = #tpu.dot_dimension_numbers<[1], [0], [0], [1], [0, 0, 1, 1], [], []>} : vector<16x32xbf16>, vector<32x32xbf16>, vector<16x32xf32> -> vector<16x32xf32>
    %c0_3 = arith.constant 0 : index
    %c0_4 = arith.constant 0 : index
    %5 = vector.load %arg4[%c0_3, %c0_4] : memref<1x32xf32, #tpu.memory_space<vmem>>, vector<1x32xf32>
    %6 = vector.broadcast %5 : vector<1x32xf32> to vector<16x32xf32>
    %7 = arith.addf %4, %6 : vector<16x32xf32>
    %c0_5 = arith.constant 0 : index
    %c0_6 = arith.constant 0 : index
    %8 = vector.load %arg2[%c0_5, %c0_6] : memref<16x32xf32, #tpu.memory_space<vmem>>, vector<16x32xf32>
    %9 = arith.addf %7, %8 : vector<16x32xf32>
    %c0_7 = arith.constant 0 : index
    %c0_8 = arith.constant 0 : index
    %10 = vector.load %arg5[%c0_7, %c0_8] : memref<1x32xf32, #tpu.memory_space<vmem>>, vector<1x32xf32>
    %c0_9 = arith.constant 0 : index
    %c0_10 = arith.constant 0 : index
    %11 = vector.load %arg6[%c0_9, %c0_10] : memref<1x32xf32, #tpu.memory_space<vmem>>, vector<1x32xf32>
    %cst_11 = arith.constant dense<0.000000e+00> : vector<16xf32>
    %12 = vector.multi_reduction <add>, %9, %cst_11 [1] : vector<16x32xf32> to vector<16xf32>
    %13 = vector.shape_cast %12 : vector<16xf32> to vector<16x1xf32>
    %cst_12 = arith.constant 3.200000e+01 : f32
    %14 = vector.broadcast %cst_12 : f32 to vector<16x1xf32>
    %15 = arith.divf %13, %14 : vector<16x1xf32>
    %16 = vector.broadcast %15 : vector<16x1xf32> to vector<16x32xf32>
    %17 = arith.subf %9, %16 : vector<16x32xf32>
    %18 = arith.mulf %17, %17 : vector<16x32xf32>
    %cst_13 = arith.constant dense<0.000000e+00> : vector<16xf32>
    %19 = vector.multi_reduction <add>, %18, %cst_13 [1] : vector<16x32xf32> to vector<16xf32>
    %20 = vector.shape_cast %19 : vector<16xf32> to vector<16x1xf32>
    %cst_14 = arith.constant 3.200000e+01 : f32
    %21 = vector.broadcast %cst_14 : f32 to vector<16x1xf32>
    %22 = arith.divf %20, %21 : vector<16x1xf32>
    %cst_15 = arith.constant 9.99999974E-6 : f32
    %23 = vector.broadcast %cst_15 : f32 to vector<16x1xf32>
    %24 = arith.addf %22, %23 : vector<16x1xf32>
    %25 = math.rsqrt %24 : vector<16x1xf32>
    %26 = vector.broadcast %25 : vector<16x1xf32> to vector<16x32xf32>
    %27 = arith.mulf %17, %26 : vector<16x32xf32>
    %28 = vector.broadcast %10 : vector<1x32xf32> to vector<16x32xf32>
    %29 = arith.mulf %27, %28 : vector<16x32xf32>
    %30 = vector.broadcast %11 : vector<1x32xf32> to vector<16x32xf32>
    %31 = arith.addf %29, %30 : vector<16x32xf32>
    %c0_16 = arith.constant 0 : index
    %c0_17 = arith.constant 0 : index
    %32 = vector.load %arg7[%c0_16, %c0_17] : memref<16x32xf32, #tpu.memory_space<vmem>>, vector<16x32xf32>
    tpu.vector_store %arg7[%c0_16, %c0_17], %31 {strides = array<i32>} : memref<16x32xf32, #tpu.memory_space<vmem>>, vector<16x32xf32>,
    return
  }
  func.func @transform_0(%arg0: i32) -> (i32, i32) {
    %c0_i32 = arith.constant 0 : i32
    %c0_i32_0 = arith.constant 0 : i32
    return %arg0, %c0_i32 : i32, i32
  }
  func.func @transform_1(%arg0: i32) -> (i32, i32) {
    %c0_i32 = arith.constant 0 : i32
    %c0_i32_0 = arith.constant 0 : i32
    return %arg0, %c0_i32 : i32, i32
  }
  func.func @transform_2(%arg0: i32) -> (i32, i32) {
    %c0_i32 = arith.constant 0 : i32
    %c0_i32_0 = arith.constant 0 : i32
    %c0_i32_1 = arith.constant 0 : i32
    return %c0_i32, %c0_i32_0 : i32, i32
  }
  func.func @transform_3(%arg0: i32) -> (i32, i32) {
    %c0_i32 = arith.constant 0 : i32
    %c0_i32_0 = arith.constant 0 : i32
    %c0_i32_1 = arith.constant 0 : i32
    return %c0_i32, %c0_i32_0 : i32, i32
  }
  func.func @transform_4(%arg0: i32) -> (i32, i32) {
    %c0_i32 = arith.constant 0 : i32
    %c0_i32_0 = arith.constant 0 : i32
    %c0_i32_1 = arith.constant 0 : i32
    return %c0_i32, %c0_i32_0 : i32, i32
  }
  func.func @transform_5(%arg0: i32) -> (i32, i32) {
    %c0_i32 = arith.constant 0 : i32
    %c0_i32_0 = arith.constant 0 : i32
    %c0_i32_1 = arith.constant 0 : i32
    return %c0_i32, %c0_i32_0 : i32, i32
  }
  func.func @transform_6(%arg0: i32) -> (i32, i32) {
    %c0_i32 = arith.constant 0 : i32
    %c0_i32_0 = arith.constant 0 : i32
    return %arg0, %c0_i32 : i32, i32
  }
}

module attributes {stable_mosaic.version = 11 : i64} {
  func.func @_linear_kernel(%arg0: i32, %arg1: memref<16x32xf32, #tpu.memory_space<vmem>>, %arg2: memref<32x32xf32, #tpu.memory_space<vmem>>, %arg3: memref<1x32xf32, #tpu.memory_space<vmem>>, %arg4: memref<16x32xf32, #tpu.memory_space<vmem>>) attributes {dimension_semantics = [#tpu.dimension_semantics<parallel>], iteration_bounds = array<i64: 1>, scalar_prefetch = 0 : i64, scratch_operands = 0 : i64, tpu.core_type = #tpu.core_type<tc>, window_params = [{transform_indices = @transform_0, window_bounds = array<i64: 16, 32>}, {pipeline_mode = #tpu.pipeline_mode<synchronous>, transform_indices = @transform_1, window_bounds = array<i64: 32, 32>}, {pipeline_mode = #tpu.pipeline_mode<synchronous>, transform_indices = @transform_2, window_bounds = array<i64: 1, 32>}, {transform_indices = @transform_3, window_bounds = array<i64: 16, 32>}]} {
    %c0 = arith.constant 0 : index
    %c0_0 = arith.constant 0 : index
    %0 = vector.load %arg1[%c0, %c0_0] : memref<16x32xf32, #tpu.memory_space<vmem>>, vector<16x32xf32>
    %1 = arith.truncf %0 : vector<16x32xf32> to vector<16x32xbf16>
    %c0_1 = arith.constant 0 : index
    %c0_2 = arith.constant 0 : index
    %2 = vector.load %arg2[%c0_1, %c0_2] : memref<32x32xf32, #tpu.memory_space<vmem>>, vector<32x32xf32>
    %3 = arith.truncf %2 : vector<32x32xf32> to vector<32x32xbf16>
    %cst = arith.constant dense<0.000000e+00> : vector<16x32xf32>
    %4 = tpu.matmul %1, %3, %cst {dimension_numbers = #tpu.dot_dimension_numbers<[1], [0], [0], [1], [0, 0, 1, 1], [], []>} : vector<16x32xbf16>, vector<32x32xbf16>, vector<16x32xf32> -> vector<16x32xf32>
    %c0_3 = arith.constant 0 : index
    %c0_4 = arith.constant 0 : index
    %5 = vector.load %arg3[%c0_3, %c0_4] : memref<1x32xf32, #tpu.memory_space<vmem>>, vector<1x32xf32>
    %6 = vector.broadcast %5 : vector<1x32xf32> to vector<16x32xf32>
    %7 = arith.addf %4, %6 : vector<16x32xf32>
    %c0_5 = arith.constant 0 : index
    %c0_6 = arith.constant 0 : index
    %8 = vector.load %arg4[%c0_5, %c0_6] : memref<16x32xf32, #tpu.memory_space<vmem>>, vector<16x32xf32>
    tpu.vector_store %arg4[%c0_5, %c0_6], %7 {strides = array<i32>} : memref<16x32xf32, #tpu.memory_space<vmem>>, vector<16x32xf32>,
    return
  }
  func.func @transform_0(%arg0: i32) -> (i32, i32) {
    %c0_i32 = arith.constant 0 : i32
    %c0_i32_0 = arith.constant 0 : i32
    return %arg0, %c0_i32 : i32, i32
  }
  func.func @transform_1(%arg0: i32) -> (i32, i32) {
    %c0_i32 = arith.constant 0 : i32
    %c0_i32_0 = arith.constant 0 : i32
    %c0_i32_1 = arith.constant 0 : i32
    return %c0_i32, %c0_i32_0 : i32, i32
  }
  func.func @transform_2(%arg0: i32) -> (i32, i32) {
    %c0_i32 = arith.constant 0 : i32
    %c0_i32_0 = arith.constant 0 : i32
    %c0_i32_1 = arith.constant 0 : i32
    return %c0_i32, %c0_i32_0 : i32, i32
  }
  func.func @transform_3(%arg0: i32) -> (i32, i32) {
    %c0_i32 = arith.constant 0 : i32
    %c0_i32_0 = arith.constant 0 : i32
    return %arg0, %c0_i32 : i32, i32
  }
}

module attributes {stable_mosaic.version = 11 : i64} {
  func.func @_cross_mha_kernel(%arg0: i32, %arg1: memref<1x8x32xf32, #tpu.memory_space<vmem>>, %arg2: memref<1x16x64xf32, #tpu.memory_space<vmem>>, %arg3: memref<1x1x16xf32, #tpu.memory_space<vmem>>, %arg4: memref<1x8x32xf32, #tpu.memory_space<vmem>>) attributes {dimension_semantics = [#tpu.dimension_semantics<parallel>], iteration_bounds = array<i64: 2>, scalar_prefetch = 0 : i64, scratch_operands = 0 : i64, tpu.core_type = #tpu.core_type<tc>, window_params = [{transform_indices = @transform_0, window_bounds = array<i64: 1, 8, 32>}, {transform_indices = @transform_1, window_bounds = array<i64: 1, 16, 64>}, {transform_indices = @transform_2, window_bounds = array<i64: 1, 1, 16>}, {transform_indices = @transform_3, window_bounds = array<i64: 1, 8, 32>}]} {
    %c0 = arith.constant 0 : index
    %c0_0 = arith.constant 0 : index
    %c0_1 = arith.constant 0 : index
    %0 = vector.load %arg1[%c0, %c0_0, %c0_1] : memref<1x8x32xf32, #tpu.memory_space<vmem>>, vector<1x8x32xf32>
    %1 = vector.shape_cast %0 : vector<1x8x32xf32> to vector<8x32xf32>
    %c0_2 = arith.constant 0 : index
    %c0_3 = arith.constant 0 : index
    %c0_4 = arith.constant 0 : index
    %2 = vector.load %arg2[%c0_2, %c0_3, %c0_4] : memref<1x16x64xf32, #tpu.memory_space<vmem>>, vector<1x16x64xf32>
    %3 = vector.shape_cast %2 : vector<1x16x64xf32> to vector<16x64xf32>
    %4 = vector.extract_strided_slice %3 {offsets = [0, 0], sizes = [16, 32], strides = [1, 1]} : vector<16x64xf32> to vector<16x32xf32>
    %5 = vector.extract_strided_slice %3 {offsets = [0, 32], sizes = [16, 32], strides = [1, 1]} : vector<16x64xf32> to vector<16x32xf32>
    %c0_5 = arith.constant 0 : index
    %c0_6 = arith.constant 0 : index
    %c0_7 = arith.constant 0 : index
    %6 = vector.load %arg3[%c0_5, %c0_6, %c0_7] : memref<1x1x16xf32, #tpu.memory_space<vmem>>, vector<1x1x16xf32>
    %7 = vector.shape_cast %6 : vector<1x1x16xf32> to vector<1x16xf32>
    %cst = arith.constant 5.000000e-01 : f32
    %8 = vector.broadcast %cst : f32 to vector<1x16xf32>
    %9 = arith.cmpf ogt, %7, %8 : vector<1x16xf32>
    %cst_8 = arith.constant -1.000000e+30 : f32
    %cst_9 = arith.constant 0.000000e+00 : f32
    %10 = vector.broadcast %cst_8 : f32 to vector<1x16xf32>
    %11 = vector.broadcast %cst_9 : f32 to vector<1x16xf32>
    %12 = arith.select %9, %10, %11 : vector<1x16xi1>, vector<1x16xf32>
    %13 = vector.extract_strided_slice %1 {offsets = [0, 0], sizes = [8, 8], strides = [1, 1]} : vector<8x32xf32> to vector<8x8xf32>
    %cst_10 = arith.constant 0.353553385 : f32
    %14 = vector.broadcast %cst_10 : f32 to vector<8x8xf32>
    %15 = arith.mulf %13, %14 : vector<8x8xf32>
    %16 = arith.truncf %15 : vector<8x8xf32> to vector<8x8xbf16>
    %17 = vector.extract_strided_slice %4 {offsets = [0, 0], sizes = [16, 8], strides = [1, 1]} : vector<16x32xf32> to vector<16x8xf32>
    %18 = arith.truncf %17 : vector<16x8xf32> to vector<16x8xbf16>
    %19 = vector.extract_strided_slice %5 {offsets = [0, 0], sizes = [16, 8], strides = [1, 1]} : vector<16x32xf32> to vector<16x8xf32>
    %20 = arith.truncf %19 : vector<16x8xf32> to vector<16x8xbf16>
    %cst_11 = arith.constant dense<0.000000e+00> : vector<8x16xf32>
    %21 = tpu.matmul %16, %18, %cst_11 {dimension_numbers = #tpu.dot_dimension_numbers<[1], [1], [0], [0], [0, 0, 1, 0], [], []>} : vector<8x8xbf16>, vector<16x8xbf16>, vector<8x16xf32> -> vector<8x16xf32>
    %22 = vector.broadcast %12 : vector<1x16xf32> to vector<8x16xf32>
    %23 = arith.addf %21, %22 : vector<8x16xf32>
    %cst_12 = arith.constant dense<0xFF800000> : vector<8xf32>
    %24 = vector.multi_reduction <maximumf>, %23, %cst_12 [1] : vector<8x16xf32> to vector<8xf32>
    %25 = vector.shape_cast %24 : vector<8xf32> to vector<8x1xf32>
    %26 = vector.broadcast %25 : vector<8x1xf32> to vector<8x16xf32>
    %27 = arith.subf %23, %26 : vector<8x16xf32>
    %28 = math.exp %27 : vector<8x16xf32>
    %cst_13 = arith.constant dense<0.000000e+00> : vector<8xf32>
    %29 = vector.multi_reduction <add>, %28, %cst_13 [1] : vector<8x16xf32> to vector<8xf32>
    %30 = vector.shape_cast %29 : vector<8xf32> to vector<8x1xf32>
    %31 = tpu.reciprocal %30 {approx = true} : vector<8x1xf32> -> vector<8x1xf32>
    %32 = arith.truncf %28 : vector<8x16xf32> to vector<8x16xbf16>
    %cst_14 = arith.constant dense<0.000000e+00> : vector<8x8xf32>
    %33 = tpu.matmul %32, %20, %cst_14 {dimension_numbers = #tpu.dot_dimension_numbers<[1], [0], [0], [1], [0, 0, 1, 1], [], []>} : vector<8x16xbf16>, vector<16x8xbf16>, vector<8x8xf32> -> vector<8x8xf32>
    %34 = vector.broadcast %31 : vector<8x1xf32> to vector<8x8xf32>
    %35 = arith.mulf %33, %34 : vector<8x8xf32>
    %36 = vector.extract_strided_slice %1 {offsets = [0, 8], sizes = [8, 8], strides = [1, 1]} : vector<8x32xf32> to vector<8x8xf32>
    %cst_15 = arith.constant 0.353553385 : f32
    %37 = vector.broadcast %cst_15 : f32 to vector<8x8xf32>
    %38 = arith.mulf %36, %37 : vector<8x8xf32>
    %39 = arith.truncf %38 : vector<8x8xf32> to vector<8x8xbf16>
    %40 = vector.extract_strided_slice %4 {offsets = [0, 8], sizes = [16, 8], strides = [1, 1]} : vector<16x32xf32> to vector<16x8xf32>
    %41 = arith.truncf %40 : vector<16x8xf32> to vector<16x8xbf16>
    %42 = vector.extract_strided_slice %5 {offsets = [0, 8], sizes = [16, 8], strides = [1, 1]} : vector<16x32xf32> to vector<16x8xf32>
    %43 = arith.truncf %42 : vector<16x8xf32> to vector<16x8xbf16>
    %cst_16 = arith.constant dense<0.000000e+00> : vector<8x16xf32>
    %44 = tpu.matmul %39, %41, %cst_16 {dimension_numbers = #tpu.dot_dimension_numbers<[1], [1], [0], [0], [0, 0, 1, 0], [], []>} : vector<8x8xbf16>, vector<16x8xbf16>, vector<8x16xf32> -> vector<8x16xf32>
    %45 = vector.broadcast %12 : vector<1x16xf32> to vector<8x16xf32>
    %46 = arith.addf %44, %45 : vector<8x16xf32>
    %cst_17 = arith.constant dense<0xFF800000> : vector<8xf32>
    %47 = vector.multi_reduction <maximumf>, %46, %cst_17 [1] : vector<8x16xf32> to vector<8xf32>
    %48 = vector.shape_cast %47 : vector<8xf32> to vector<8x1xf32>
    %49 = vector.broadcast %48 : vector<8x1xf32> to vector<8x16xf32>
    %50 = arith.subf %46, %49 : vector<8x16xf32>
    %51 = math.exp %50 : vector<8x16xf32>
    %cst_18 = arith.constant dense<0.000000e+00> : vector<8xf32>
    %52 = vector.multi_reduction <add>, %51, %cst_18 [1] : vector<8x16xf32> to vector<8xf32>
    %53 = vector.shape_cast %52 : vector<8xf32> to vector<8x1xf32>
    %54 = tpu.reciprocal %53 {approx = true} : vector<8x1xf32> -> vector<8x1xf32>
    %55 = arith.truncf %51 : vector<8x16xf32> to vector<8x16xbf16>
    %cst_19 = arith.constant dense<0.000000e+00> : vector<8x8xf32>
    %56 = tpu.matmul %55, %43, %cst_19 {dimension_numbers = #tpu.dot_dimension_numbers<[1], [0], [0], [1], [0, 0, 1, 1], [], []>} : vector<8x16xbf16>, vector<16x8xbf16>, vector<8x8xf32> -> vector<8x8xf32>
    %57 = vector.broadcast %54 : vector<8x1xf32> to vector<8x8xf32>
    %58 = arith.mulf %56, %57 : vector<8x8xf32>
    %59 = vector.extract_strided_slice %1 {offsets = [0, 16], sizes = [8, 8], strides = [1, 1]} : vector<8x32xf32> to vector<8x8xf32>
    %cst_20 = arith.constant 0.353553385 : f32
    %60 = vector.broadcast %cst_20 : f32 to vector<8x8xf32>
    %61 = arith.mulf %59, %60 : vector<8x8xf32>
    %62 = arith.truncf %61 : vector<8x8xf32> to vector<8x8xbf16>
    %63 = vector.extract_strided_slice %4 {offsets = [0, 16], sizes = [16, 8], strides = [1, 1]} : vector<16x32xf32> to vector<16x8xf32>
    %64 = arith.truncf %63 : vector<16x8xf32> to vector<16x8xbf16>
    %65 = vector.extract_strided_slice %5 {offsets = [0, 16], sizes = [16, 8], strides = [1, 1]} : vector<16x32xf32> to vector<16x8xf32>
    %66 = arith.truncf %65 : vector<16x8xf32> to vector<16x8xbf16>
    %cst_21 = arith.constant dense<0.000000e+00> : vector<8x16xf32>
    %67 = tpu.matmul %62, %64, %cst_21 {dimension_numbers = #tpu.dot_dimension_numbers<[1], [1], [0], [0], [0, 0, 1, 0], [], []>} : vector<8x8xbf16>, vector<16x8xbf16>, vector<8x16xf32> -> vector<8x16xf32>
    %68 = vector.broadcast %12 : vector<1x16xf32> to vector<8x16xf32>
    %69 = arith.addf %67, %68 : vector<8x16xf32>
    %cst_22 = arith.constant dense<0xFF800000> : vector<8xf32>
    %70 = vector.multi_reduction <maximumf>, %69, %cst_22 [1] : vector<8x16xf32> to vector<8xf32>
    %71 = vector.shape_cast %70 : vector<8xf32> to vector<8x1xf32>
    %72 = vector.broadcast %71 : vector<8x1xf32> to vector<8x16xf32>
    %73 = arith.subf %69, %72 : vector<8x16xf32>
    %74 = math.exp %73 : vector<8x16xf32>
    %cst_23 = arith.constant dense<0.000000e+00> : vector<8xf32>
    %75 = vector.multi_reduction <add>, %74, %cst_23 [1] : vector<8x16xf32> to vector<8xf32>
    %76 = vector.shape_cast %75 : vector<8xf32> to vector<8x1xf32>
    %77 = tpu.reciprocal %76 {approx = true} : vector<8x1xf32> -> vector<8x1xf32>
    %78 = arith.truncf %74 : vector<8x16xf32> to vector<8x16xbf16>
    %cst_24 = arith.constant dense<0.000000e+00> : vector<8x8xf32>
    %79 = tpu.matmul %78, %66, %cst_24 {dimension_numbers = #tpu.dot_dimension_numbers<[1], [0], [0], [1], [0, 0, 1, 1], [], []>} : vector<8x16xbf16>, vector<16x8xbf16>, vector<8x8xf32> -> vector<8x8xf32>
    %80 = vector.broadcast %77 : vector<8x1xf32> to vector<8x8xf32>
    %81 = arith.mulf %79, %80 : vector<8x8xf32>
    %82 = vector.extract_strided_slice %1 {offsets = [0, 24], sizes = [8, 8], strides = [1, 1]} : vector<8x32xf32> to vector<8x8xf32>
    %cst_25 = arith.constant 0.353553385 : f32
    %83 = vector.broadcast %cst_25 : f32 to vector<8x8xf32>
    %84 = arith.mulf %82, %83 : vector<8x8xf32>
    %85 = arith.truncf %84 : vector<8x8xf32> to vector<8x8xbf16>
    %86 = vector.extract_strided_slice %4 {offsets = [0, 24], sizes = [16, 8], strides = [1, 1]} : vector<16x32xf32> to vector<16x8xf32>
    %87 = arith.truncf %86 : vector<16x8xf32> to vector<16x8xbf16>
    %88 = vector.extract_strided_slice %5 {offsets = [0, 24], sizes = [16, 8], strides = [1, 1]} : vector<16x32xf32> to vector<16x8xf32>
    %89 = arith.truncf %88 : vector<16x8xf32> to vector<16x8xbf16>
    %cst_26 = arith.constant dense<0.000000e+00> : vector<8x16xf32>
    %90 = tpu.matmul %85, %87, %cst_26 {dimension_numbers = #tpu.dot_dimension_numbers<[1], [1], [0], [0], [0, 0, 1, 0], [], []>} : vector<8x8xbf16>, vector<16x8xbf16>, vector<8x16xf32> -> vector<8x16xf32>
    %91 = vector.broadcast %12 : vector<1x16xf32> to vector<8x16xf32>
    %92 = arith.addf %90, %91 : vector<8x16xf32>
    %cst_27 = arith.constant dense<0xFF800000> : vector<8xf32>
    %93 = vector.multi_reduction <maximumf>, %92, %cst_27 [1] : vector<8x16xf32> to vector<8xf32>
    %94 = vector.shape_cast %93 : vector<8xf32> to vector<8x1xf32>
    %95 = vector.broadcast %94 : vector<8x1xf32> to vector<8x16xf32>
    %96 = arith.subf %92, %95 : vector<8x16xf32>
    %97 = math.exp %96 : vector<8x16xf32>
    %cst_28 = arith.constant dense<0.000000e+00> : vector<8xf32>
    %98 = vector.multi_reduction <add>, %97, %cst_28 [1] : vector<8x16xf32> to vector<8xf32>
    %99 = vector.shape_cast %98 : vector<8xf32> to vector<8x1xf32>
    %100 = tpu.reciprocal %99 {approx = true} : vector<8x1xf32> -> vector<8x1xf32>
    %101 = arith.truncf %97 : vector<8x16xf32> to vector<8x16xbf16>
    %cst_29 = arith.constant dense<0.000000e+00> : vector<8x8xf32>
    %102 = tpu.matmul %101, %89, %cst_29 {dimension_numbers = #tpu.dot_dimension_numbers<[1], [0], [0], [1], [0, 0, 1, 1], [], []>} : vector<8x16xbf16>, vector<16x8xbf16>, vector<8x8xf32> -> vector<8x8xf32>
    %103 = vector.broadcast %100 : vector<8x1xf32> to vector<8x8xf32>
    %104 = arith.mulf %102, %103 : vector<8x8xf32>
    %105 = tpu.concatenate %35, %58, %81, %104 in 1 : vector<8x8xf32>, vector<8x8xf32>, vector<8x8xf32>, vector<8x8xf32> -> vector<8x32xf32>
    %c0_30 = arith.constant 0 : index
    %c0_31 = arith.constant 0 : index
    %c0_32 = arith.constant 0 : index
    %106 = vector.load %arg4[%c0_30, %c0_31, %c0_32] : memref<1x8x32xf32, #tpu.memory_space<vmem>>, vector<1x8x32xf32>
    %107 = vector.shape_cast %106 : vector<1x8x32xf32> to vector<8x32xf32>
    %108 = vector.shape_cast %105 : vector<8x32xf32> to vector<1x8x32xf32>
    tpu.vector_store %arg4[%c0_30, %c0_31, %c0_32], %108 {strides = array<i32>} : memref<1x8x32xf32, #tpu.memory_space<vmem>>, vector<1x8x32xf32>,
    return
  }
  func.func @transform_0(%arg0: i32) -> (i32, i32, i32) {
    %c0_i32 = arith.constant 0 : i32
    %c0_i32_0 = arith.constant 0 : i32
    %c0_i32_1 = arith.constant 0 : i32
    return %arg0, %c0_i32, %c0_i32_0 : i32, i32, i32
  }
  func.func @transform_1(%arg0: i32) -> (i32, i32, i32) {
    %c0_i32 = arith.constant 0 : i32
    %c0_i32_0 = arith.constant 0 : i32
    %c0_i32_1 = arith.constant 0 : i32
    return %arg0, %c0_i32, %c0_i32_0 : i32, i32, i32
  }
  func.func @transform_2(%arg0: i32) -> (i32, i32, i32) {
    %c0_i32 = arith.constant 0 : i32
    %c0_i32_0 = arith.constant 0 : i32
    %c0_i32_1 = arith.constant 0 : i32
    return %arg0, %c0_i32, %c0_i32_0 : i32, i32, i32
  }
  func.func @transform_3(%arg0: i32) -> (i32, i32, i32) {
    %c0_i32 = arith.constant 0 : i32
    %c0_i32_0 = arith.constant 0 : i32
    %c0_i32_1 = arith.constant 0 : i32
    return %arg0, %c0_i32, %c0_i32_0 : i32, i32, i32
  }
}

module attributes {stable_mosaic.version = 11 : i64} {
  func.func @_ffn_add_ln_kernel(%arg0: i32, %arg1: memref<16x32xf32, #tpu.memory_space<vmem>>, %arg2: memref<32x32xf32, #tpu.memory_space<vmem>>, %arg3: memref<1x32xf32, #tpu.memory_space<vmem>>, %arg4: memref<32x32xf32, #tpu.memory_space<vmem>>, %arg5: memref<1x32xf32, #tpu.memory_space<vmem>>, %arg6: memref<1x32xf32, #tpu.memory_space<vmem>>, %arg7: memref<1x32xf32, #tpu.memory_space<vmem>>, %arg8: memref<16x32xf32, #tpu.memory_space<vmem>>) attributes {dimension_semantics = [#tpu.dimension_semantics<parallel>], iteration_bounds = array<i64: 1>, scalar_prefetch = 0 : i64, scratch_operands = 0 : i64, tpu.core_type = #tpu.core_type<tc>, window_params = [{transform_indices = @transform_0, window_bounds = array<i64: 16, 32>}, {pipeline_mode = #tpu.pipeline_mode<synchronous>, transform_indices = @transform_1, window_bounds = array<i64: 32, 32>}, {pipeline_mode = #tpu.pipeline_mode<synchronous>, transform_indices = @transform_2, window_bounds = array<i64: 1, 32>}, {pipeline_mode = #tpu.pipeline_mode<synchronous>, transform_indices = @transform_3, window_bounds = array<i64: 32, 32>}, {pipeline_mode = #tpu.pipeline_mode<synchronous>, transform_indices = @transform_4, window_bounds = array<i64: 1, 32>}, {pipeline_mode = #tpu.pipeline_mode<synchronous>, transform_indices = @transform_5, window_bounds = array<i64: 1, 32>}, {pipeline_mode = #tpu.pipeline_mode<synchronous>, transform_indices = @transform_6, window_bounds = array<i64: 1, 32>}, {transform_indices = @transform_7, window_bounds = array<i64: 16, 32>}]} {
    %c0 = arith.constant 0 : index
    %c0_0 = arith.constant 0 : index
    %0 = vector.load %arg1[%c0, %c0_0] : memref<16x32xf32, #tpu.memory_space<vmem>>, vector<16x32xf32>
    %1 = arith.truncf %0 : vector<16x32xf32> to vector<16x32xbf16>
    %c0_1 = arith.constant 0 : index
    %c0_2 = arith.constant 0 : index
    %2 = vector.load %arg2[%c0_1, %c0_2] : memref<32x32xf32, #tpu.memory_space<vmem>>, vector<32x32xf32>
    %3 = arith.truncf %2 : vector<32x32xf32> to vector<32x32xbf16>
    %cst = arith.constant dense<0.000000e+00> : vector<16x32xf32>
    %4 = tpu.matmul %1, %3, %cst {dimension_numbers = #tpu.dot_dimension_numbers<[1], [0], [0], [1], [0, 0, 1, 1], [], []>} : vector<16x32xbf16>, vector<32x32xbf16>, vector<16x32xf32> -> vector<16x32xf32>
    %c0_3 = arith.constant 0 : index
    %c0_4 = arith.constant 0 : index
    %5 = vector.load %arg3[%c0_3, %c0_4] : memref<1x32xf32, #tpu.memory_space<vmem>>, vector<1x32xf32>
    %6 = vector.broadcast %5 : vector<1x32xf32> to vector<16x32xf32>
    %7 = arith.addf %4, %6 : vector<16x32xf32>
    %cst_5 = arith.constant 0.000000e+00 : f32
    %8 = vector.broadcast %cst_5 : f32 to vector<16x32xf32>
    %9 = arith.maximumf %7, %8 : vector<16x32xf32>
    %10 = arith.truncf %9 : vector<16x32xf32> to vector<16x32xbf16>
    %c0_6 = arith.constant 0 : index
    %c0_7 = arith.constant 0 : index
    %11 = vector.load %arg4[%c0_6, %c0_7] : memref<32x32xf32, #tpu.memory_space<vmem>>, vector<32x32xf32>
    %12 = arith.truncf %11 : vector<32x32xf32> to vector<32x32xbf16>
    %cst_8 = arith.constant dense<0.000000e+00> : vector<16x32xf32>
    %13 = tpu.matmul %10, %12, %cst_8 {dimension_numbers = #tpu.dot_dimension_numbers<[1], [0], [0], [1], [0, 0, 1, 1], [], []>} : vector<16x32xbf16>, vector<32x32xbf16>, vector<16x32xf32> -> vector<16x32xf32>
    %c0_9 = arith.constant 0 : index
    %c0_10 = arith.constant 0 : index
    %14 = vector.load %arg5[%c0_9, %c0_10] : memref<1x32xf32, #tpu.memory_space<vmem>>, vector<1x32xf32>
    %15 = vector.broadcast %14 : vector<1x32xf32> to vector<16x32xf32>
    %16 = arith.addf %13, %15 : vector<16x32xf32>
    %17 = arith.addf %16, %0 : vector<16x32xf32>
    %c0_11 = arith.constant 0 : index
    %c0_12 = arith.constant 0 : index
    %18 = vector.load %arg6[%c0_11, %c0_12] : memref<1x32xf32, #tpu.memory_space<vmem>>, vector<1x32xf32>
    %c0_13 = arith.constant 0 : index
    %c0_14 = arith.constant 0 : index
    %19 = vector.load %arg7[%c0_13, %c0_14] : memref<1x32xf32, #tpu.memory_space<vmem>>, vector<1x32xf32>
    %cst_15 = arith.constant dense<0.000000e+00> : vector<16xf32>
    %20 = vector.multi_reduction <add>, %17, %cst_15 [1] : vector<16x32xf32> to vector<16xf32>
    %21 = vector.shape_cast %20 : vector<16xf32> to vector<16x1xf32>
    %cst_16 = arith.constant 3.200000e+01 : f32
    %22 = vector.broadcast %cst_16 : f32 to vector<16x1xf32>
    %23 = arith.divf %21, %22 : vector<16x1xf32>
    %24 = vector.broadcast %23 : vector<16x1xf32> to vector<16x32xf32>
    %25 = arith.subf %17, %24 : vector<16x32xf32>
    %26 = arith.mulf %25, %25 : vector<16x32xf32>
    %cst_17 = arith.constant dense<0.000000e+00> : vector<16xf32>
    %27 = vector.multi_reduction <add>, %26, %cst_17 [1] : vector<16x32xf32> to vector<16xf32>
    %28 = vector.shape_cast %27 : vector<16xf32> to vector<16x1xf32>
    %cst_18 = arith.constant 3.200000e+01 : f32
    %29 = vector.broadcast %cst_18 : f32 to vector<16x1xf32>
    %30 = arith.divf %28, %29 : vector<16x1xf32>
    %cst_19 = arith.constant 9.99999974E-6 : f32
    %31 = vector.broadcast %cst_19 : f32 to vector<16x1xf32>
    %32 = arith.addf %30, %31 : vector<16x1xf32>
    %33 = math.rsqrt %32 : vector<16x1xf32>
    %34 = vector.broadcast %33 : vector<16x1xf32> to vector<16x32xf32>
    %35 = arith.mulf %25, %34 : vector<16x32xf32>
    %36 = vector.broadcast %18 : vector<1x32xf32> to vector<16x32xf32>
    %37 = arith.mulf %35, %36 : vector<16x32xf32>
    %38 = vector.broadcast %19 : vector<1x32xf32> to vector<16x32xf32>
    %39 = arith.addf %37, %38 : vector<16x32xf32>
    %c0_20 = arith.constant 0 : index
    %c0_21 = arith.constant 0 : index
    %40 = vector.load %arg8[%c0_20, %c0_21] : memref<16x32xf32, #tpu.memory_space<vmem>>, vector<16x32xf32>
    tpu.vector_store %arg8[%c0_20, %c0_21], %39 {strides = array<i32>} : memref<16x32xf32, #tpu.memory_space<vmem>>, vector<16x32xf32>,
    return
  }
  func.func @transform_0(%arg0: i32) -> (i32, i32) {
    %c0_i32 = arith.constant 0 : i32
    %c0_i32_0 = arith.constant 0 : i32
    return %arg0, %c0_i32 : i32, i32
  }
  func.func @transform_1(%arg0: i32) -> (i32, i32) {
    %c0_i32 = arith.constant 0 : i32
    %c0_i32_0 = arith.constant 0 : i32
    %c0_i32_1 = arith.constant 0 : i32
    return %c0_i32, %c0_i32_0 : i32, i32
  }
  func.func @transform_2(%arg0: i32) -> (i32, i32) {
    %c0_i32 = arith.constant 0 : i32
    %c0_i32_0 = arith.constant 0 : i32
    %c0_i32_1 = arith.constant 0 : i32
    return %c0_i32, %c0_i32_0 : i32, i32
  }
  func.func @transform_3(%arg0: i32) -> (i32, i32) {
    %c0_i32 = arith.constant 0 : i32
    %c0_i32_0 = arith.constant 0 : i32
    %c0_i32_1 = arith.constant 0 : i32
    return %c0_i32, %c0_i32_0 : i32, i32
  }
  func.func @transform_4(%arg0: i32) -> (i32, i32) {
    %c0_i32 = arith.constant 0 : i32
    %c0_i32_0 = arith.constant 0 : i32
    %c0_i32_1 = arith.constant 0 : i32
    return %c0_i32, %c0_i32_0 : i32, i32
  }
  func.func @transform_5(%arg0: i32) -> (i32, i32) {
    %c0_i32 = arith.constant 0 : i32
    %c0_i32_0 = arith.constant 0 : i32
    %c0_i32_1 = arith.constant 0 : i32
    return %c0_i32, %c0_i32_0 : i32, i32
  }
  func.func @transform_6(%arg0: i32) -> (i32, i32) {
    %c0_i32 = arith.constant 0 : i32
    %c0_i32_0 = arith.constant 0 : i32
    %c0_i32_1 = arith.constant 0 : i32
    return %c0_i32, %c0_i32_0 : i32, i32
  }
  func.func @transform_7(%arg0: i32) -> (i32, i32) {
    %c0_i32 = arith.constant 0 : i32
    %c0_i32_0 = arith.constant 0 : i32
    return %arg0, %c0_i32 : i32, i32
  }
}

module attributes {stable_mosaic.version = 11 : i64} {
  func.func @_ln_kernel(%arg0: i32, %arg1: memref<16x32xf32, #tpu.memory_space<vmem>>, %arg2: memref<1x32xf32, #tpu.memory_space<vmem>>, %arg3: memref<1x32xf32, #tpu.memory_space<vmem>>, %arg4: memref<16x32xf32, #tpu.memory_space<vmem>>) attributes {dimension_semantics = [#tpu.dimension_semantics<parallel>], iteration_bounds = array<i64: 1>, scalar_prefetch = 0 : i64, scratch_operands = 0 : i64, tpu.core_type = #tpu.core_type<tc>, window_params = [{transform_indices = @transform_0, window_bounds = array<i64: 16, 32>}, {pipeline_mode = #tpu.pipeline_mode<synchronous>, transform_indices = @transform_1, window_bounds = array<i64: 1, 32>}, {pipeline_mode = #tpu.pipeline_mode<synchronous>, transform_indices = @transform_2, window_bounds = array<i64: 1, 32>}, {transform_indices = @transform_3, window_bounds = array<i64: 16, 32>}]} {
    %c0 = arith.constant 0 : index
    %c0_0 = arith.constant 0 : index
    %0 = vector.load %arg1[%c0, %c0_0] : memref<16x32xf32, #tpu.memory_space<vmem>>, vector<16x32xf32>
    %c0_1 = arith.constant 0 : index
    %c0_2 = arith.constant 0 : index
    %1 = vector.load %arg2[%c0_1, %c0_2] : memref<1x32xf32, #tpu.memory_space<vmem>>, vector<1x32xf32>
    %c0_3 = arith.constant 0 : index
    %c0_4 = arith.constant 0 : index
    %2 = vector.load %arg3[%c0_3, %c0_4] : memref<1x32xf32, #tpu.memory_space<vmem>>, vector<1x32xf32>
    %cst = arith.constant dense<0.000000e+00> : vector<16xf32>
    %3 = vector.multi_reduction <add>, %0, %cst [1] : vector<16x32xf32> to vector<16xf32>
    %4 = vector.shape_cast %3 : vector<16xf32> to vector<16x1xf32>
    %cst_5 = arith.constant 3.200000e+01 : f32
    %5 = vector.broadcast %cst_5 : f32 to vector<16x1xf32>
    %6 = arith.divf %4, %5 : vector<16x1xf32>
    %7 = vector.broadcast %6 : vector<16x1xf32> to vector<16x32xf32>
    %8 = arith.subf %0, %7 : vector<16x32xf32>
    %9 = arith.mulf %8, %8 : vector<16x32xf32>
    %cst_6 = arith.constant dense<0.000000e+00> : vector<16xf32>
    %10 = vector.multi_reduction <add>, %9, %cst_6 [1] : vector<16x32xf32> to vector<16xf32>
    %11 = vector.shape_cast %10 : vector<16xf32> to vector<16x1xf32>
    %cst_7 = arith.constant 3.200000e+01 : f32
    %12 = vector.broadcast %cst_7 : f32 to vector<16x1xf32>
    %13 = arith.divf %11, %12 : vector<16x1xf32>
    %cst_8 = arith.constant 9.99999974E-6 : f32
    %14 = vector.broadcast %cst_8 : f32 to vector<16x1xf32>
    %15 = arith.addf %13, %14 : vector<16x1xf32>
    %16 = math.rsqrt %15 : vector<16x1xf32>
    %17 = vector.broadcast %16 : vector<16x1xf32> to vector<16x32xf32>
    %18 = arith.mulf %8, %17 : vector<16x32xf32>
    %19 = vector.broadcast %1 : vector<1x32xf32> to vector<16x32xf32>
    %20 = arith.mulf %18, %19 : vector<16x32xf32>
    %21 = vector.broadcast %2 : vector<1x32xf32> to vector<16x32xf32>
    %22 = arith.addf %20, %21 : vector<16x32xf32>
    %c0_9 = arith.constant 0 : index
    %c0_10 = arith.constant 0 : index
    %23 = vector.load %arg4[%c0_9, %c0_10] : memref<16x32xf32, #tpu.memory_space<vmem>>, vector<16x32xf32>
    tpu.vector_store %arg4[%c0_9, %c0_10], %22 {strides = array<i32>} : memref<16x32xf32, #tpu.memory_space<vmem>>, vector<16x32xf32>,
    return
  }
  func.func @transform_0(%arg0: i32) -> (i32, i32) {
    %c0_i32 = arith.constant 0 : i32
    %c0_i32_0 = arith.constant 0 : i32
    return %arg0, %c0_i32 : i32, i32
  }
  func.func @transform_1(%arg0: i32) -> (i32, i32) {
    %c0_i32 = arith.constant 0 : i32
    %c0_i32_0 = arith.constant 0 : i32
    %c0_i32_1 = arith.constant 0 : i32
    return %c0_i32, %c0_i32_0 : i32, i32
  }
  func.func @transform_2(%arg0: i32) -> (i32, i32) {
    %c0_i32 = arith.constant 0 : i32
    %c0_i32_0 = arith.constant 0 : i32
    %c0_i32_1 = arith.constant 0 : i32
    return %c0_i32, %c0_i32_0 : i32, i32
  }
  func.func @transform_3(%arg0: i32) -> (i32, i32) {
    %c0_i32 = arith.constant 0 : i32
    %c0_i32_0 = arith.constant 0 : i32
    return %arg0, %c0_i32 : i32, i32
  }
}

module attributes {stable_mosaic.version = 11 : i64} {
  func.func @_linear_kernel(%arg0: i32, %arg1: memref<16x32xf32, #tpu.memory_space<vmem>>, %arg2: memref<32x18xf32, #tpu.memory_space<vmem>>, %arg3: memref<1x18xf32, #tpu.memory_space<vmem>>, %arg4: memref<16x18xf32, #tpu.memory_space<vmem>>) attributes {dimension_semantics = [#tpu.dimension_semantics<parallel>], iteration_bounds = array<i64: 1>, scalar_prefetch = 0 : i64, scratch_operands = 0 : i64, tpu.core_type = #tpu.core_type<tc>, window_params = [{transform_indices = @transform_0, window_bounds = array<i64: 16, 32>}, {pipeline_mode = #tpu.pipeline_mode<synchronous>, transform_indices = @transform_1, window_bounds = array<i64: 32, 18>}, {pipeline_mode = #tpu.pipeline_mode<synchronous>, transform_indices = @transform_2, window_bounds = array<i64: 1, 18>}, {transform_indices = @transform_3, window_bounds = array<i64: 16, 18>}]} {
    %c0 = arith.constant 0 : index
    %c0_0 = arith.constant 0 : index
    %0 = vector.load %arg1[%c0, %c0_0] : memref<16x32xf32, #tpu.memory_space<vmem>>, vector<16x32xf32>
    %1 = arith.truncf %0 : vector<16x32xf32> to vector<16x32xbf16>
    %c0_1 = arith.constant 0 : index
    %c0_2 = arith.constant 0 : index
    %2 = vector.load %arg2[%c0_1, %c0_2] : memref<32x18xf32, #tpu.memory_space<vmem>>, vector<32x18xf32>
    %3 = arith.truncf %2 : vector<32x18xf32> to vector<32x18xbf16>
    %cst = arith.constant dense<0.000000e+00> : vector<16x18xf32>
    %4 = tpu.matmul %1, %3, %cst {dimension_numbers = #tpu.dot_dimension_numbers<[1], [0], [0], [1], [0, 0, 1, 1], [], []>} : vector<16x32xbf16>, vector<32x18xbf16>, vector<16x18xf32> -> vector<16x18xf32>
    %c0_3 = arith.constant 0 : index
    %c0_4 = arith.constant 0 : index
    %5 = vector.load %arg3[%c0_3, %c0_4] : memref<1x18xf32, #tpu.memory_space<vmem>>, vector<1x18xf32>
    %6 = vector.broadcast %5 : vector<1x18xf32> to vector<16x18xf32>
    %7 = arith.addf %4, %6 : vector<16x18xf32>
    %c0_5 = arith.constant 0 : index
    %c0_6 = arith.constant 0 : index
    %8 = vector.load %arg4[%c0_5, %c0_6] : memref<16x18xf32, #tpu.memory_space<vmem>>, vector<16x18xf32>
    tpu.vector_store %arg4[%c0_5, %c0_6], %7 {strides = array<i32>} : memref<16x18xf32, #tpu.memory_space<vmem>>, vector<16x18xf32>,
    return
  }
  func.func @transform_0(%arg0: i32) -> (i32, i32) {
    %c0_i32 = arith.constant 0 : i32
    %c0_i32_0 = arith.constant 0 : i32
    return %arg0, %c0_i32 : i32, i32
  }
  func.func @transform_1(%arg0: i32) -> (i32, i32) {
    %c0_i32 = arith.constant 0 : i32
    %c0_i32_0 = arith.constant 0 : i32
    %c0_i32_1 = arith.constant 0 : i32
    return %c0_i32, %c0_i32_0 : i32, i32
  }
  func.func @transform_2(%arg0: i32) -> (i32, i32) {
    %c0_i32 = arith.constant 0 : i32
    %c0_i32_0 = arith.constant 0 : i32
    %c0_i32_1 = arith.constant 0 : i32
    return %c0_i32, %c0_i32_0 : i32, i32
  }
  func.func @transform_3(%arg0: i32) -> (i32, i32) {
    %c0_i32 = arith.constant 0 : i32
    %c0_i32_0 = arith.constant 0 : i32
    return %arg0, %c0_i32 : i32, i32
  }
}

</mosaic_0001>

<bundles_post_ra>
// kernel: seq2seq_forward.30
= control target key start
LH: loop header
LB: loop body
LE: loop exit
PB: predicated region body
PF: predicated region fallthrough
CT: control target
= control target key end

     0   :  { %vm46_vm0 = vcmask 261120   ;;  %s419_s1 = inlined_call_operand.vmem [shape: f32[32,32], index: 1, kind: input, shape index: {}]   ;;  %s420_s0 = inlined_call_operand.vmem [shape: f32[32,32], index: 0, kind: input, shape index: {}]   ;;  %s421_s3 = inlined_call_operand.vmem [shape: f32[32,32], index: 3, kind: input, shape index: {}]   ;;  %s422_s2 = inlined_call_operand.vmem [shape: f32[1,32], index: 2, kind: input, shape index: {}]   ;;  %s423_s4 = inlined_call_operand.vmem [shape: f32[1,32], index: 4, kind: input, shape index: {}]   ;;  %s424_s5 = inlined_call_operand.vmem [shape: f32[1,32], index: 5, kind: input, shape index: {}]   ;;  %s425_s6 = inlined_call_operand.vmem [shape: f32[1,32], index: 6, kind: input, shape index: {}]   ;;  %s426_s7 = inlined_call_operand.vmem [shape: f32[32,32], index: 7, kind: output, shape index: {}]  }
   0x1   :  { %v35_v0 = vld [vmem:[%s419_s1 + $0x10] sm:$0xff]  ;;  %v36_v1 = vld [vmem:[%s419_s1 + $0x18] sm:$0xff]  ;;  %v33_v2 = vld [vmem:[%s419_s1] sm:$0xff] }
   0x2   :  { %v38_v3 = vpack.c.bf16 %v36_v1, %v35_v0  ;;  %v34_v4 = vld [vmem:[%s419_s1 + $0x8] sm:$0xff]  ;;  %v27_v5 = vld [vmem:[%s420_s0] sm:$0xff]  ;;  %v29_v9 = vld [vmem:[%s420_s0 + $0x10] sm:$0xff] }
   0x3   :  { %v28_v6 = vld [vmem:[%s420_s0 + $0x8] sm:$0xff]  ;;  %v37_v7 = vpack.c.bf16 %v34_v4, %v33_v2  ;;  %v30_v10 = vld [vmem:[%s420_s0 + $0x18] sm:$0xff]  ;;  %v110_v12 = vld [vmem:[%s421_s3 + $0x10] sm:$0xff] }
   0x4   :  { %v31_v8 = vpack.c.bf16 %v28_v6, %v27_v5  ;;  %279 = vmatprep.subr.bf16.mxu0 %v38_v3  ;;  %v32_v11 = vpack.c.bf16 %v30_v10, %v29_v9  ;;  %v111_v13 = vld [vmem:[%s421_s3 + $0x18] sm:$0xff]  ;;  %v108_v15 = vld [vmem:[%s421_s3] sm:$0xff]  ;;  %v109_v16 = vld [vmem:[%s421_s3 + $0x8] sm:$0xff] }
   0x5   :  { %280 = vmatpush3.bf16.msra.mxu0 %v38_v3  ;;  %v113_v14 = vpack.c.bf16 %v111_v13, %v110_v12  ;;  %v112_v17 = vpack.c.bf16 %v109_v16, %v108_v15  ;;  %v263_v20 = vld [vmem:[%s422_s2] ss:$0 sm:$0xff] }
   0x6   :  { %283 = vmatprep.mubr.msk.bf16.mxu0 %vm46_vm0, %v31_v8  ;;  %281 = vmatprep.subr.bf16.mxu0 %v37_v7  ;;  %v266_v33 = vld [vmem:[%s423_s4] ss:$0 sm:$0xff] }
   0x7   :  { %287 = vmatprep.subr.bf16.mxu1 %v113_v14 }
   0x8   :  { %288 = vmatpush3.bf16.msra.mxu1 %v113_v14 }
   0x9   :  { %282 = vmatpush3.bf16.msra.mxu0 %v37_v7  ;;  %289 = vmatprep.subr.bf16.mxu1 %v112_v17 }
   0xc   :  { %284 = vmatmul.mubr.msk.bf16.vlgmr.msra.gmra.mxu0 %vm46_vm0, %v32_v11  ;;  %290 = vmatpush3.bf16.msra.mxu1 %v112_v17 }
  0xcc   :  { %v285_v18 = vpop.f32.mrf.mxu0 }
  0xcd   :  { %v96_v24 = vadd.f32 %v285_v18, %v263_v20 }
  0xce   :  { %v87_v19 = vpop.f32.mrf.mxu0 }
  0xcf   :  { %v88_v22 = vadd.f32 %v263_v20, %v87_v19  ;;  %v104_v30 = vmax.f32 %v96_v24, 0.0  ;;  %v269_v19 = vld [vmem:[%s424_s5] ss:$0 sm:$0xff] }
  0xd0   :  { %v286_v21 = vpop.f32.mrf.mxu0 }
  0xd1   :  { %v99_v23 = vadd.f32 %v286_v21, %v263_v20  ;;  %v102_v28 = vmax.f32 %v88_v22, 0.0  ;;  %v270_v21 = vld [vmem:[%s425_s6] ss:$0 sm:$0xff] }
  0xd2   :  { %v90_v25 = vpop.f32.mrf.mxu0 }
  0xd3   :  { %v91_v26 = vadd.f32 %v263_v20, %v90_v25  ;;  %v105_v27 = vmax.f32 %v99_v23, 0.0 }
  0xd5   :  { %v103_v29 = vmax.f32 %v91_v26, 0.0  ;;  %v107_v32 = vpack.c.bf16 %v105_v27, %v104_v30 }
  0xd7   :  { %v106_v31 = vpack.c.bf16 %v103_v29, %v102_v28 }
  0xd9   :  { %291 = vmatprep.mubr.msk.bf16.mxu1 %vm46_vm0, %v106_v31 }
  0xda   :  { %292 = vmatmul.mubr.msk.bf16.vlgmr.msra.gmra.mxu1 %vm46_vm0, %v107_v32 }
 0x19a   :  { %v293_v34 = vpop.f32.mrf.mxu1 }
 0x19b   :  { %v170_v35 = vadd.f32 %v293_v34, %v266_v33 }
 0x19c   :  { %v161_v36 = vpop.f32.mrf.mxu1 }
 0x19d   :  { %v162_v37 = vadd.f32 %v266_v33, %v161_v36  ;;  %v178_v38 = vadd.f32 %v170_v35, %v29_v9 }
 0x19e   :  { %v294_v39 = vpop.f32.mrf.mxu1 }
 0x19f   :  { %v173_v40 = vadd.f32 %v294_v39, %v266_v33  ;;  %v188_v41 = vsel %vm46_vm0, %v178_v38, 0.0  ;;  %v176_v42 = vadd.f32 %v162_v37, %v27_v5 }
 0x1a0   :  { %189 = vadd.xlane.f32.xlu1 %v188_v41  ;;  %v164_v43 = vpop.f32.mrf.mxu1 }
 0x1a1   :  { %v165_v44 = vadd.f32 %v266_v33, %v164_v43  ;;  %v182_v45 = vsel %vm46_vm0, %v176_v42, 0.0  ;;  %v179_v46 = vadd.f32 %v173_v40, %v30_v10 }
 0x1a2   :  { %183 = vadd.xlane.f32.xlu0 %v182_v45 }
 0x1a3   :  { %v191_v47 = vsel %vm46_vm0, %v179_v46, 0.0  ;;  %v177_v48 = vadd.f32 %v165_v44, %v28_v6 }
 0x1a4   :  { %192 = vadd.xlane.f32.xlu1 %v191_v47 }
 0x1a5   :  { %v185_v49 = vsel %vm46_vm0, %v177_v48, 0.0 }
 0x1a6   :  { %186 = vadd.xlane.f32.xlu0 %v185_v49 }
 0x229   :  { %v190_v50 = vpop.xlane.xlu1 %189 }
 0x22a   :  { %v197_v51 = vmul.f32 0.03125, %v190_v50 }
 0x22b   :  { %v184_v52 = vpop.xlane.xlu0 %183 }
 0x22c   :  { %v195_v53 = vmul.f32 0.03125, %v184_v52  ;;  %v201_v55 = vsub.f32 %v178_v38, %v197_v51 }
 0x22d   :  { %v193_v54 = vpop.xlane.xlu1 %192 }
 0x22e   :  { %v199_v56 = vsub.f32 %v176_v42, %v195_v53  ;;  %v198_v57 = vmul.f32 0.03125, %v193_v54  ;;  %v205_v0 = vmul.f32 %v201_v55, %v201_v55 }
 0x22f   :  { %v187_v58 = vpop.xlane.xlu0 %186 }
 0x230   :  { %v196_v59 = vmul.f32 0.03125, %v187_v58  ;;  %v203_v60 = vmul.f32 %v199_v56, %v199_v56  ;;  %v202_v61 = vsub.f32 %v179_v46, %v198_v57  ;;  %v213_v2 = vsel %vm46_vm0, %v205_v0, 0.0 }
 0x232   :  { %v200_v62 = vsub.f32 %v177_v48, %v196_v59  ;;  %v207_v63 = vsel %vm46_vm0, %v203_v60, 0.0  ;;  %v206_v4 = vmul.f32 %v202_v61, %v202_v61 }
 0x233   :  { %208 = vadd.xlane.f32.xlu0 %v207_v63 }
 0x234   :  { %v204_v1 = vmul.f32 %v200_v62, %v200_v62  ;;  %v216_v5 = vsel %vm46_vm0, %v206_v4, 0.0 }
 0x236   :  { %v210_v3 = vsel %vm46_vm0, %v204_v1, 0.0 }
 0x237   :  { %214 = vadd.xlane.f32.xlu0 %v213_v2  ;;  %211 = vadd.xlane.f32.xlu1 %v210_v3 }
 0x23b   :  { %217 = vadd.xlane.f32.xlu1 %v216_v5 }
 0x2bc   :  { %v209_v6 = vpop.xlane.xlu0 %208 }
 0x2bd   :  { %v219_v7 = vmul.f32 0.03125, %v209_v6 }
 0x2bf   :  { %v223_v8 = vadd.f32 1e-05, %v219_v7 }
 0x2c0   :  { %v212_v9 = vpop.xlane.xlu1 %211  ;;  %v215_v10 = vpop.xlane.xlu0 %214 }
 0x2c1   :  { %295 = vrsqrt.f32 %v223_v8  ;;  %v220_v11 = vmul.f32 0.03125, %v212_v9  ;;  %v221_v12 = vmul.f32 0.03125, %v215_v10 }
 0x2c3   :  { %v224_v13 = vadd.f32 1e-05, %v220_v11  ;;  %v225_v14 = vadd.f32 1e-05, %v221_v12 }
 0x2c4   :  { %v218_v15 = vpop.xlane.xlu1 %217 }
 0x2c5   :  { %297 = vrsqrt.f32 %v224_v13  ;;  %v222_v16 = vmul.f32 0.03125, %v218_v15 }
 0x2c6   :  { %299 = vrsqrt.f32 %v225_v14 }
 0x2c7   :  { %v226_v17 = vadd.f32 1e-05, %v222_v16 }
 0x2c9   :  { %301 = vrsqrt.f32 %v226_v17 }
 0x2ce   :  { %v296_v18 = vpop.eup %295 }
 0x2cf   :  { %v231_v20 = vmul.f32 %v296_v18, %v199_v56 }
 0x2d1   :  { %v241_v22 = vmul.f32 %v269_v19, %v231_v20 }
 0x2d2   :  { %v298_v23 = vpop.eup %297 }
 0x2d3   :  { %v300_v24 = vpop.eup %299  ;;  %v251_v25 = vadd.f32 %v270_v21, %v241_v22  ;;  %v232_v26 = vmul.f32 %v298_v23, %v200_v62 }
 0x2d4   :  { %v233_v27 = vmul.f32 %v300_v24, %v201_v55 }
 0x2d5   :  { %255 = vst.msk [vmem:[%s426_s7] sm:$0xff] %vm46_vm0, %v251_v25  ;;  %v242_v28 = vmul.f32 %v269_v19, %v232_v26 }
 0x2d6   :  { %v302_v29 = vpop.eup %301  ;;  %v243_v30 = vmul.f32 %v269_v19, %v233_v27 }
 0x2d7   :  { %v252_v31 = vadd.f32 %v270_v21, %v242_v28  ;;  %v234_v32 = vmul.f32 %v302_v29, %v202_v61 }
 0x2d8   :  { %v253_v33 = vadd.f32 %v270_v21, %v243_v30 }
 0x2d9   :  { %256 = vst.msk [vmem:[%s426_s7 + $0x8] sm:$0xff] %vm46_vm0, %v252_v31  ;;  %v244_v34 = vmul.f32 %v269_v19, %v234_v32 }
 0x2da   :  { %257 = vst.msk [vmem:[%s426_s7 + $0x10] sm:$0xff] %vm46_vm0, %v253_v33 }
 0x2db   :  { %v254_v35 = vadd.f32 %v270_v21, %v244_v34 }
 0x2dd   :  { %258 = vst.msk [vmem:[%s426_s7 + $0x18] sm:$0xff] %vm46_vm0, %v254_v35 }

// kernel: seq2seq_forward.27
= control target key start
LH: loop header
LB: loop body
LE: loop exit
PB: predicated region body
PF: predicated region fallthrough
CT: control target
= control target key end

     0   :  { %vm34_vm0 = vcmask 261120   ;;  %vm90_vm1 = vcmask 785408   ;;  %s173_s1 = inlined_call_operand.vmem [shape: f32[32,96], index: 1, kind: input, shape index: {}]   ;;  %s174_s0 = inlined_call_operand.vmem [shape: f32[32,32], index: 0, kind: input, shape index: {}]   ;;  %s175_s2 = inlined_call_operand.vmem [shape: f32[1,96], index: 2, kind: input, shape index: {}]   ;;  %s176_s3 = inlined_call_operand.vmem [shape: f32[32,96], index: 3, kind: output, shape index: {}]  }
   0x1   :  { %v23_v0 = vld [vmem:[%s173_s1 + $0x10] sm:$0xff]  ;;  %v24_v1 = vld [vmem:[%s173_s1 + $0x18] sm:$0xff]  ;;  %v21_v2 = vld [vmem:[%s173_s1] sm:$0xff] }
   0x2   :  { %v26_v3 = vpack.c.bf16 %v24_v1, %v23_v0  ;;  %v22_v4 = vld [vmem:[%s173_s1 + $0x8] sm:$0xff]  ;;  %v15_v5 = vld [vmem:[%s174_s0] sm:$0xff]  ;;  %v17_v9 = vld [vmem:[%s174_s0 + $0x10] sm:$0xff] }
   0x3   :  { %v16_v6 = vld [vmem:[%s174_s0 + $0x8] sm:$0xff]  ;;  %v25_v7 = vpack.c.bf16 %v22_v4, %v21_v2  ;;  %v18_v10 = vld [vmem:[%s174_s0 + $0x18] sm:$0xff]  ;;  %v99_v12 = vld [vmem:[%s175_s2] ss:$0 sm:$0xff] }
   0x4   :  { %v19_v8 = vpack.c.bf16 %v16_v6, %v15_v5  ;;  %106 = vmatprep.subr.bf16.mxu0 %v26_v3  ;;  %v20_v11 = vpack.c.bf16 %v18_v10, %v17_v9 }
   0x5   :  { %107 = vmatpush3.bf16.msra.mxu0 %v26_v3 }
   0x6   :  { %110 = vmatprep.mubr.msk.bf16.mxu0 %vm34_vm0, %v19_v8  ;;  %108 = vmatprep.subr.bf16.mxu0 %v25_v7 }
   0x9   :  { %109 = vmatpush3.bf16.msra.mxu0 %v25_v7 }
   0xc   :  { %111 = vmatmul.mubr.msk.bf16.vlgmr.msra.gmra.mxu0 %vm34_vm0, %v20_v11 }
  0xcc   :  { %v112_v13 = vpop.f32.mrf.mxu0 }
  0xcd   :  { %v84_v14 = vadd.f32 %v112_v13, %v99_v12 }
  0xce   :  { %v75_v15 = vpop.f32.mrf.mxu0 }
  0xcf   :  { %93 = vst.msk [vmem:[%s176_s3 + $0x10] sm:$0xff] %vm90_vm1, %v84_v14  ;;  %v76_v16 = vadd.f32 %v99_v12, %v75_v15 }
  0xd0   :  { %v113_v17 = vpop.f32.mrf.mxu0 }
  0xd1   :  { %91 = vst.msk [vmem:[%s176_s3] sm:$0xff] %vm90_vm1, %v76_v16  ;;  %v87_v18 = vadd.f32 %v113_v17, %v99_v12 }
  0xd2   :  { %v78_v19 = vpop.f32.mrf.mxu0 }
  0xd3   :  { %94 = vst.msk [vmem:[%s176_s3 + $0x18] sm:$0xff] %vm90_vm1, %v87_v18  ;;  %v79_v20 = vadd.f32 %v99_v12, %v78_v19 }
  0xd5   :  { %92 = vst.msk [vmem:[%s176_s3 + $0x8] sm:$0xff] %vm90_vm1, %v79_v20 }

// kernel: seq2seq_forward.29
= control target key start
LH: loop header
LB: loop body
LE: loop exit
PB: predicated region body
PF: predicated region fallthrough
CT: control target
= control target key end

     0   :  { %vm43_vm0 = vcmask 261120   ;;  %s321_s2 = inlined_call_operand.vmem [shape: f32[32,32], index: 2, kind: input, shape index: {}]   ;;  %s322_s0 = inlined_call_operand.vmem [shape: f32[32,32], index: 0, kind: input, shape index: {}]   ;;  %s323_s3 = inlined_call_operand.vmem [shape: f32[1,32], index: 3, kind: input, shape index: {}]   ;;  %s324_s1 = inlined_call_operand.vmem [shape: f32[32,32], index: 1, kind: input, shape index: {}]   ;;  %s325_s4 = inlined_call_operand.vmem [shape: f32[1,32], index: 4, kind: input, shape index: {}]   ;;  %s326_s5 = inlined_call_operand.vmem [shape: f32[1,32], index: 5, kind: input, shape index: {}]   ;;  %s327_s6 = inlined_call_operand.vmem [shape: f32[32,32], index: 6, kind: output, shape index: {}]  }
   0x1   :  { %v32_v0 = vld [vmem:[%s321_s2 + $0x10] sm:$0xff]  ;;  %v33_v1 = vld [vmem:[%s321_s2 + $0x18] sm:$0xff]  ;;  %v30_v2 = vld [vmem:[%s321_s2] sm:$0xff] }
   0x2   :  { %v35_v3 = vpack.c.bf16 %v33_v1, %v32_v0  ;;  %v31_v4 = vld [vmem:[%s321_s2 + $0x8] sm:$0xff]  ;;  %v24_v5 = vld [vmem:[%s322_s0] sm:$0xff]  ;;  %v26_v9 = vld [vmem:[%s322_s0 + $0x10] sm:$0xff] }
   0x3   :  { %v25_v6 = vld [vmem:[%s322_s0 + $0x8] sm:$0xff]  ;;  %v34_v7 = vpack.c.bf16 %v31_v4, %v30_v2  ;;  %v27_v10 = vld [vmem:[%s322_s0 + $0x18] sm:$0xff]  ;;  %v190_v12 = vld [vmem:[%s323_s3] ss:$0 sm:$0xff] }
   0x4   :  { %v28_v8 = vpack.c.bf16 %v25_v6, %v24_v5  ;;  %199 = vmatprep.subr.bf16.mxu0 %v35_v3  ;;  %v29_v11 = vpack.c.bf16 %v27_v10, %v26_v9  ;;  %v101_v14 = vld [vmem:[%s324_s1 + $0x10] sm:$0xff]  ;;  %v99_v17 = vld [vmem:[%s324_s1] sm:$0xff]  ;;  %v102_v21 = vld [vmem:[%s324_s1 + $0x18] sm:$0xff] }
   0x5   :  { %200 = vmatpush3.bf16.msra.mxu0 %v35_v3  ;;  %v100_v26 = vld [vmem:[%s324_s1 + $0x8] sm:$0xff]  ;;  %v193_v2 = vld [vmem:[%s325_s4] ss:$0 sm:$0xff] }
   0x6   :  { %203 = vmatprep.mubr.msk.bf16.mxu0 %vm43_vm0, %v28_v8  ;;  %201 = vmatprep.subr.bf16.mxu0 %v34_v7  ;;  %v194_v4 = vld [vmem:[%s326_s5] ss:$0 sm:$0xff] }
   0x9   :  { %202 = vmatpush3.bf16.msra.mxu0 %v34_v7 }
   0xc   :  { %204 = vmatmul.mubr.msk.bf16.vlgmr.msra.gmra.mxu0 %vm43_vm0, %v29_v11 }
  0xcc   :  { %v205_v13 = vpop.f32.mrf.mxu0 }
  0xcd   :  { %v93_v15 = vadd.f32 %v205_v13, %v190_v12 }
  0xce   :  { %v84_v16 = vpop.f32.mrf.mxu0 }
  0xcf   :  { %v85_v18 = vadd.f32 %v190_v12, %v84_v16  ;;  %v105_v19 = vadd.f32 %v101_v14, %v93_v15 }
  0xd0   :  { %v206_v20 = vpop.f32.mrf.mxu0 }
  0xd1   :  { %v96_v22 = vadd.f32 %v206_v20, %v190_v12  ;;  %v115_v23 = vsel %vm43_vm0, %v105_v19, 0.0  ;;  %v103_v24 = vadd.f32 %v99_v17, %v85_v18 }
  0xd2   :  { %116 = vadd.xlane.f32.xlu1 %v115_v23  ;;  %v87_v25 = vpop.f32.mrf.mxu0 }
  0xd3   :  { %v88_v27 = vadd.f32 %v190_v12, %v87_v25  ;;  %v109_v28 = vsel %vm43_vm0, %v103_v24, 0.0  ;;  %v106_v29 = vadd.f32 %v102_v21, %v96_v22 }
  0xd4   :  { %110 = vadd.xlane.f32.xlu0 %v109_v28 }
  0xd5   :  { %v118_v30 = vsel %vm43_vm0, %v106_v29, 0.0  ;;  %v104_v31 = vadd.f32 %v100_v26, %v88_v27 }
  0xd6   :  { %119 = vadd.xlane.f32.xlu1 %v118_v30 }
  0xd7   :  { %v112_v32 = vsel %vm43_vm0, %v104_v31, 0.0 }
  0xd8   :  { %113 = vadd.xlane.f32.xlu0 %v112_v32 }
 0x15b   :  { %v117_v33 = vpop.xlane.xlu1 %116 }
 0x15c   :  { %v124_v34 = vmul.f32 0.03125, %v117_v33 }
 0x15d   :  { %v111_v35 = vpop.xlane.xlu0 %110 }
 0x15e   :  { %v122_v36 = vmul.f32 0.03125, %v111_v35  ;;  %v128_v38 = vsub.f32 %v105_v19, %v124_v34 }
 0x15f   :  { %v120_v37 = vpop.xlane.xlu1 %119 }
 0x160   :  { %v126_v39 = vsub.f32 %v103_v24, %v122_v36  ;;  %v125_v40 = vmul.f32 0.03125, %v120_v37  ;;  %v132_v47 = vmul.f32 %v128_v38, %v128_v38 }
 0x161   :  { %v114_v41 = vpop.xlane.xlu0 %113 }
 0x162   :  { %v123_v42 = vmul.f32 0.03125, %v114_v41  ;;  %v130_v43 = vmul.f32 %v126_v39, %v126_v39  ;;  %v129_v44 = vsub.f32 %v106_v29, %v125_v40  ;;  %v140_v49 = vsel %vm43_vm0, %v132_v47, 0.0 }
 0x164   :  { %v127_v45 = vsub.f32 %v104_v31, %v123_v42  ;;  %v134_v46 = vsel %vm43_vm0, %v130_v43, 0.0  ;;  %v133_v51 = vmul.f32 %v129_v44, %v129_v44 }
 0x165   :  { %135 = vadd.xlane.f32.xlu0 %v134_v46 }
 0x166   :  { %v131_v48 = vmul.f32 %v127_v45, %v127_v45  ;;  %v143_v52 = vsel %vm43_vm0, %v133_v51, 0.0 }
 0x168   :  { %v137_v50 = vsel %vm43_vm0, %v131_v48, 0.0 }
 0x169   :  { %141 = vadd.xlane.f32.xlu0 %v140_v49  ;;  %138 = vadd.xlane.f32.xlu1 %v137_v50 }
 0x16d   :  { %144 = vadd.xlane.f32.xlu1 %v143_v52 }
 0x1ee   :  { %v136_v53 = vpop.xlane.xlu0 %135 }
 0x1ef   :  { %v146_v54 = vmul.f32 0.03125, %v136_v53 }
 0x1f1   :  { %v150_v55 = vadd.f32 1e-05, %v146_v54 }
 0x1f2   :  { %v139_v56 = vpop.xlane.xlu1 %138  ;;  %v142_v57 = vpop.xlane.xlu0 %141 }
 0x1f3   :  { %207 = vrsqrt.f32 %v150_v55  ;;  %v147_v58 = vmul.f32 0.03125, %v139_v56  ;;  %v148_v59 = vmul.f32 0.03125, %v142_v57 }
 0x1f5   :  { %v151_v60 = vadd.f32 1e-05, %v147_v58  ;;  %v152_v61 = vadd.f32 1e-05, %v148_v59 }
 0x1f6   :  { %v145_v62 = vpop.xlane.xlu1 %144 }
 0x1f7   :  { %209 = vrsqrt.f32 %v151_v60  ;;  %v149_v63 = vmul.f32 0.03125, %v145_v62 }
 0x1f8   :  { %211 = vrsqrt.f32 %v152_v61 }
 0x1f9   :  { %v153_v0 = vadd.f32 1e-05, %v149_v63 }
 0x1fb   :  { %213 = vrsqrt.f32 %v153_v0 }
 0x200   :  { %v208_v1 = vpop.eup %207 }
 0x201   :  { %v158_v3 = vmul.f32 %v208_v1, %v126_v39 }
 0x203   :  { %v168_v5 = vmul.f32 %v193_v2, %v158_v3 }
 0x204   :  { %v210_v6 = vpop.eup %209 }
 0x205   :  { %v212_v7 = vpop.eup %211  ;;  %v178_v8 = vadd.f32 %v194_v4, %v168_v5  ;;  %v159_v9 = vmul.f32 %v210_v6, %v127_v45 }
 0x206   :  { %v160_v10 = vmul.f32 %v212_v7, %v128_v38 }
 0x207   :  { %182 = vst.msk [vmem:[%s327_s6] sm:$0xff] %vm43_vm0, %v178_v8  ;;  %v169_v11 = vmul.f32 %v193_v2, %v159_v9 }
 0x208   :  { %v214_v12 = vpop.eup %213  ;;  %v170_v13 = vmul.f32 %v193_v2, %v160_v10 }
 0x209   :  { %v179_v14 = vadd.f32 %v194_v4, %v169_v11  ;;  %v161_v15 = vmul.f32 %v214_v12, %v129_v44 }
 0x20a   :  { %v180_v16 = vadd.f32 %v194_v4, %v170_v13 }
 0x20b   :  { %183 = vst.msk [vmem:[%s327_s6 + $0x8] sm:$0xff] %vm43_vm0, %v179_v14  ;;  %v171_v17 = vmul.f32 %v193_v2, %v161_v15 }
 0x20c   :  { %184 = vst.msk [vmem:[%s327_s6 + $0x10] sm:$0xff] %vm43_vm0, %v180_v16 }
 0x20d   :  { %v181_v18 = vadd.f32 %v194_v4, %v171_v17 }
 0x20f   :  { %185 = vst.msk [vmem:[%s327_s6 + $0x18] sm:$0xff] %vm43_vm0, %v181_v18 }

// kernel: seq2seq_forward.28
= control target key start
LH: loop header
LB: loop body
LE: loop exit
PB: predicated region body
PF: predicated region fallthrough
CT: control target
= control target key end

     0   :  { %s938_s9 = smov 0   ;;  %s1057_s0 = inlined_call_operand.vmem [shape: f32[2,16,96], index: 0, kind: input, shape index: {}]   ;;  %s1058_s1 = inlined_call_operand.vmem [shape: f32[2,1,16], index: 1, kind: input, shape index: {}]   ;;  %s1059_s2 = inlined_call_operand.vmem [shape: f32[2,16,32], index: 2, kind: output, shape index: {}]  }
   0x1 LB: > { %s758_s10 = sadd.s32 4294967295, %s905_s9   ;;  %p762_p0 = scmp.ge.s32.totalorder %s905_s9, 1  ;;  %s905_s9 = sphi %s938_s9, %s12_s9  }
   0x2   : > { %p120_p1 = scmp.lt.s32.totalorder %s905_s9, 3 }
   0x4   : > { %p121_p2 = pnand %p762_p0, %p120_p1 }
   0x5   : > { %p145_p3 = scmp.lt.s32.totalorder (!%p121_p2), %s758_s10, 1  ;;  %s909_s15 = smov (!%p121_p2), 96  }
   0x6   : > { %124 = sbr.rel (%p121_p2) target bundleno = 1241 (0x4d9), region = 28  ;;  %s910_s16 = smov (!%p121_p2), 64  }
   0x7   : > { %s911_s17 = smov (!%p121_p2), 88   ;;  %s912_s21 = smov (!%p121_p2), 120  }
   0x8   : > { %s913_s22 = smov (!%p121_p2), 72   ;;  %s914_s23 = smov (!%p121_p2), 80  }
   0x9   : > { %s915_s24 = smov (!%p121_p2), 112   ;;  %s916_s25 = smov (!%p121_p2), 104  }
   0xa   : > { %s917_s26 = smov (!%p121_p2), 56   ;;  %s918_s27 = smov (!%p121_p2), 48  }
   0xb   : > { %v907_v0 = vmov 0.0   ;;  %vm908_vm0 = vmmov 0   ;;  %s1061_s10 = smov (!%p145_p3, %s758_s10), 1  ;;  %vm177_vm1 = vcmask 64512   ;;  %v169_v10 = vlaneseq  ;;  %s919_s28 = smov 40  }
   0xc   : > { %795 = vmatprep.subr.bf16.mxu0 %v907_v0  ;;  %797 = vmatprep.mubr.msk.bf16.mxu0 %vm908_vm0, %v907_v0  ;;  %s777_s11 = sshll.u32 %s1061_s10, 4  ;;  %s152_s20 = scalar_lea.vmem %s1058_s1, %s1061_s10  ;;  %vm225_vm3 = vcmask 130048   ;;  %vm688_vm4 = vcmask 195584   ;;  %vm691_vm5 = vcmask 261120  }
   0xd   : > { %801 = vmatprep.subr.bf16.mxu1 %v907_v0  ;;  %803 = vmatprep.mubr.msk.bf16.mxu1 %vm908_vm0, %v907_v0  ;;  %s149_s14 = scalar_lea.vmem %s1057_s0, %s777_s11  ;;  %v161_v11 = vld [vmem:[%s152_s20] sm:$0x1]  ;;  %v170_v12 = vshrl.u32 %v169_v10, 7  ;;  %s920_s29 = smov 8  }
   0xe   : > { %v159_v1 = vld [vmem:[%s149_s14] sm:$0xff]  ;;  %v160_v2 = vld [vmem:[%s149_s14 + $0x8] sm:$0xff]  ;;  %vm162_vm2 = vcmp.gt.f32.partialorder %v161_v11, 0.5  ;;  %s921_s30 = smov 16   ;;  %s922_s3 = smov 24  }
   0xf   : > { %v960_v3 = vpack.c.bf16 %v160_v2, %v159_v1  ;;  %v164_v4 = vmul.f32 0.35355338, %v159_v1  ;;  %v165_v5 = vmul.f32 0.35355338, %v160_v2  ;;  %v171_v13 = vsub.s32 0, %v170_v12  ;;  %s157_s6 = scalar_lea.vmem %s1059_s2, %s777_s11 }
  0x10   : > { %v163_v14 = vsel %vm162_vm2, -1e+30, %v907_v0 }
  0x11   : > { %175 = vrot.lane.b32.xlu0 %v960_v3, %s909_s15  ;;  %v166_v6 = vpack.c.bf16 %v165_v5, %v164_v4  ;;  %247 = vrot.lane.b32.xlu1 %v960_v3, %s910_s16  ;;  %v976_v15 = vrot.slane %v163_v14, %v171_v13 }
  0x15   : > { %299 = vrot.lane.b32.xlu1 %v960_v3, %s911_s17 }
  0x83   : > { %v176_v7 = vpop.permute.xlu0 %175  ;;  %v248_v9 = vpop.permute.xlu1 %247 }
  0x84   : > { %v182_v8 = vsel %vm177_vm1, %v176_v7, 0  ;;  %802 = vmatpush3.bf16.msra.mxu1 %v248_v9 }
  0x85   : > { %796 = vmatpush3.bf16.xpose.msra.mxu0 %v182_v8  ;;  %807 = vmatprep.subr.bf16.mxu1 %v907_v0 }
  0x86   : > { %813 = vmatprep.subr.bf16.mxu0 %v907_v0 }
  0x87   : > { %v300_v24 = vpop.permute.xlu1 %299 }
  0x88   : > { %v305_v35 = vsel %vm177_vm1, %v300_v24, 0 }
  0x8c   : > { %798 = vmatmul.mubr.msk.bf16.vlgmr.msra.gmra.mxu0 %vm177_vm1, %v166_v6 }
  0x8d   : > { %815 = vmatprep.mubr.msk.bf16.mxu0 %vm908_vm0, %v907_v0 }
 0x14c   : > { %v218_v16 = vpop.f32.mrf.mxu0 }
 0x14d   : > { %v219_v17 = vadd.f32 %v218_v16, %v976_v15 }
 0x14e   : > { %v799_v18 = vpop.f32.mrf.mxu0 }
 0x14f   : > { %v226_v19 = vsel %vm225_vm3, %v219_v17, -inf }
 0x150   : > { %227 = vmax.xlane.f32.xlu0 %v226_v19  ;;  %v221_v20 = vpop.f32.mrf.mxu0 }
 0x151   : > { %v222_v21 = vadd.f32 %v221_v20, %v976_v15 }
 0x152   : > { %v800_v22 = vpop.f32.mrf.mxu0 }
 0x153   : > { %v229_v23 = vsel %vm225_vm3, %v222_v21, -inf }
 0x154   : > { %230 = vmax.xlane.f32.xlu1 %v229_v23 }
 0x165   : > { %297 = vrot.lane.b32.xlu1 %v166_v6, %s912_s21 }
 0x166   : > { %541 = vrot.lane.b32.xlu0 %v960_v3, %s913_s22 }
 0x169   : > { %420 = vrot.lane.b32.xlu1 %v960_v3, %s914_s23 }
 0x16d   : > { %418 = vrot.lane.b32.xlu1 %v166_v6, %s915_s24 }
 0x171   : > { %539 = vrot.lane.b32.xlu1 %v166_v6, %s916_s25 }
 0x1d9   : > { %v228_v25 = vpop.xlane.xlu0 %227 }
 0x1da   : > { %v232_v26 = vsub.f32 %v219_v17, %v228_v25 }
 0x1dc   : > { %v234_v27 = vmul.f32 1.442695, %v232_v26 }
 0x1dd   : > { %v231_v28 = vpop.xlane.xlu1 %230  ;;  %v542_v38 = vpop.permute.xlu0 %541 }
 0x1de   : > { %v233_v29 = vsub.f32 %v222_v21, %v231_v28  ;;  %867 = vpow2.f32 %v234_v27  ;;  %v547_v40 = vsel %vm177_vm1, %v542_v38, 0 }
 0x1e0   : > { %v236_v30 = vmul.f32 1.442695, %v233_v29 }
 0x1e1   : > { %v298_v33 = vpop.permute.xlu1 %297 }
 0x1e2   : > { %869 = vpow2.f32 %v236_v30 }
 0x1e5   : > { %v421_v36 = vpop.permute.xlu1 %420 }
 0x1e6   : > { %v426_v37 = vsel %vm177_vm1, %v421_v36, 0 }
 0x1e9   : > { %v419_v39 = vpop.permute.xlu1 %418 }
 0x1eb   : > { %v984_v31 = vpop.eup %867 }
 0x1ed   : > { %v540_v41 = vpop.permute.xlu1 %539 }
 0x1ef   : > { %v986_v32 = vpop.eup %869 }
 0x1f0   : > { %v246_v34 = vpack.c.bf16 %v986_v32, %v984_v31 }
 0x1f2   : > { %804 = vmatmul.mubr.msk.bf16.vlgmr.msra.gmra.mxu1 %vm225_vm3, %v246_v34 }
 0x1f3   : > { %808 = vmatpush3.bf16.xpose.msra.mxu1 %v305_v35  ;;  %809 = vmatprep.mubr.msk.bf16.mxu1 %vm908_vm0, %v907_v0 }
 0x1f4   : > { %819 = vmatprep.subr.bf16.mxu1 %v907_v0 }
 0x1fa   : > { %810 = vmatmul.mubr.msk.bf16.vlgmr.msra.gmra.mxu1 %vm177_vm1, %v298_v33 }
 0x1fb   : > { %820 = vmatpush3.bf16.xpose.msra.mxu1 %v426_v37  ;;  %821 = vmatprep.mubr.msk.bf16.mxu1 %vm908_vm0, %v907_v0 }
 0x1fc   : > { %831 = vmatprep.subr.bf16.mxu1 %v907_v0 }
 0x202   : > { %822 = vmatmul.mubr.msk.bf16.vlgmr.msra.gmra.mxu1 %vm177_vm1, %v419_v39 }
 0x203   : > { %832 = vmatpush3.bf16.xpose.msra.mxu1 %v547_v40  ;;  %833 = vmatprep.mubr.msk.bf16.mxu1 %vm908_vm0, %v907_v0 }
 0x20a   : > { %834 = vmatmul.mubr.msk.bf16.vlgmr.msra.gmra.mxu1 %vm177_vm1, %v540_v41 }
 0x2b2   : > { %v1005_v42 = vpop.f32.mrf.mxu1 }
 0x2b4   : > { %v805_v43 = vpop.f32.mrf.mxu1 }
 0x2b6   : > { %v1007_v44 = vpop.f32.mrf.mxu1 }
 0x2b8   : > { %v806_v45 = vpop.f32.mrf.mxu1 }
 0x2ba   : > { %v341_v46 = vpop.f32.mrf.mxu1 }
 0x2bb   : > { %v342_v47 = vadd.f32 %v341_v46, %v976_v15  ;;  %v241_v46 = vsel %vm225_vm3, %v986_v32, 0.0 }
 0x2bc   : > { %v811_v48 = vpop.f32.mrf.mxu1 }
 0x2bd   : > { %v348_v49 = vsel %vm225_vm3, %v342_v47, -inf }
 0x2be   : > { %349 = vmax.xlane.f32.xlu1 %v348_v49  ;;  %v344_v50 = vpop.f32.mrf.mxu1 }
 0x2bf   : > { %v345_v51 = vadd.f32 %v344_v50, %v976_v15 }
 0x2c0   : > { %v812_v52 = vpop.f32.mrf.mxu1 }
 0x2c1   : > { %v351_v53 = vsel %vm225_vm3, %v345_v51, -inf }
 0x2c2   : > { %352 = vmax.xlane.f32.xlu0 %v351_v53  ;;  %v462_v54 = vpop.f32.mrf.mxu1 }
 0x2c3   : > { %v463_v1 = vadd.f32 %v462_v54, %v976_v15 }
 0x2c4   : > { %v823_v55 = vpop.f32.mrf.mxu1 }
 0x2c5   : > { %v469_v2 = vsel %vm225_vm3, %v463_v1, -inf }
 0x2c6   : > { %v465_v56 = vpop.f32.mrf.mxu1 }
 0x2c7   : > { %v466_v4 = vadd.f32 %v465_v56, %v976_v15 }
 0x2c8   : > { %v824_v57 = vpop.f32.mrf.mxu1 }
 0x2c9   : > { %v472_v6 = vsel %vm225_vm3, %v466_v4, -inf }
 0x2ca   : > { %v583_v58 = vpop.f32.mrf.mxu1 }
 0x2cb   : > { %v584_v5 = vadd.f32 %v583_v58, %v976_v15 }
 0x2cc   : > { %v835_v59 = vpop.f32.mrf.mxu1 }
 0x2cd   : > { %v590_v7 = vsel %vm225_vm3, %v584_v5, -inf }
 0x2ce   : > { %v586_v60 = vpop.f32.mrf.mxu1 }
 0x2cf   : > { %v587_v61 = vadd.f32 %v586_v60, %v976_v15  ;;  %369 = vrot.lane.b32.xlu1 %v960_v3, %s917_s26 }
 0x2d0   : > { %v836_v62 = vpop.f32.mrf.mxu1 }
 0x2d1   : > { %v593_v63 = vsel %vm225_vm3, %v587_v61, -inf }
 0x2d2   : > { %594 = vmax.xlane.f32.xlu0 %v593_v63 }
 0x2e8   : > { %490 = vrot.lane.b32.xlu0 %v960_v3, %s918_s27 }
 0x2f3   : > { %470 = vmax.xlane.f32.xlu1 %v469_v2 }
 0x2f7   : > { %473 = vmax.xlane.f32.xlu1 %v472_v6 }
 0x2fb   : > { %591 = vmax.xlane.f32.xlu1 %v590_v7 }
 0x30c   : > { %611 = vrot.lane.b32.xlu1 %v960_v3, %s919_s28 }
 0x347   : > { %v350_v8 = vpop.xlane.xlu1 %349 }
 0x348   : > { %v354_v9 = vsub.f32 %v342_v47, %v350_v8  ;;  %v238_v47 = vsel %vm225_vm3, %v984_v31, 0.0 }
 0x34a   : > { %v356_v10 = vmul.f32 1.442695, %v354_v9 }
 0x34b   : > { %v353_v11 = vpop.xlane.xlu0 %352  ;;  %v370_v12 = vpop.permute.xlu1 %369 }
 0x34c   : > { %871 = vpow2.f32 %v356_v10  ;;  %v355_v13 = vsub.f32 %v345_v51, %v353_v11  ;;  %814 = vmatpush3.bf16.msra.mxu0 %v370_v12 }
 0x34d   : > { %825 = vmatprep.subr.bf16.mxu0 %v907_v0 }
 0x34e   : > { %v358_v14 = vmul.f32 1.442695, %v355_v13 }
 0x350   : > { %873 = vpow2.f32 %v358_v14 }
 0x359   : > { %v872_v15 = vpop.eup %871 }
 0x35a   : > { %v360_v16 = vsel %vm225_vm3, %v872_v15, 0.0 }
 0x35b   : > { %v595_v17 = vpop.xlane.xlu0 %594  ;;  %361 = vadd.xlane.f32.xlu1 %v360_v16 }
 0x35c   : > { %v597_v23 = vsub.f32 %v587_v61, %v595_v17 }
 0x35d   : > { %v874_v18 = vpop.eup %873 }
 0x35e   : > { %v363_v3 = vsel %vm225_vm3, %v874_v18, 0.0  ;;  %v368_v19 = vpack.c.bf16 %v874_v18, %v872_v15  ;;  %v600_v27 = vmul.f32 1.442695, %v597_v23 }
 0x35f   : > { %364 = vadd.xlane.f32.xlu0 %v363_v3  ;;  %v491_v20 = vpop.permute.xlu0 %490 }
 0x360   : > { %816 = vmatmul.mubr.msk.bf16.vlgmr.msra.gmra.mxu0 %vm225_vm3, %v368_v19 }
 0x361   : > { %826 = vmatpush3.bf16.msra.mxu0 %v491_v20  ;;  %827 = vmatprep.mubr.msk.bf16.mxu0 %vm908_vm0, %v907_v0 }
 0x362   : > { %837 = vmatprep.subr.bf16.mxu0 %v907_v0 }
 0x37c   : > { %v471_v21 = vpop.xlane.xlu1 %470 }
 0x37d   : > { %v475_v22 = vsub.f32 %v463_v1, %v471_v21 }
 0x37f   : > { %v477_v24 = vmul.f32 1.442695, %v475_v22 }
 0x380   : > { %v474_v25 = vpop.xlane.xlu1 %473 }
 0x381   : > { %875 = vpow2.f32 %v477_v24  ;;  %v476_v26 = vsub.f32 %v466_v4, %v474_v25 }
 0x383   : > { %v479_v28 = vmul.f32 1.442695, %v476_v26 }
 0x384   : > { %v592_v29 = vpop.xlane.xlu1 %591 }
 0x385   : > { %877 = vpow2.f32 %v479_v28  ;;  %v596_v30 = vsub.f32 %v584_v5, %v592_v29 }
 0x386   : > { %879 = vpow2.f32 %v600_v27 }
 0x387   : > { %v598_v33 = vmul.f32 1.442695, %v596_v30 }
 0x388   : > { %v612_v38 = vpop.permute.xlu1 %611 }
 0x389   : > { %881 = vpow2.f32 %v598_v33 }
 0x38e   : > { %v876_v34 = vpop.eup %875 }
 0x38f   : > { %v481_v35 = vsel %vm225_vm3, %v876_v34, 0.0 }
 0x390   : > { %482 = vadd.xlane.f32.xlu0 %v481_v35 }
 0x392   : > { %v878_v36 = vpop.eup %877 }
 0x393   : > { %v484_v37 = vsel %vm225_vm3, %v878_v36, 0.0  ;;  %v489_v39 = vpack.c.bf16 %v878_v36, %v876_v34  ;;  %v880_v40 = vpop.eup %879 }
 0x394   : > { %485 = vadd.xlane.f32.xlu1 %v484_v37  ;;  %v605_v43 = vsel %vm225_vm3, %v880_v40, 0.0 }
 0x395   : > { %828 = vmatmul.mubr.msk.bf16.vlgmr.msra.gmra.mxu0 %vm225_vm3, %v489_v39 }
 0x396   : > { %v882_v41 = vpop.eup %881  ;;  %838 = vmatpush3.bf16.msra.mxu0 %v612_v38  ;;  %839 = vmatprep.mubr.msk.bf16.mxu0 %vm908_vm0, %v907_v0 }
 0x397   : > { %v602_v45 = vsel %vm225_vm3, %v882_v41, 0.0  ;;  %v610_v48 = vpack.c.bf16 %v880_v40, %v882_v41 }
 0x398   : > { %606 = vadd.xlane.f32.xlu1 %v605_v43  ;;  %603 = vadd.xlane.f32.xlu0 %v602_v45 }
 0x39c   : > { %242 = vadd.xlane.f32.xlu1 %v241_v46  ;;  %239 = vadd.xlane.f32.xlu0 %v238_v47 }
 0x39d   : > { %840 = vmatmul.mubr.msk.bf16.vlgmr.msra.gmra.mxu0 %vm225_vm3, %v610_v48 }
 0x3e4   : > { %v362_v49 = vpop.xlane.xlu1 %361 }
 0x3e5   : > { %883 = vrcp.f32 %v362_v49 }
 0x3e8   : > { %v365_v0 = vpop.xlane.xlu0 %364 }
 0x3e9   : > { %885 = vrcp.f32 %v365_v0 }
 0x3f2   : > { %v884_v50 = vpop.eup %883 }
 0x3f6   : > { %v886_v54 = vpop.eup %885 }
 0x419   : > { %v483_v31 = vpop.xlane.xlu0 %482 }
 0x41a   : > { %887 = vrcp.f32 %v483_v31 }
 0x41d   : > { %v486_v57 = vpop.xlane.xlu1 %485 }
 0x41e   : > { %889 = vrcp.f32 %v486_v57 }
 0x420   : > { %v409_v51 = vpop.f32.mrf.mxu0 }
 0x421   : > { %v416_v52 = vmul.f32 %v884_v50, %v409_v51  ;;  %v604_v58 = vpop.xlane.xlu0 %603  ;;  %v607_v59 = vpop.xlane.xlu1 %606 }
 0x422   : > { %v817_v53 = vpop.f32.mrf.mxu0  ;;  %891 = vrcp.f32 %v604_v58 }
 0x423   : > { %662 = vrot.lane.b32.xlu0 %v416_v52, %s920_s29  ;;  %893 = vrcp.f32 %v607_v59 }
 0x424   : > { %v412_v32 = vpop.f32.mrf.mxu0 }
 0x425   : > { %v417_v55 = vmul.f32 %v886_v54, %v412_v32  ;;  %v240_v14 = vpop.xlane.xlu0 %239  ;;  %v243_v15 = vpop.xlane.xlu1 %242 }
 0x426   : > { %v818_v56 = vpop.f32.mrf.mxu0  ;;  %895 = vrcp.f32 %v240_v14 }
 0x427   : > { %664 = vrot.lane.b32.xlu1 %v417_v55, %s920_s29  ;;  %v888_v60 = vpop.eup %887  ;;  %897 = vrcp.f32 %v243_v15 }
 0x42b   : > { %v890_v1 = vpop.eup %889 }
 0x42f   : > { %v892_v6 = vpop.eup %891 }
 0x430   : > { %v894_v10 = vpop.eup %893 }
 0x433   : > { %v896_v17 = vpop.eup %895 }
 0x434   : > { %v294_v19 = vmul.f32 %v896_v17, %v1005_v42  ;;  %v898_v20 = vpop.eup %897 }
 0x435   : > { %v295_v25 = vmul.f32 %v898_v20, %v1007_v44 }
 0x455   : > { %v530_v61 = vpop.f32.mrf.mxu0 }
 0x456   : > { %v537_v62 = vmul.f32 %v888_v60, %v530_v61 }
 0x457   : > { %v829_v63 = vpop.f32.mrf.mxu0 }
 0x458   : > { %670 = vrot.lane.b32.xlu1 %v537_v62, %s921_s30 }
 0x459   : > { %v533_v2 = vpop.f32.mrf.mxu0 }
 0x45a   : > { %v538_v4 = vmul.f32 %v890_v1, %v533_v2 }
 0x45b   : > { %v830_v5 = vpop.f32.mrf.mxu0 }
 0x45c   : > { %672 = vrot.lane.b32.xlu0 %v538_v4, %s921_s30 }
 0x45d   : > { %v651_v7 = vpop.f32.mrf.mxu0 }
 0x45e   : > { %v658_v8 = vmul.f32 %v892_v6, %v651_v7 }
 0x45f   : > { %v841_v9 = vpop.f32.mrf.mxu0 }
 0x460   : > { %678 = vrot.lane.b32.xlu1 %v658_v8, %s922_s3 }
 0x461   : > { %v654_v11 = vpop.f32.mrf.mxu0 }
 0x462   : > { %v659_v12 = vmul.f32 %v894_v10, %v654_v11 }
 0x463   : > { %v842_v13 = vpop.f32.mrf.mxu0 }
 0x464   : > { %680 = vrot.lane.b32.xlu0 %v659_v12, %s922_s3 }
 0x495   : > { %v663_v18 = vpop.permute.xlu0 %662 }
 0x496   : > { %v684_v21 = vsel %vm177_vm1, %v294_v19, %v663_v18 }
 0x499   : > { %v665_v16 = vpop.permute.xlu1 %664 }
 0x49a   : > { %v685_v42 = vsel %vm177_vm1, %v295_v25, %v665_v16 }
 0x4ca   : > { %v671_v3 = vpop.permute.xlu1 %670 }
 0x4cb   : > { %v686_v22 = vsel %vm225_vm3, %v684_v21, %v671_v3 }
 0x4ce   : > { %v673_v23 = vpop.permute.xlu0 %672 }
 0x4cf   : > { %v687_v27 = vsel %vm225_vm3, %v685_v42, %v673_v23 }
 0x4d2   : > { %v679_v24 = vpop.permute.xlu1 %678 }
 0x4d3   : > { %v689_v26 = vsel %vm688_vm4, %v686_v22, %v679_v24 }
 0x4d4   : > { %692 = vst.msk [vmem:[%s157_s6] sm:$0xff] %vm691_vm5, %v689_v26 }
 0x4d6   : > { %v681_v28 = vpop.permute.xlu0 %680 }
 0x4d7   : > { %v690_v29 = vsel %vm688_vm4, %v687_v27, %v681_v28 }
 0x4d8   : > { %693 = vst.msk [vmem:[%s157_s6 + $0x8] sm:$0xff] %vm691_vm5, %v690_v29 }
 0x4d9 PF: > { %s12_s9 = sadd.s32 1, %s905_s9  }
 0x4da   : > { %p9_p4 = scmp.ge.s32.totalorder %s12_s9, 4  }
 0x4dc   :  { %11 = sbr.rel (!%p9_p4) target bundleno = 1 (0x1), region = 61 }

// kernel: seq2seq_forward.40
= control target key start
LH: loop header
LB: loop body
LE: loop exit
PB: predicated region body
PF: predicated region fallthrough
CT: control target
= control target key end

     0   :  { %vm34_vm0 = vcmask 261120   ;;  %vm90_vm1 = vcmask 523264   ;;  %s173_s1 = inlined_call_operand.vmem [shape: f32[32,64], index: 1, kind: input, shape index: {}]   ;;  %s174_s0 = inlined_call_operand.vmem [shape: f32[32,32], index: 0, kind: input, shape index: {}]   ;;  %s175_s2 = inlined_call_operand.vmem [shape: f32[1,64], index: 2, kind: input, shape index: {}]   ;;  %s176_s3 = inlined_call_operand.vmem [shape: f32[32,64], index: 3, kind: output, shape index: {}]  }
   0x1   :  { %v23_v0 = vld [vmem:[%s173_s1 + $0x10] sm:$0xff]  ;;  %v24_v1 = vld [vmem:[%s173_s1 + $0x18] sm:$0xff]  ;;  %v21_v2 = vld [vmem:[%s173_s1] sm:$0xff] }
   0x2   :  { %v26_v3 = vpack.c.bf16 %v24_v1, %v23_v0  ;;  %v22_v4 = vld [vmem:[%s173_s1 + $0x8] sm:$0xff]  ;;  %v15_v5 = vld [vmem:[%s174_s0] sm:$0xff]  ;;  %v17_v9 = vld [vmem:[%s174_s0 + $0x10] sm:$0xff] }
   0x3   :  { %v16_v6 = vld [vmem:[%s174_s0 + $0x8] sm:$0xff]  ;;  %v25_v7 = vpack.c.bf16 %v22_v4, %v21_v2  ;;  %v18_v10 = vld [vmem:[%s174_s0 + $0x18] sm:$0xff]  ;;  %v99_v12 = vld [vmem:[%s175_s2] ss:$0 sm:$0xff] }
   0x4   :  { %v19_v8 = vpack.c.bf16 %v16_v6, %v15_v5  ;;  %106 = vmatprep.subr.bf16.mxu0 %v26_v3  ;;  %v20_v11 = vpack.c.bf16 %v18_v10, %v17_v9 }
   0x5   :  { %107 = vmatpush3.bf16.msra.mxu0 %v26_v3 }
   0x6   :  { %110 = vmatprep.mubr.msk.bf16.mxu0 %vm34_vm0, %v19_v8  ;;  %108 = vmatprep.subr.bf16.mxu0 %v25_v7 }
   0x9   :  { %109 = vmatpush3.bf16.msra.mxu0 %v25_v7 }
   0xc   :  { %111 = vmatmul.mubr.msk.bf16.vlgmr.msra.gmra.mxu0 %vm34_vm0, %v20_v11 }
  0xcc   :  { %v112_v13 = vpop.f32.mrf.mxu0 }
  0xcd   :  { %v84_v14 = vadd.f32 %v112_v13, %v99_v12 }
  0xce   :  { %v75_v15 = vpop.f32.mrf.mxu0 }
  0xcf   :  { %93 = vst.msk [vmem:[%s176_s3 + $0x10] sm:$0xff] %vm90_vm1, %v84_v14  ;;  %v76_v16 = vadd.f32 %v99_v12, %v75_v15 }
  0xd0   :  { %v113_v17 = vpop.f32.mrf.mxu0 }
  0xd1   :  { %91 = vst.msk [vmem:[%s176_s3] sm:$0xff] %vm90_vm1, %v76_v16  ;;  %v87_v18 = vadd.f32 %v113_v17, %v99_v12 }
  0xd2   :  { %v78_v19 = vpop.f32.mrf.mxu0 }
  0xd3   :  { %94 = vst.msk [vmem:[%s176_s3 + $0x18] sm:$0xff] %vm90_vm1, %v87_v18  ;;  %v79_v20 = vadd.f32 %v99_v12, %v78_v19 }
  0xd5   :  { %92 = vst.msk [vmem:[%s176_s3 + $0x8] sm:$0xff] %vm90_vm1, %v79_v20 }

// kernel: seq2seq_forward.35
= control target key start
LH: loop header
LB: loop body
LE: loop exit
PB: predicated region body
PF: predicated region fallthrough
CT: control target
= control target key end

     0   :  { %vm20_vm0 = vcmask 261120   ;;  %s174_s0 = inlined_call_operand.vmem [shape: f32[32,32], index: 0, kind: input, shape index: {}]   ;;  %s175_s1 = inlined_call_operand.vmem [shape: f32[1,32], index: 1, kind: input, shape index: {}]   ;;  %s176_s2 = inlined_call_operand.vmem [shape: f32[1,32], index: 2, kind: input, shape index: {}]   ;;  %s177_s3 = inlined_call_operand.vmem [shape: f32[32,32], index: 3, kind: output, shape index: {}]  }
   0x1   :  { %v14_v0 = vld [vmem:[%s174_s0] sm:$0xff]  ;;  %v16_v1 = vld [vmem:[%s174_s0 + $0x10] sm:$0xff]  ;;  %v15_v2 = vld [vmem:[%s174_s0 + $0x8] sm:$0xff] }
   0x2   :  { %v21_v3 = vsel %vm20_vm0, %v14_v0, 0.0  ;;  %v27_v4 = vsel %vm20_vm0, %v16_v1, 0.0  ;;  %v17_v5 = vld [vmem:[%s174_s0 + $0x18] sm:$0xff]  ;;  %v24_v6 = vsel %vm20_vm0, %v15_v2, 0.0  ;;  %v102_v41 = vld [vmem:[%s175_s1] ss:$0 sm:$0xff] }
   0x3   :  { %22 = vadd.xlane.f32.xlu0 %v21_v3  ;;  %28 = vadd.xlane.f32.xlu1 %v27_v4  ;;  %v30_v7 = vsel %vm20_vm0, %v17_v5, 0.0  ;;  %v103_v43 = vld [vmem:[%s176_s2] ss:$0 sm:$0xff] }
   0x7   :  { %25 = vadd.xlane.f32.xlu0 %v24_v6  ;;  %31 = vadd.xlane.f32.xlu1 %v30_v7 }
  0x8c   :  { %v23_v8 = vpop.xlane.xlu0 %22  ;;  %v29_v9 = vpop.xlane.xlu1 %28 }
  0x8d   :  { %v34_v10 = vmul.f32 0.03125, %v23_v8  ;;  %v36_v11 = vmul.f32 0.03125, %v29_v9 }
  0x8f   :  { %v38_v12 = vsub.f32 %v14_v0, %v34_v10  ;;  %v40_v13 = vsub.f32 %v16_v1, %v36_v11 }
  0x90   :  { %v26_v14 = vpop.xlane.xlu0 %25  ;;  %v32_v15 = vpop.xlane.xlu1 %31 }
  0x91   :  { %v35_v16 = vmul.f32 0.03125, %v26_v14  ;;  %v37_v17 = vmul.f32 0.03125, %v32_v15  ;;  %v42_v18 = vmul.f32 %v38_v12, %v38_v12  ;;  %v44_v19 = vmul.f32 %v40_v13, %v40_v13 }
  0x93   :  { %v39_v20 = vsub.f32 %v15_v2, %v35_v16  ;;  %v41_v21 = vsub.f32 %v17_v5, %v37_v17  ;;  %v46_v22 = vsel %vm20_vm0, %v42_v18, 0.0  ;;  %v52_v23 = vsel %vm20_vm0, %v44_v19, 0.0 }
  0x94   :  { %47 = vadd.xlane.f32.xlu0 %v46_v22 }
  0x95   :  { %v43_v24 = vmul.f32 %v39_v20, %v39_v20  ;;  %v45_v25 = vmul.f32 %v41_v21, %v41_v21 }
  0x97   :  { %v49_v26 = vsel %vm20_vm0, %v43_v24, 0.0  ;;  %v55_v27 = vsel %vm20_vm0, %v45_v25, 0.0 }
  0x98   :  { %53 = vadd.xlane.f32.xlu0 %v52_v23  ;;  %50 = vadd.xlane.f32.xlu1 %v49_v26 }
  0x9c   :  { %56 = vadd.xlane.f32.xlu1 %v55_v27 }
 0x11d   :  { %v48_v28 = vpop.xlane.xlu0 %47 }
 0x11e   :  { %v58_v29 = vmul.f32 0.03125, %v48_v28 }
 0x120   :  { %v62_v30 = vadd.f32 1e-05, %v58_v29 }
 0x121   :  { %v51_v31 = vpop.xlane.xlu1 %50  ;;  %v54_v32 = vpop.xlane.xlu0 %53 }
 0x122   :  { %104 = vrsqrt.f32 %v62_v30  ;;  %v59_v33 = vmul.f32 0.03125, %v51_v31  ;;  %v60_v34 = vmul.f32 0.03125, %v54_v32 }
 0x124   :  { %v63_v35 = vadd.f32 1e-05, %v59_v33  ;;  %v64_v36 = vadd.f32 1e-05, %v60_v34 }
 0x125   :  { %v57_v37 = vpop.xlane.xlu1 %56 }
 0x126   :  { %106 = vrsqrt.f32 %v63_v35  ;;  %v61_v38 = vmul.f32 0.03125, %v57_v37 }
 0x127   :  { %108 = vrsqrt.f32 %v64_v36 }
 0x128   :  { %v65_v39 = vadd.f32 1e-05, %v61_v38 }
 0x12a   :  { %110 = vrsqrt.f32 %v65_v39 }
 0x12f   :  { %v105_v40 = vpop.eup %104 }
 0x130   :  { %v70_v42 = vmul.f32 %v105_v40, %v38_v12 }
 0x132   :  { %v80_v44 = vmul.f32 %v102_v41, %v70_v42 }
 0x133   :  { %v107_v45 = vpop.eup %106 }
 0x134   :  { %v109_v46 = vpop.eup %108  ;;  %v90_v47 = vadd.f32 %v103_v43, %v80_v44  ;;  %v71_v48 = vmul.f32 %v107_v45, %v39_v20 }
 0x135   :  { %v72_v49 = vmul.f32 %v109_v46, %v40_v13 }
 0x136   :  { %94 = vst.msk [vmem:[%s177_s3] sm:$0xff] %vm20_vm0, %v90_v47  ;;  %v81_v50 = vmul.f32 %v102_v41, %v71_v48 }
 0x137   :  { %v111_v51 = vpop.eup %110  ;;  %v82_v52 = vmul.f32 %v102_v41, %v72_v49 }
 0x138   :  { %v91_v53 = vadd.f32 %v103_v43, %v81_v50  ;;  %v73_v54 = vmul.f32 %v111_v51, %v41_v21 }
 0x139   :  { %v92_v55 = vadd.f32 %v103_v43, %v82_v52 }
 0x13a   :  { %95 = vst.msk [vmem:[%s177_s3 + $0x8] sm:$0xff] %vm20_vm0, %v91_v53  ;;  %v83_v56 = vmul.f32 %v102_v41, %v73_v54 }
 0x13b   :  { %96 = vst.msk [vmem:[%s177_s3 + $0x10] sm:$0xff] %vm20_vm0, %v92_v55 }
 0x13c   :  { %v93_v57 = vadd.f32 %v103_v43, %v83_v56 }
 0x13e   :  { %97 = vst.msk [vmem:[%s177_s3 + $0x18] sm:$0xff] %vm20_vm0, %v93_v57 }

// kernel: seq2seq_forward.36
= control target key start
LH: loop header
LB: loop body
LE: loop exit
PB: predicated region body
PF: predicated region fallthrough
CT: control target
= control target key end

     0   :  { %v98_v0 = vmov 0.0   ;;  %vm99_vm0 = vmmov 0   ;;  %vm31_vm1 = vcmask 261120   ;;  %vm76_vm2 = vcmask 785408   ;;  %s147_s1 = inlined_call_operand.vmem [shape: f32[32,96], index: 1, kind: input, shape index: {}]   ;;  %s148_s0 = inlined_call_operand.vmem [shape: f32[16,32], index: 0, kind: input, shape index: {}]   ;;  %s149_s2 = inlined_call_operand.vmem [shape: f32[1,96], index: 2, kind: input, shape index: {}]   ;;  %s150_s3 = inlined_call_operand.vmem [shape: f32[16,96], index: 3, kind: output, shape index: {}]  }
   0x1   :  { %88 = vmatprep.subr.bf16.mxu0 %v98_v0  ;;  %v20_v1 = vld [vmem:[%s147_s1 + $0x10] sm:$0xff]  ;;  %v21_v2 = vld [vmem:[%s147_s1 + $0x18] sm:$0xff]  ;;  %v18_v3 = vld [vmem:[%s147_s1] sm:$0xff]  ;;  %92 = vmatprep.mubr.msk.bf16.mxu0 %vm99_vm0, %v98_v0 }
   0x2   :  { %v23_v4 = vpack.c.bf16 %v21_v2, %v20_v1  ;;  %v19_v5 = vld [vmem:[%s147_s1 + $0x8] sm:$0xff]  ;;  %v15_v7 = vld [vmem:[%s148_s0] sm:$0xff] }
   0x3   :  { %v22_v6 = vpack.c.bf16 %v19_v5, %v18_v3  ;;  %v16_v8 = vld [vmem:[%s148_s0 + $0x8] sm:$0xff]  ;;  %v83_v10 = vld [vmem:[%s149_s2] ss:$0 sm:$0xff] }
   0x4   :  { %89 = vmatpush3.bf16.msra.mxu0 %v23_v4  ;;  %v17_v9 = vpack.c.bf16 %v16_v8, %v15_v7 }
   0x5   :  { %90 = vmatprep.subr.bf16.mxu0 %v98_v0 }
   0x8   :  { %91 = vmatpush3.bf16.msra.mxu0 %v22_v6 }
   0xb   :  { %93 = vmatmul.mubr.msk.bf16.vlgmr.msra.gmra.mxu0 %vm31_vm1, %v17_v9 }
  0xcb   :  { %v69_v11 = vpop.f32.mrf.mxu0 }
  0xcc   :  { %v70_v12 = vadd.f32 %v83_v10, %v69_v11 }
  0xcd   :  { %v94_v13 = vpop.f32.mrf.mxu0 }
  0xce   :  { %77 = vst.msk [vmem:[%s150_s3] sm:$0xff] %vm76_vm2, %v70_v12 }
  0xcf   :  { %v72_v14 = vpop.f32.mrf.mxu0 }
  0xd0   :  { %v73_v15 = vadd.f32 %v83_v10, %v72_v14 }
  0xd1   :  { %v95_v16 = vpop.f32.mrf.mxu0 }
  0xd2   :  { %78 = vst.msk [vmem:[%s150_s3 + $0x8] sm:$0xff] %vm76_vm2, %v73_v15 }

// kernel: seq2seq_forward.39
= control target key start
LH: loop header
LB: loop body
LE: loop exit
PB: predicated region body
PF: predicated region fallthrough
CT: control target
= control target key end

     0   :  { %v97_v0 = vmov 0.0   ;;  %vm98_vm0 = vmmov 0   ;;  %vm31_vm1 = vcmask 261120   ;;  %s146_s1 = inlined_call_operand.vmem [shape: f32[32,32], index: 1, kind: input, shape index: {}]   ;;  %s147_s0 = inlined_call_operand.vmem [shape: f32[16,32], index: 0, kind: input, shape index: {}]   ;;  %s148_s2 = inlined_call_operand.vmem [shape: f32[1,32], index: 2, kind: input, shape index: {}]   ;;  %s149_s3 = inlined_call_operand.vmem [shape: f32[16,32], index: 3, kind: output, shape index: {}]  }
   0x1   :  { %87 = vmatprep.subr.bf16.mxu0 %v97_v0  ;;  %v20_v1 = vld [vmem:[%s146_s1 + $0x10] sm:$0xff]  ;;  %v21_v2 = vld [vmem:[%s146_s1 + $0x18] sm:$0xff]  ;;  %v18_v3 = vld [vmem:[%s146_s1] sm:$0xff]  ;;  %91 = vmatprep.mubr.msk.bf16.mxu0 %vm98_vm0, %v97_v0 }
   0x2   :  { %v23_v4 = vpack.c.bf16 %v21_v2, %v20_v1  ;;  %v19_v5 = vld [vmem:[%s146_s1 + $0x8] sm:$0xff]  ;;  %v15_v7 = vld [vmem:[%s147_s0] sm:$0xff] }
   0x3   :  { %v22_v6 = vpack.c.bf16 %v19_v5, %v18_v3  ;;  %v16_v8 = vld [vmem:[%s147_s0 + $0x8] sm:$0xff]  ;;  %v82_v10 = vld [vmem:[%s148_s2] ss:$0 sm:$0xff] }
   0x4   :  { %88 = vmatpush3.bf16.msra.mxu0 %v23_v4  ;;  %v17_v9 = vpack.c.bf16 %v16_v8, %v15_v7 }
   0x5   :  { %89 = vmatprep.subr.bf16.mxu0 %v97_v0 }
   0x8   :  { %90 = vmatpush3.bf16.msra.mxu0 %v22_v6 }
   0xb   :  { %92 = vmatmul.mubr.msk.bf16.vlgmr.msra.gmra.mxu0 %vm31_vm1, %v17_v9 }
  0xcb   :  { %v69_v11 = vpop.f32.mrf.mxu0 }
  0xcc   :  { %v70_v12 = vadd.f32 %v82_v10, %v69_v11 }
  0xcd   :  { %v93_v13 = vpop.f32.mrf.mxu0 }
  0xce   :  { %76 = vst.msk [vmem:[%s149_s3] sm:$0xff] %vm31_vm1, %v70_v12 }
  0xcf   :  { %v72_v14 = vpop.f32.mrf.mxu0 }
  0xd0   :  { %v73_v15 = vadd.f32 %v82_v10, %v72_v14 }
  0xd1   :  { %v94_v16 = vpop.f32.mrf.mxu0 }
  0xd2   :  { %77 = vst.msk [vmem:[%s149_s3 + $0x8] sm:$0xff] %vm31_vm1, %v73_v15 }

// kernel: seq2seq_forward.38
= control target key start
LH: loop header
LB: loop body
LE: loop exit
PB: predicated region body
PF: predicated region fallthrough
CT: control target
= control target key end

     0   :  { %v161_v0 = vmov 0.0   ;;  %vm162_vm0 = vmmov 0   ;;  %vm40_vm1 = vcmask 261120   ;;  %s244_s2 = inlined_call_operand.vmem [shape: f32[32,32], index: 2, kind: input, shape index: {}]   ;;  %s245_s0 = inlined_call_operand.vmem [shape: f32[16,32], index: 0, kind: input, shape index: {}]   ;;  %s246_s3 = inlined_call_operand.vmem [shape: f32[1,32], index: 3, kind: input, shape index: {}]   ;;  %s247_s1 = inlined_call_operand.vmem [shape: f32[16,32], index: 1, kind: input, shape index: {}]   ;;  %s248_s4 = inlined_call_operand.vmem [shape: f32[1,32], index: 4, kind: input, shape index: {}]   ;;  %s249_s5 = inlined_call_operand.vmem [shape: f32[1,32], index: 5, kind: input, shape index: {}]   ;;  %s250_s6 = inlined_call_operand.vmem [shape: f32[16,32], index: 6, kind: output, shape index: {}]  }
   0x1   :  { %147 = vmatprep.subr.bf16.mxu0 %v161_v0  ;;  %v29_v1 = vld [vmem:[%s244_s2 + $0x10] sm:$0xff]  ;;  %v30_v2 = vld [vmem:[%s244_s2 + $0x18] sm:$0xff]  ;;  %v27_v3 = vld [vmem:[%s244_s2] sm:$0xff]  ;;  %151 = vmatprep.mubr.msk.bf16.mxu0 %vm162_vm0, %v161_v0 }
   0x2   :  { %v32_v4 = vpack.c.bf16 %v30_v2, %v29_v1  ;;  %v28_v5 = vld [vmem:[%s244_s2 + $0x8] sm:$0xff]  ;;  %v24_v7 = vld [vmem:[%s245_s0] sm:$0xff] }
   0x3   :  { %v31_v6 = vpack.c.bf16 %v28_v5, %v27_v3  ;;  %v25_v8 = vld [vmem:[%s245_s0 + $0x8] sm:$0xff]  ;;  %v140_v10 = vld [vmem:[%s246_s3] ss:$0 sm:$0xff] }
   0x4   :  { %148 = vmatpush3.bf16.msra.mxu0 %v32_v4  ;;  %v26_v9 = vpack.c.bf16 %v25_v8, %v24_v7  ;;  %v85_v12 = vld [vmem:[%s247_s1] sm:$0xff]  ;;  %v86_v17 = vld [vmem:[%s247_s1 + $0x8] sm:$0xff] }
   0x5   :  { %149 = vmatprep.subr.bf16.mxu0 %v161_v0  ;;  %v142_v40 = vld [vmem:[%s248_s4] ss:$0 sm:$0xff] }
   0x6   :  { %v143_v42 = vld [vmem:[%s249_s5] ss:$0 sm:$0xff] }
   0x8   :  { %150 = vmatpush3.bf16.msra.mxu0 %v31_v6 }
   0xb   :  { %152 = vmatmul.mubr.msk.bf16.vlgmr.msra.gmra.mxu0 %vm40_vm1, %v26_v9 }
  0xcb   :  { %v78_v11 = vpop.f32.mrf.mxu0 }
  0xcc   :  { %v79_v13 = vadd.f32 %v140_v10, %v78_v11 }
  0xcd   :  { %v153_v14 = vpop.f32.mrf.mxu0 }
  0xce   :  { %v87_v15 = vadd.f32 %v85_v12, %v79_v13 }
  0xcf   :  { %v81_v16 = vpop.f32.mrf.mxu0 }
  0xd0   :  { %v82_v18 = vadd.f32 %v140_v10, %v81_v16  ;;  %v91_v19 = vsel %vm40_vm1, %v87_v15, 0.0 }
  0xd1   :  { %92 = vadd.xlane.f32.xlu0 %v91_v19  ;;  %v154_v20 = vpop.f32.mrf.mxu0 }
  0xd2   :  { %v88_v21 = vadd.f32 %v86_v17, %v82_v18 }
  0xd4   :  { %v94_v22 = vsel %vm40_vm1, %v88_v21, 0.0 }
  0xd5   :  { %95 = vadd.xlane.f32.xlu0 %v94_v22 }
 0x15a   :  { %v93_v23 = vpop.xlane.xlu0 %92 }
 0x15b   :  { %v98_v24 = vmul.f32 0.03125, %v93_v23 }
 0x15d   :  { %v100_v25 = vsub.f32 %v87_v15, %v98_v24 }
 0x15e   :  { %v96_v26 = vpop.xlane.xlu0 %95 }
 0x15f   :  { %v99_v27 = vmul.f32 0.03125, %v96_v26  ;;  %v102_v28 = vmul.f32 %v100_v25, %v100_v25 }
 0x161   :  { %v101_v29 = vsub.f32 %v88_v21, %v99_v27  ;;  %v104_v30 = vsel %vm40_vm1, %v102_v28, 0.0 }
 0x162   :  { %105 = vadd.xlane.f32.xlu1 %v104_v30 }
 0x163   :  { %v103_v31 = vmul.f32 %v101_v29, %v101_v29 }
 0x165   :  { %v107_v32 = vsel %vm40_vm1, %v103_v31, 0.0 }
 0x166   :  { %108 = vadd.xlane.f32.xlu1 %v107_v32 }
 0x1eb   :  { %v106_v33 = vpop.xlane.xlu1 %105 }
 0x1ec   :  { %v110_v34 = vmul.f32 0.03125, %v106_v33 }
 0x1ee   :  { %v112_v35 = vadd.f32 1e-05, %v110_v34 }
 0x1ef   :  { %v109_v36 = vpop.xlane.xlu1 %108 }
 0x1f0   :  { %157 = vrsqrt.f32 %v112_v35  ;;  %v111_v37 = vmul.f32 0.03125, %v109_v36 }
 0x1f2   :  { %v113_v38 = vadd.f32 1e-05, %v111_v37 }
 0x1f4   :  { %159 = vrsqrt.f32 %v113_v38 }
 0x1fd   :  { %v158_v39 = vpop.eup %157 }
 0x1fe   :  { %v116_v41 = vmul.f32 %v158_v39, %v100_v25 }
 0x200   :  { %v124_v43 = vmul.f32 %v142_v40, %v116_v41 }
 0x201   :  { %v160_v44 = vpop.eup %159 }
 0x202   :  { %v132_v45 = vadd.f32 %v143_v42, %v124_v43  ;;  %v117_v46 = vmul.f32 %v160_v44, %v101_v29 }
 0x204   :  { %134 = vst.msk [vmem:[%s250_s6] sm:$0xff] %vm40_vm1, %v132_v45  ;;  %v125_v47 = vmul.f32 %v142_v40, %v117_v46 }
 0x206   :  { %v133_v48 = vadd.f32 %v143_v42, %v125_v47 }
 0x208   :  { %135 = vst.msk [vmem:[%s250_s6 + $0x8] sm:$0xff] %vm40_vm1, %v133_v48 }

// kernel: seq2seq_forward.37
= control target key start
LH: loop header
LB: loop body
LE: loop exit
PB: predicated region body
PF: predicated region fallthrough
CT: control target
= control target key end

     0   :  { %s856_s9 = smov 0   ;;  %s958_s0 = inlined_call_operand.vmem [shape: f32[2,8,96], index: 0, kind: input, shape index: {}]   ;;  %s959_s1 = inlined_call_operand.vmem [shape: f32[2,1,8], index: 1, kind: input, shape index: {}]   ;;  %s960_s2 = inlined_call_operand.vmem [shape: f32[2,8,32], index: 2, kind: output, shape index: {}]  }
   0x1 LB: > { %s696_s10 = sadd.s32 4294967295, %s823_s9   ;;  %p700_p0 = scmp.ge.s32.totalorder %s823_s9, 1  ;;  %s823_s9 = sphi %s856_s9, %s12_s9  }
   0x2   : > { %p119_p1 = scmp.lt.s32.totalorder %s823_s9, 3 }
   0x4   : > { %p120_p2 = pnand %p700_p0, %p119_p1 }
   0x5   : > { %p142_p3 = scmp.lt.s32.totalorder (!%p120_p2), %s696_s10, 1  ;;  %s827_s15 = smov (!%p120_p2), 96  }
   0x6   : > { %123 = sbr.rel (%p120_p2) target bundleno = 1229 (0x4cd), region = 28  ;;  %s828_s16 = smov (!%p120_p2), 64  }
   0x7   : > { %s829_s17 = smov (!%p120_p2), 88   ;;  %s830_s18 = smov (!%p120_p2), 120  }
   0x8   : > { %s831_s19 = smov (!%p120_p2), 80   ;;  %s832_s20 = smov (!%p120_p2), 112  }
   0x9   : > { %s833_s21 = smov (!%p120_p2), 72   ;;  %s834_s22 = smov (!%p120_p2), 104  }
   0xa   : > { %s835_s26 = smov (!%p120_p2), 48   ;;  %s836_s27 = smov (!%p120_p2), 56  }
   0xb   : > { %v825_v0 = vmov 0.0   ;;  %vm826_vm0 = vmmov 0   ;;  %s962_s10 = smov (!%p142_p3, %s696_s10), 1  ;;  %vm176_vm1 = vcmask 64512   ;;  %v158_v7 = vlaneseq  ;;  %s837_s28 = smov 40  }
   0xc   : > { %729 = vmatprep.subr.bf16.mxu0 %v825_v0  ;;  %731 = vmatprep.mubr.msk.bf16.mxu0 %vm826_vm0, %v825_v0  ;;  %s701_s11 = sshll.u32 %s962_s10, 3  ;;  %s148_s25 = scalar_lea.vmem %s959_s1, %s962_s10  ;;  %vm239_vm4 = vcmask 1043456   ;;  %vm628_vm5 = vcmask 130048   ;;  %vm630_vm6 = vcmask 195584   ;;  %vm632_vm7 = vcmask 261120  }
   0xd   : > { %735 = vmatprep.subr.bf16.mxu1 %v825_v0  ;;  %737 = vmatprep.mubr.msk.bf16.mxu1 %vm826_vm0, %v825_v0  ;;  %s145_s14 = scalar_lea.vmem %s958_s0, %s701_s11  ;;  %v155_v8 = vld [vmem:[%s148_s25] sm:$0x1]  ;;  %v159_v9 = vshrl.u32 %v158_v7, 7  ;;  %v161_v12 = vand.u32 127, %v158_v7  ;;  %s838_s29 = smov 8  }
   0xe   : > { %v154_v1 = vld [vmem:[%s145_s14] sm:$0xff]  ;;  %vm156_vm2 = vcmp.gt.f32.partialorder %v155_v8, 0.5  ;;  %s839_s30 = smov 16   ;;  %s840_s3 = smov 24  }
   0xf   : > { %v878_v2 = vpack.c.bf16 %v154_v1, %v154_v1  ;;  %v170_v5 = vmul.f32 0.35355338, %v154_v1  ;;  %v166_v10 = vsub.s32 0, %v159_v9  ;;  %v157_v11 = vsel %vm156_vm2, -1e+30, %v825_v0  ;;  %s152_s6 = scalar_lea.vmem %s960_s2, %s701_s11 }
  0x10   : > { %vm162_vm3 = vcmp.gt.s32.totalorder %v161_v12, %v159_v9 }
  0x11   : > { %174 = vrot.lane.b32.xlu0 %v878_v2, %s827_s15  ;;  %v171_v6 = vpack.c.bf16 %v170_v5, %v170_v5  ;;  %234 = vrot.lane.b32.xlu1 %v878_v2, %s828_s16  ;;  %v167_v13 = vrot.slane %v157_v11, %v166_v10 }
  0x13   : > { %v895_v14 = vsel %vm162_vm3, -1e+30, %v167_v13 }
  0x15   : > { %287 = vrot.lane.b32.xlu1 %v878_v2, %s829_s17 }
  0x19   : > { %285 = vrot.lane.b32.xlu1 %v171_v6, %s830_s18 }
  0x1d   : > { %397 = vrot.lane.b32.xlu1 %v878_v2, %s831_s19 }
  0x21   : > { %395 = vrot.lane.b32.xlu1 %v171_v6, %s832_s20 }
  0x25   : > { %507 = vrot.lane.b32.xlu1 %v878_v2, %s833_s21 }
  0x29   : > { %505 = vrot.lane.b32.xlu1 %v171_v6, %s834_s22 }
  0x83   : > { %v175_v3 = vpop.permute.xlu0 %174  ;;  %v235_v21 = vpop.permute.xlu1 %234 }
  0x84   : > { %v181_v4 = vsel %vm176_vm1, %v175_v3, 0  ;;  %v241_v22 = vsel %vm239_vm4, %v235_v21, 0 }
  0x85   : > { %730 = vmatpush3.bf16.xpose.msra.mxu0 %v181_v4  ;;  %736 = vmatpush3.bf16.msra.mxu1 %v241_v22 }
  0x86   : > { %747 = vmatprep.subr.bf16.mxu0 %v825_v0  ;;  %741 = vmatprep.subr.bf16.mxu1 %v825_v0 }
  0x87   : > { %v288_v26 = vpop.permute.xlu1 %287 }
  0x88   : > { %v293_v29 = vsel %vm176_vm1, %v288_v26, 0 }
  0x8b   : > { %v286_v28 = vpop.permute.xlu1 %285 }
  0x8c   : > { %732 = vmatmul.mubr.msk.bf16.vlgmr.msra.gmra.mxu0 %vm176_vm1, %v171_v6 }
  0x8d   : > { %749 = vmatprep.mubr.msk.bf16.mxu0 %vm826_vm0, %v825_v0 }
  0x8f   : > { %v398_v31 = vpop.permute.xlu1 %397 }
  0x90   : > { %v403_v32 = vsel %vm176_vm1, %v398_v31, 0 }
  0x93   : > { %v396_v33 = vpop.permute.xlu1 %395 }
  0x97   : > { %v508_v34 = vpop.permute.xlu1 %507 }
  0x98   : > { %v513_v35 = vsel %vm176_vm1, %v508_v34, 0 }
  0x9b   : > { %v506_v36 = vpop.permute.xlu1 %505 }
 0x14c   : > { %v217_v15 = vpop.f32.mrf.mxu0 }
 0x14d   : > { %v218_v16 = vadd.f32 %v217_v15, %v895_v14 }
 0x14e   : > { %v733_v17 = vpop.f32.mrf.mxu0 }
 0x14f   : > { %v223_v18 = vsel %vm176_vm1, %v218_v16, -inf }
 0x150   : > { %224 = vmax.xlane.f32.xlu0 %v223_v18  ;;  %v220_v19 = vpop.f32.mrf.mxu0 }
 0x152   : > { %v734_v20 = vpop.f32.mrf.mxu0 }
 0x1d9   : > { %v225_v23 = vpop.xlane.xlu0 %224 }
 0x1da   : > { %v226_v24 = vsub.f32 %v218_v16, %v225_v23 }
 0x1dc   : > { %v227_v25 = vmul.f32 1.442695, %v226_v24 }
 0x1de   : > { %801 = vpow2.f32 %v227_v25 }
 0x1eb   : > { %v901_v27 = vpop.eup %801 }
 0x1ec   : > { %v233_v30 = vpack.c.bf16 %v901_v27, %v901_v27  ;;  %v229_v20 = vsel %vm176_vm1, %v901_v27, 0.0 }
 0x1ee   : > { %738 = vmatmul.mubr.msk.bf16.vlgmr.msra.gmra.mxu1 %vm176_vm1, %v233_v30 }
 0x1ef   : > { %742 = vmatpush3.bf16.xpose.msra.mxu1 %v293_v29  ;;  %743 = vmatprep.mubr.msk.bf16.mxu1 %vm826_vm0, %v825_v0 }
 0x1f0   : > { %753 = vmatprep.subr.bf16.mxu1 %v825_v0 }
 0x1f6   : > { %744 = vmatmul.mubr.msk.bf16.vlgmr.msra.gmra.mxu1 %vm176_vm1, %v286_v28 }
 0x1f7   : > { %754 = vmatpush3.bf16.xpose.msra.mxu1 %v403_v32  ;;  %755 = vmatprep.mubr.msk.bf16.mxu1 %vm826_vm0, %v825_v0 }
 0x1f8   : > { %765 = vmatprep.subr.bf16.mxu1 %v825_v0 }
 0x1fe   : > { %756 = vmatmul.mubr.msk.bf16.vlgmr.msra.gmra.mxu1 %vm176_vm1, %v396_v33 }
 0x1ff   : > { %766 = vmatpush3.bf16.xpose.msra.mxu1 %v513_v35  ;;  %767 = vmatprep.mubr.msk.bf16.mxu1 %vm826_vm0, %v825_v0 }
 0x206   : > { %768 = vmatmul.mubr.msk.bf16.vlgmr.msra.gmra.mxu1 %vm176_vm1, %v506_v36 }
 0x2ae   : > { %v920_v37 = vpop.f32.mrf.mxu1 }
 0x2b0   : > { %v739_v38 = vpop.f32.mrf.mxu1 }
 0x2b2   : > { %v280_v39 = vpop.f32.mrf.mxu1 }
 0x2b4   : > { %v740_v40 = vpop.f32.mrf.mxu1 }
 0x2b6   : > { %v329_v41 = vpop.f32.mrf.mxu1 }
 0x2b7   : > { %v330_v42 = vadd.f32 %v329_v41, %v895_v14 }
 0x2b8   : > { %v745_v43 = vpop.f32.mrf.mxu1 }
 0x2b9   : > { %v335_v44 = vsel %vm176_vm1, %v330_v42, -inf }
 0x2ba   : > { %336 = vmax.xlane.f32.xlu1 %v335_v44  ;;  %v332_v45 = vpop.f32.mrf.mxu1 }
 0x2bc   : > { %v746_v46 = vpop.f32.mrf.mxu1 }
 0x2be   : > { %v439_v47 = vpop.f32.mrf.mxu1 }
 0x2bf   : > { %v440_v48 = vadd.f32 %v439_v47, %v895_v14 }
 0x2c0   : > { %v757_v49 = vpop.f32.mrf.mxu1 }
 0x2c1   : > { %v445_v50 = vsel %vm176_vm1, %v440_v48, -inf }
 0x2c2   : > { %446 = vmax.xlane.f32.xlu0 %v445_v50  ;;  %v442_v51 = vpop.f32.mrf.mxu1 }
 0x2c4   : > { %v758_v52 = vpop.f32.mrf.mxu1 }
 0x2c6   : > { %v549_v53 = vpop.f32.mrf.mxu1 }
 0x2c7   : > { %v550_v57 = vadd.f32 %v549_v53, %v895_v14 }
 0x2c8   : > { %v769_v54 = vpop.f32.mrf.mxu1 }
 0x2c9   : > { %v555_v58 = vsel %vm176_vm1, %v550_v57, -inf }
 0x2ca   : > { %v552_v55 = vpop.f32.mrf.mxu1 }
 0x2cb   : > { %456 = vrot.lane.b32.xlu1 %v878_v2, %s835_s26 }
 0x2cc   : > { %v770_v56 = vpop.f32.mrf.mxu1 }
 0x2d8   : > { %346 = vrot.lane.b32.xlu0 %v878_v2, %s836_s27 }
 0x2f7   : > { %556 = vmax.xlane.f32.xlu0 %v555_v58 }
 0x30d   : > { %566 = vrot.lane.b32.xlu0 %v878_v2, %s837_s28 }
 0x343   : > { %v337_v59 = vpop.xlane.xlu1 %336 }
 0x344   : > { %v338_v60 = vsub.f32 %v330_v42, %v337_v59 }
 0x346   : > { %v339_v61 = vmul.f32 1.442695, %v338_v60 }
 0x347   : > { %v457_v5 = vpop.permute.xlu1 %456 }
 0x348   : > { %803 = vpow2.f32 %v339_v61  ;;  %v462_v2 = vsel %vm239_vm4, %v457_v5, 0 }
 0x34b   : > { %v447_v62 = vpop.xlane.xlu0 %446 }
 0x34c   : > { %v448_v63 = vsub.f32 %v440_v48, %v447_v62 }
 0x34e   : > { %v449_v1 = vmul.f32 1.442695, %v448_v63 }
 0x34f   : > { %v347_v3 = vpop.permute.xlu0 %346 }
 0x350   : > { %805 = vpow2.f32 %v449_v1  ;;  %v352_v4 = vsel %vm239_vm4, %v347_v3, 0 }
 0x351   : > { %748 = vmatpush3.bf16.msra.mxu0 %v352_v4 }
 0x352   : > { %759 = vmatprep.subr.bf16.mxu0 %v825_v0 }
 0x355   : > { %v804_v6 = vpop.eup %803 }
 0x356   : > { %v341_v7 = vsel %vm176_vm1, %v804_v6, 0.0  ;;  %v345_v8 = vpack.c.bf16 %v804_v6, %v804_v6 }
 0x357   : > { %342 = vadd.xlane.f32.xlu0 %v341_v7 }
 0x358   : > { %750 = vmatmul.mubr.msk.bf16.vlgmr.msra.gmra.mxu0 %vm176_vm1, %v345_v8 }
 0x359   : > { %760 = vmatpush3.bf16.msra.mxu0 %v462_v2  ;;  %761 = vmatprep.mubr.msk.bf16.mxu0 %vm826_vm0, %v825_v0 }
 0x35a   : > { %771 = vmatprep.subr.bf16.mxu0 %v825_v0 }
 0x35d   : > { %v806_v9 = vpop.eup %805 }
 0x35e   : > { %v451_v10 = vsel %vm176_vm1, %v806_v9, 0.0  ;;  %v455_v11 = vpack.c.bf16 %v806_v9, %v806_v9 }
 0x35f   : > { %452 = vadd.xlane.f32.xlu1 %v451_v10 }
 0x360   : > { %762 = vmatmul.mubr.msk.bf16.vlgmr.msra.gmra.mxu0 %vm176_vm1, %v455_v11 }
 0x361   : > { %773 = vmatprep.mubr.msk.bf16.mxu0 %vm826_vm0, %v825_v0 }
 0x380   : > { %v557_v12 = vpop.xlane.xlu0 %556 }
 0x381   : > { %v558_v13 = vsub.f32 %v550_v57, %v557_v12 }
 0x383   : > { %v559_v14 = vmul.f32 1.442695, %v558_v13 }
 0x384   : > { %v567_v15 = vpop.permute.xlu0 %566 }
 0x385   : > { %807 = vpow2.f32 %v559_v14  ;;  %v572_v16 = vsel %vm239_vm4, %v567_v15, 0 }
 0x386   : > { %772 = vmatpush3.bf16.msra.mxu0 %v572_v16 }
 0x392   : > { %v808_v17 = vpop.eup %807 }
 0x393   : > { %v561_v18 = vsel %vm176_vm1, %v808_v17, 0.0  ;;  %v565_v19 = vpack.c.bf16 %v808_v17, %v808_v17 }
 0x394   : > { %562 = vadd.xlane.f32.xlu0 %v561_v18 }
 0x395   : > { %774 = vmatmul.mubr.msk.bf16.vlgmr.msra.gmra.mxu0 %vm176_vm1, %v565_v19 }
 0x398   : > { %230 = vadd.xlane.f32.xlu0 %v229_v20 }
 0x3e0   : > { %v343_v0 = vpop.xlane.xlu0 %342 }
 0x3e1   : > { %809 = vrcp.f32 %v343_v0 }
 0x3e8   : > { %v453_v21 = vpop.xlane.xlu1 %452 }
 0x3e9   : > { %811 = vrcp.f32 %v453_v21 }
 0x3ee   : > { %v810_v22 = vpop.eup %809 }
 0x3f6   : > { %v812_v29 = vpop.eup %811 }
 0x418   : > { %v388_v23 = vpop.f32.mrf.mxu0 }
 0x419   : > { %v394_v24 = vmul.f32 %v810_v22, %v388_v23 }
 0x41a   : > { %v751_v25 = vpop.f32.mrf.mxu0 }
 0x41b   : > { %616 = vrot.lane.b32.xlu0 %v394_v24, %s838_s29 }
 0x41c   : > { %v391_v26 = vpop.f32.mrf.mxu0 }
 0x41d   : > { %v563_v34 = vpop.xlane.xlu0 %562 }
 0x41e   : > { %v752_v28 = vpop.f32.mrf.mxu0  ;;  %813 = vrcp.f32 %v563_v34 }
 0x420   : > { %v498_v30 = vpop.f32.mrf.mxu0 }
 0x421   : > { %v504_v31 = vmul.f32 %v812_v29, %v498_v30  ;;  %v231_v42 = vpop.xlane.xlu0 %230 }
 0x422   : > { %v763_v32 = vpop.f32.mrf.mxu0  ;;  %815 = vrcp.f32 %v231_v42 }
 0x423   : > { %620 = vrot.lane.b32.xlu1 %v504_v31, %s839_s30 }
 0x424   : > { %v501_v27 = vpop.f32.mrf.mxu0 }
 0x426   : > { %v764_v33 = vpop.f32.mrf.mxu0 }
 0x42b   : > { %v814_v35 = vpop.eup %813 }
 0x42f   : > { %v816_v43 = vpop.eup %815 }
 0x430   : > { %v283_v45 = vmul.f32 %v816_v43, %v920_v37 }
 0x455   : > { %v608_v36 = vpop.f32.mrf.mxu0 }
 0x456   : > { %v614_v38 = vmul.f32 %v814_v35, %v608_v36 }
 0x457   : > { %v775_v39 = vpop.f32.mrf.mxu0 }
 0x458   : > { %624 = vrot.lane.b32.xlu0 %v614_v38, %s840_s3 }
 0x459   : > { %v611_v40 = vpop.f32.mrf.mxu0 }
 0x45b   : > { %v776_v41 = vpop.f32.mrf.mxu0 }
 0x48d   : > { %v617_v44 = vpop.permute.xlu0 %616 }
 0x48e   : > { %v627_v47 = vsel %vm176_vm1, %v283_v45, %v617_v44 }
 0x495   : > { %v621_v46 = vpop.permute.xlu1 %620 }
 0x496   : > { %v629_v48 = vsel %vm628_vm5, %v627_v47, %v621_v46 }
 0x4ca   : > { %v625_v49 = vpop.permute.xlu0 %624 }
 0x4cb   : > { %v631_v50 = vsel %vm630_vm6, %v629_v48, %v625_v49 }
 0x4cc   : > { %633 = vst.msk [vmem:[%s152_s6] sm:$0xff] %vm632_vm7, %v631_v50 }
 0x4cd PF: > { %s12_s9 = sadd.s32 1, %s823_s9  }
 0x4ce   : > { %p9_p4 = scmp.ge.s32.totalorder %s12_s9, 4  }
 0x4d0   :  { %11 = sbr.rel (!%p9_p4) target bundleno = 1 (0x1), region = 61 }

// kernel: seq2seq_forward.52
= control target key start
LH: loop header
LB: loop body
LE: loop exit
PB: predicated region body
PF: predicated region fallthrough
CT: control target
= control target key end

     0   :  { %vm18_vm0 = vcmask 261120   ;;  %s118_s0 = inlined_call_operand.vmem [shape: f32[16,32], index: 0, kind: input, shape index: {}]   ;;  %s119_s1 = inlined_call_operand.vmem [shape: f32[1,32], index: 1, kind: input, shape index: {}]   ;;  %s120_s2 = inlined_call_operand.vmem [shape: f32[1,32], index: 2, kind: input, shape index: {}]   ;;  %s121_s3 = inlined_call_operand.vmem [shape: f32[16,32], index: 3, kind: output, shape index: {}]  }
   0x1   :  { %v14_v0 = vld [vmem:[%s118_s0] sm:$0xff]  ;;  %v15_v1 = vld [vmem:[%s118_s0 + $0x8] sm:$0xff] }
   0x2   :  { %v19_v2 = vsel %vm18_vm0, %v14_v0, 0.0  ;;  %v22_v3 = vsel %vm18_vm0, %v15_v1, 0.0  ;;  %v68_v21 = vld [vmem:[%s119_s1] ss:$0 sm:$0xff] }
   0x3   :  { %20 = vadd.xlane.f32.xlu0 %v19_v2  ;;  %v69_v23 = vld [vmem:[%s120_s2] ss:$0 sm:$0xff] }
   0x7   :  { %23 = vadd.xlane.f32.xlu0 %v22_v3 }
  0x8c   :  { %v21_v4 = vpop.xlane.xlu0 %20 }
  0x8d   :  { %v26_v5 = vmul.f32 0.03125, %v21_v4 }
  0x8f   :  { %v28_v6 = vsub.f32 %v14_v0, %v26_v5 }
  0x90   :  { %v24_v7 = vpop.xlane.xlu0 %23 }
  0x91   :  { %v27_v8 = vmul.f32 0.03125, %v24_v7  ;;  %v30_v9 = vmul.f32 %v28_v6, %v28_v6 }
  0x93   :  { %v29_v10 = vsub.f32 %v15_v1, %v27_v8  ;;  %v32_v11 = vsel %vm18_vm0, %v30_v9, 0.0 }
  0x94   :  { %33 = vadd.xlane.f32.xlu1 %v32_v11 }
  0x95   :  { %v31_v12 = vmul.f32 %v29_v10, %v29_v10 }
  0x97   :  { %v35_v13 = vsel %vm18_vm0, %v31_v12, 0.0 }
  0x98   :  { %36 = vadd.xlane.f32.xlu1 %v35_v13 }
 0x11d   :  { %v34_v14 = vpop.xlane.xlu1 %33 }
 0x11e   :  { %v38_v15 = vmul.f32 0.03125, %v34_v14 }
 0x120   :  { %v40_v16 = vadd.f32 1e-05, %v38_v15 }
 0x121   :  { %v37_v17 = vpop.xlane.xlu1 %36 }
 0x122   :  { %70 = vrsqrt.f32 %v40_v16  ;;  %v39_v18 = vmul.f32 0.03125, %v37_v17 }
 0x124   :  { %v41_v19 = vadd.f32 1e-05, %v39_v18 }
 0x126   :  { %72 = vrsqrt.f32 %v41_v19 }
 0x12f   :  { %v71_v20 = vpop.eup %70 }
 0x130   :  { %v44_v22 = vmul.f32 %v71_v20, %v28_v6 }
 0x132   :  { %v52_v24 = vmul.f32 %v68_v21, %v44_v22 }
 0x133   :  { %v73_v25 = vpop.eup %72 }
 0x134   :  { %v60_v26 = vadd.f32 %v69_v23, %v52_v24  ;;  %v45_v27 = vmul.f32 %v73_v25, %v29_v10 }
 0x136   :  { %62 = vst.msk [vmem:[%s121_s3] sm:$0xff] %vm18_vm0, %v60_v26  ;;  %v53_v28 = vmul.f32 %v68_v21, %v45_v27 }
 0x138   :  { %v61_v29 = vadd.f32 %v69_v23, %v53_v28 }
 0x13a   :  { %63 = vst.msk [vmem:[%s121_s3 + $0x8] sm:$0xff] %vm18_vm0, %v61_v29 }

// kernel: seq2seq_forward.43
= control target key start
LH: loop header
LB: loop body
LE: loop exit
PB: predicated region body
PF: predicated region fallthrough
CT: control target
= control target key end

     0   :  { %v235_v0 = vmov 0.0   ;;  %vm236_vm0 = vmmov 0   ;;  %vm43_vm1 = vcmask 261120   ;;  %s333_s1 = inlined_call_operand.vmem [shape: f32[32,32], index: 1, kind: input, shape index: {}]   ;;  %s334_s0 = inlined_call_operand.vmem [shape: f32[16,32], index: 0, kind: input, shape index: {}]   ;;  %s335_s3 = inlined_call_operand.vmem [shape: f32[32,32], index: 3, kind: input, shape index: {}]   ;;  %s336_s2 = inlined_call_operand.vmem [shape: f32[1,32], index: 2, kind: input, shape index: {}]   ;;  %s337_s4 = inlined_call_operand.vmem [shape: f32[1,32], index: 4, kind: input, shape index: {}]   ;;  %s338_s5 = inlined_call_operand.vmem [shape: f32[1,32], index: 5, kind: input, shape index: {}]   ;;  %s339_s6 = inlined_call_operand.vmem [shape: f32[1,32], index: 6, kind: input, shape index: {}]   ;;  %s340_s7 = inlined_call_operand.vmem [shape: f32[16,32], index: 7, kind: output, shape index: {}]  }
   0x1   :  { %213 = vmatprep.subr.bf16.mxu0 %v235_v0  ;;  %v32_v1 = vld [vmem:[%s333_s1 + $0x10] sm:$0xff]  ;;  %v33_v2 = vld [vmem:[%s333_s1 + $0x18] sm:$0xff]  ;;  %v30_v3 = vld [vmem:[%s333_s1] sm:$0xff]  ;;  %217 = vmatprep.mubr.msk.bf16.mxu0 %vm236_vm0, %v235_v0 }
   0x2   :  { %v35_v4 = vpack.c.bf16 %v33_v2, %v32_v1  ;;  %v31_v5 = vld [vmem:[%s333_s1 + $0x8] sm:$0xff]  ;;  %221 = vmatprep.subr.bf16.mxu1 %v235_v0  ;;  %225 = vmatprep.mubr.msk.bf16.mxu1 %vm236_vm0, %v235_v0  ;;  %v27_v7 = vld [vmem:[%s334_s0] sm:$0xff]  ;;  %v93_v10 = vld [vmem:[%s335_s3 + $0x10] sm:$0xff] }
   0x3   :  { %v34_v6 = vpack.c.bf16 %v31_v5, %v30_v3  ;;  %v28_v8 = vld [vmem:[%s334_s0 + $0x8] sm:$0xff]  ;;  %v94_v11 = vld [vmem:[%s335_s3 + $0x18] sm:$0xff]  ;;  %v91_v13 = vld [vmem:[%s335_s3] sm:$0xff] }
   0x4   :  { %214 = vmatpush3.bf16.msra.mxu0 %v35_v4  ;;  %v29_v9 = vpack.c.bf16 %v28_v8, %v27_v7  ;;  %v96_v12 = vpack.c.bf16 %v94_v11, %v93_v10  ;;  %v92_v14 = vld [vmem:[%s335_s3 + $0x8] sm:$0xff]  ;;  %v201_v16 = vld [vmem:[%s336_s2] ss:$0 sm:$0xff] }
   0x5   :  { %215 = vmatprep.subr.bf16.mxu0 %v235_v0  ;;  %v95_v15 = vpack.c.bf16 %v92_v14, %v91_v13  ;;  %v203_v26 = vld [vmem:[%s337_s4] ss:$0 sm:$0xff] }
   0x6   :  { %222 = vmatpush3.bf16.msra.mxu1 %v96_v12  ;;  %v205_v54 = vld [vmem:[%s338_s5] ss:$0 sm:$0xff] }
   0x7   :  { %223 = vmatprep.subr.bf16.mxu1 %v235_v0  ;;  %v206_v56 = vld [vmem:[%s339_s6] ss:$0 sm:$0xff] }
   0x8   :  { %216 = vmatpush3.bf16.msra.mxu0 %v34_v6 }
   0xa   :  { %224 = vmatpush3.bf16.msra.mxu1 %v95_v15 }
   0xb   :  { %218 = vmatmul.mubr.msk.bf16.vlgmr.msra.gmra.mxu0 %vm43_vm1, %v29_v9 }
  0xcb   :  { %v81_v17 = vpop.f32.mrf.mxu0 }
  0xcc   :  { %v82_v19 = vadd.f32 %v201_v16, %v81_v17 }
  0xcd   :  { %v219_v18 = vpop.f32.mrf.mxu0 }
  0xce   :  { %v88_v23 = vmax.f32 %v82_v19, 0.0 }
  0xcf   :  { %v84_v20 = vpop.f32.mrf.mxu0 }
  0xd0   :  { %v85_v21 = vadd.f32 %v201_v16, %v84_v20 }
  0xd1   :  { %v220_v22 = vpop.f32.mrf.mxu0 }
  0xd2   :  { %v89_v24 = vmax.f32 %v85_v21, 0.0 }
  0xd4   :  { %v90_v25 = vpack.c.bf16 %v89_v24, %v88_v23 }
  0xd6   :  { %226 = vmatmul.mubr.msk.bf16.vlgmr.msra.gmra.mxu1 %vm43_vm1, %v90_v25 }
 0x196   :  { %v141_v27 = vpop.f32.mrf.mxu1 }
 0x197   :  { %v142_v28 = vadd.f32 %v203_v26, %v141_v27 }
 0x198   :  { %v227_v29 = vpop.f32.mrf.mxu1 }
 0x199   :  { %v148_v30 = vadd.f32 %v142_v28, %v27_v7 }
 0x19a   :  { %v144_v31 = vpop.f32.mrf.mxu1 }
 0x19b   :  { %v145_v32 = vadd.f32 %v203_v26, %v144_v31  ;;  %v152_v33 = vsel %vm43_vm1, %v148_v30, 0.0 }
 0x19c   :  { %153 = vadd.xlane.f32.xlu0 %v152_v33  ;;  %v228_v34 = vpop.f32.mrf.mxu1 }
 0x19d   :  { %v149_v35 = vadd.f32 %v145_v32, %v28_v8 }
 0x19f   :  { %v155_v36 = vsel %vm43_vm1, %v149_v35, 0.0 }
 0x1a0   :  { %156 = vadd.xlane.f32.xlu0 %v155_v36 }
 0x225   :  { %v154_v37 = vpop.xlane.xlu0 %153 }
 0x226   :  { %v159_v38 = vmul.f32 0.03125, %v154_v37 }
 0x228   :  { %v161_v39 = vsub.f32 %v148_v30, %v159_v38 }
 0x229   :  { %v157_v40 = vpop.xlane.xlu0 %156 }
 0x22a   :  { %v160_v41 = vmul.f32 0.03125, %v157_v40  ;;  %v163_v42 = vmul.f32 %v161_v39, %v161_v39 }
 0x22c   :  { %v162_v43 = vsub.f32 %v149_v35, %v160_v41  ;;  %v165_v44 = vsel %vm43_vm1, %v163_v42, 0.0 }
 0x22d   :  { %166 = vadd.xlane.f32.xlu1 %v165_v44 }
 0x22e   :  { %v164_v45 = vmul.f32 %v162_v43, %v162_v43 }
 0x230   :  { %v168_v46 = vsel %vm43_vm1, %v164_v45, 0.0 }
 0x231   :  { %169 = vadd.xlane.f32.xlu1 %v168_v46 }
 0x2b6   :  { %v167_v47 = vpop.xlane.xlu1 %166 }
 0x2b7   :  { %v171_v48 = vmul.f32 0.03125, %v167_v47 }
 0x2b9   :  { %v173_v49 = vadd.f32 1e-05, %v171_v48 }
 0x2ba   :  { %v170_v50 = vpop.xlane.xlu1 %169 }
 0x2bb   :  { %231 = vrsqrt.f32 %v173_v49  ;;  %v172_v51 = vmul.f32 0.03125, %v170_v50 }
 0x2bd   :  { %v174_v52 = vadd.f32 1e-05, %v172_v51 }
 0x2bf   :  { %233 = vrsqrt.f32 %v174_v52 }
 0x2c8   :  { %v232_v53 = vpop.eup %231 }
 0x2c9   :  { %v177_v55 = vmul.f32 %v232_v53, %v161_v39 }
 0x2cb   :  { %v185_v57 = vmul.f32 %v205_v54, %v177_v55 }
 0x2cc   :  { %v234_v58 = vpop.eup %233 }
 0x2cd   :  { %v193_v59 = vadd.f32 %v206_v56, %v185_v57  ;;  %v178_v60 = vmul.f32 %v234_v58, %v162_v43 }
 0x2cf   :  { %195 = vst.msk [vmem:[%s340_s7] sm:$0xff] %vm43_vm1, %v193_v59  ;;  %v186_v61 = vmul.f32 %v205_v54, %v178_v60 }
 0x2d1   :  { %v194_v62 = vadd.f32 %v206_v56, %v186_v61 }
 0x2d3   :  { %196 = vst.msk [vmem:[%s340_s7 + $0x8] sm:$0xff] %vm43_vm1, %v194_v62 }

// kernel: seq2seq_forward.53
= control target key start
LH: loop header
LB: loop body
LE: loop exit
PB: predicated region body
PF: predicated region fallthrough
CT: control target
= control target key end

     0   :  { %v136_v3 = vmov 0.0   ;;  %vm137_vm0 = vmmov 0   ;;  %s185_s0 = inlined_call_operand.vmem [shape: f32[16,32], index: 0, kind: input, shape index: {}]   ;;  %s186_s1 = inlined_call_operand.vmem [shape: f32[32,18], index: 1, kind: input, shape index: {}]   ;;  %s187_s2 = inlined_call_operand.vmem [shape: f32[1,18], index: 2, kind: input, shape index: {}]   ;;  %s188_s3 = inlined_call_operand.hbm [shape: f32[16,18], index: 3, kind: output, shape index: {}]  }
   0x1   :  { %v21_v0 = vld [vmem:[%s186_s1 + $0x10] sm:$0xff]  ;;  %v22_v1 = vld [vmem:[%s186_s1 + $0x18] sm:$0xff]  ;;  %v19_v2 = vld [vmem:[%s186_s1] sm:$0xff]  ;;  %101 = vmatprep.subr.bf16.mxu0 %v136_v3  ;;  %105 = vmatprep.mubr.msk.bf16.mxu0 %vm137_vm0, %v136_v3 }
   0x2   :  { %v24_v4 = vpack.c.bf16 %v22_v1, %v21_v0  ;;  %v20_v5 = vld [vmem:[%s186_s1 + $0x8] sm:$0xff] }
   0x3   :  { %8 = vsyncpa [#allocation3], 0  ;;  %v23_v6 = vpack.c.bf16 %v20_v5, %v19_v2  ;;  %v16_v7 = vld [vmem:[%s185_s0] sm:$0xff]  ;;  %v17_v8 = vld [vmem:[%s185_s0 + $0x8] sm:$0xff]  ;;  %vm32_vm1 = vcmask 261120   ;;  %vm77_vm2 = vcmask 146432  }
   0x4   :  { %102 = vmatpush3.bf16.msra.mxu0 %v24_v4  ;;  %v18_v9 = vpack.c.bf16 %v17_v8, %v16_v7  ;;  %v96_v10 = vld [vmem:[%s187_s2] ss:$0 sm:$0xff]  ;;  %s138_s25 = smov [#allocation2]  }
   0x5   :  { %103 = vmatprep.subr.bf16.mxu0 %v136_v3  ;;  %s85_s26 = sshll.u32 %s138_s25, 4  ;;  %s86_s26 = int_to_ptr.vmem [resolvable:$true] %s85_s26 }
   0x6   :  { %s114_s0 = scalar_lea.vmem %s86_s26, 256  ;;  %p119_p1 = scmp.lt.s32.totalorder %s86_s26, %s86_s26 }
   0x7   :  { %p115_p0 = scmp.ne.s32.totalorder %s86_s26, %s114_s0  ;;  %p120_p2 = scmp.lt.s32.totalorder %s114_s0, %s114_s0 }
   0x8   :  { %104 = vmatpush3.bf16.msra.mxu0 %v23_v6 }
   0x9   :  { %p121_p3 = por %p120_p2, %p119_p1 }
   0xb   :  { %106 = vmatmul.mubr.msk.bf16.vlgmr.msra.gmra.mxu0 %vm32_vm1, %v18_v9  ;;  %p122_p4 = pnand %p121_p3, %p115_p0 }
  0xcb   :  { %v70_v11 = vpop.f32.mrf.mxu0 }
  0xcc   :  { %v71_v12 = vadd.f32 %v96_v10, %v70_v11 }
  0xcd   :  { %v107_v13 = vpop.f32.mrf.mxu0 }
  0xce   :  { %78 = vst.msk [vmem:[#allocation2] sm:$0xff] %vm77_vm2, %v71_v12 }
  0xcf   :  { %v73_v14 = vpop.f32.mrf.mxu0 }
  0xd0   :  { %v74_v15 = vadd.f32 %v96_v10, %v73_v14 }
  0xd1   :  { %v108_v16 = vpop.f32.mrf.mxu0 }
  0xd2   :  { %79 = vst.msk [vmem:[#allocation2 + $0x8] sm:$0xff] %vm77_vm2, %v74_v15 }
  0xd3   :  { %125 = shalt.err (!%p122_p4)
}
  0xd4   :  { %s139_s2 = smov 128   ;;  %s140_s27 = smov 8  }
  0xd5   :  { %91 = dma.vmem_to_hbm [thread:$0]  %s86_s26, 256, %s188_s3, [#allocation3], %s139_s2, %s139_s2, %s140_s27  }
  0xd6   :  { %134 = dma.done.wait [#allocation3], 256  }
  0xd7   :  { %135 = vsyncadd [#allocation3], 4294967040 }
  0xd8   :  { %95 = vsyncpa [#allocation3], 1 }

// kernel: seq2seq_forward.41
= control target key start
LH: loop header
LB: loop body
LE: loop exit
PB: predicated region body
PF: predicated region fallthrough
CT: control target
= control target key end

     0   :  { %s900_s12 = smov 0   ;;  %s997_s0 = inlined_call_operand.vmem [shape: f32[2,8,32], index: 0, kind: input, shape index: {}]   ;;  %s998_s1 = inlined_call_operand.vmem [shape: f32[2,16,64], index: 1, kind: input, shape index: {}]   ;;  %s999_s2 = inlined_call_operand.vmem [shape: f32[2,1,16], index: 2, kind: input, shape index: {}]   ;;  %s1000_s3 = inlined_call_operand.vmem [shape: f32[2,8,32], index: 3, kind: output, shape index: {}]  }
   0x1 LB: > { %s740_s13 = sadd.s32 4294967295, %s866_s12   ;;  %p744_p0 = scmp.ge.s32.totalorder %s866_s12, 1  ;;  %s866_s12 = sphi %s900_s12, %s13_s12  }
   0x2   : > { %p154_p1 = scmp.lt.s32.totalorder %s866_s12, 3 }
   0x4   : > { %p155_p2 = pnand %p744_p0, %p154_p1 }
   0x5   : > { %p184_p3 = scmp.lt.s32.totalorder (!%p155_p2), %s740_s13, 1  ;;  %s870_s22 = smov (!%p155_p2), 120  }
   0x6   : > { %158 = sbr.rel (%p155_p2) target bundleno = 1069 (0x42d), region = 32  ;;  %s871_s23 = smov (!%p155_p2), 112  }
   0x7   : > { %s872_s24 = smov (!%p155_p2), 104   ;;  %s873_s28 = smov (!%p155_p2), 96  }
   0x8   : > { %s874_s29 = smov (!%p155_p2), 88   ;;  %s875_s30 = smov (!%p155_p2), 72  }
   0x9   : > { %s876_s4 = smov (!%p155_p2), 80   ;;  %s877_s5 = smov (!%p155_p2), 8  }
   0xa   : > { %s878_s6 = smov (!%p155_p2), 16   ;;  %s879_s7 = smov (!%p155_p2), 24  }
   0xb   : > { %v868_v0 = vmov 0.0   ;;  %vm869_vm0 = vmmov 0   ;;  %s1002_s13 = smov (!%p184_p3, %s740_s13), 1  ;;  %vm216_vm1 = vcmask 64512   ;;  %v211_v8 = vlaneseq }
   0xc   : > { %776 = vmatprep.subr.bf16.mxu0 %v868_v0  ;;  %778 = vmatprep.mubr.msk.bf16.mxu0 %vm869_vm0, %v868_v0  ;;  %s759_s14 = sshll.u32 %s1002_s13, 4  ;;  %s745_s15 = sshll.u32 %s1002_s13, 3  ;;  %vm263_vm3 = vcmask 130048   ;;  %vm662_vm4 = vcmask 195584   ;;  %vm664_vm5 = vcmask 261120  }
   0xd   : > { %782 = vmatprep.subr.bf16.mxu1 %v868_v0  ;;  %784 = vmatprep.mubr.msk.bf16.mxu1 %vm869_vm0, %v868_v0  ;;  %s192_s18 = scalar_lea.vmem %s998_s1, %s759_s14  ;;  %s187_s21 = scalar_lea.vmem %s997_s0, %s745_s15  ;;  %v212_v10 = vshrl.u32 %v211_v8, 7 }
   0xe   : > { %v202_v1 = vld [vmem:[%s192_s18] sm:$0xff]  ;;  %v203_v2 = vld [vmem:[%s192_s18 + $0x8] sm:$0xff]  ;;  %s195_s27 = scalar_lea.vmem %s999_s2, %s1002_s13  ;;  %s199_s10 = scalar_lea.vmem %s1000_s3, %s745_s15 }
   0xf   : > { %v201_v3 = vld [vmem:[%s187_s21] sm:$0xff]  ;;  %v926_v4 = vpack.c.bf16 %v203_v2, %v202_v1  ;;  %v213_v11 = vsub.s32 0, %v212_v10 }
  0x10   : > { %v207_v6 = vmul.f32 0.35355338, %v201_v3  ;;  %v204_v9 = vld [vmem:[%s195_s27] sm:$0x1] }
  0x11   : > { %v221_v5 = vsel %vm216_vm1, %v926_v4, 0  ;;  %326 = vrot.lane.b32.xlu1 %v926_v4, %s870_s22  ;;  %vm205_vm2 = vcmp.gt.f32.partialorder %v204_v9, 0.5 }
  0x12   : > { %777 = vmatpush3.bf16.xpose.msra.mxu0 %v221_v5  ;;  %v208_v7 = vpack.c.bf16 %v207_v6, %v207_v6  ;;  %v206_v12 = vsel %vm205_vm2, -1e+30, %v868_v0 }
  0x13   : > { %794 = vmatprep.subr.bf16.mxu0 %v868_v0  ;;  %v214_v13 = vrot.slane %v206_v12, %v213_v11 }
  0x15   : > { %324 = vrot.lane.b32.xlu1 %v208_v7, %s870_s22 }
  0x19   : > { %779 = vmatmul.mubr.msk.bf16.vlgmr.msra.gmra.mxu0 %vm216_vm1, %v208_v7  ;;  %434 = vrot.lane.b32.xlu1 %v926_v4, %s871_s23 }
  0x1a   : > { %796 = vmatprep.mubr.msk.bf16.mxu0 %vm869_vm0, %v868_v0 }
  0x1d   : > { %432 = vrot.lane.b32.xlu1 %v208_v7, %s871_s23 }
  0x21   : > { %542 = vrot.lane.b32.xlu1 %v926_v4, %s872_s24 }
  0x25   : > { %540 = vrot.lane.b32.xlu1 %v208_v7, %s872_s24 }
  0x83   : > { %v327_v24 = vpop.permute.xlu1 %326 }
  0x84   : > { %v332_v27 = vsel %vm216_vm1, %v327_v24, 0 }
  0x87   : > { %v325_v25 = vpop.permute.xlu1 %324 }
  0x8b   : > { %v435_v29 = vpop.permute.xlu1 %434 }
  0x8c   : > { %v440_v31 = vsel %vm216_vm1, %v435_v29, 0 }
  0x8f   : > { %v433_v30 = vpop.permute.xlu1 %432 }
  0x93   : > { %v543_v32 = vpop.permute.xlu1 %542 }
  0x94   : > { %v548_v33 = vsel %vm216_vm1, %v543_v32, 0 }
  0x97   : > { %v541_v34 = vpop.permute.xlu1 %540 }
  0xd9   : > { %v257_v14 = vpop.f32.mrf.mxu0 }
  0xda   : > { %v258_v15 = vadd.f32 %v257_v14, %v214_v13 }
  0xdb   : > { %v780_v16 = vpop.f32.mrf.mxu0 }
  0xdc   : > { %v264_v17 = vsel %vm263_vm3, %v258_v15, -inf }
  0xdd   : > { %265 = vmax.xlane.f32.xlu0 %v264_v17  ;;  %v260_v18 = vpop.f32.mrf.mxu0 }
  0xdf   : > { %v781_v19 = vpop.f32.mrf.mxu0 }
  0xf3   : > { %276 = vrot.lane.b32.xlu0 %v926_v4, %s873_s28 }
 0x166   : > { %v266_v20 = vpop.xlane.xlu0 %265 }
 0x167   : > { %v267_v21 = vsub.f32 %v258_v15, %v266_v20 }
 0x169   : > { %v268_v22 = vmul.f32 1.442695, %v267_v21 }
 0x16a   : > { %v277_v23 = vpop.permute.xlu0 %276 }
 0x16b   : > { %844 = vpow2.f32 %v268_v22  ;;  %783 = vmatpush3.bf16.msra.mxu1 %v277_v23 }
 0x16c   : > { %788 = vmatprep.subr.bf16.mxu1 %v868_v0 }
 0x178   : > { %v945_v26 = vpop.eup %844 }
 0x179   : > { %v274_v28 = vpack.c.bf16 %v945_v26, %v945_v26  ;;  %v270_v8 = vsel %vm263_vm3, %v945_v26, 0.0 }
 0x17b   : > { %785 = vmatmul.mubr.msk.bf16.vlgmr.msra.gmra.mxu1 %vm263_vm3, %v274_v28 }
 0x17c   : > { %789 = vmatpush3.bf16.xpose.msra.mxu1 %v332_v27  ;;  %790 = vmatprep.mubr.msk.bf16.mxu1 %vm869_vm0, %v868_v0 }
 0x17d   : > { %800 = vmatprep.subr.bf16.mxu1 %v868_v0 }
 0x183   : > { %791 = vmatmul.mubr.msk.bf16.vlgmr.msra.gmra.mxu1 %vm216_vm1, %v325_v25 }
 0x184   : > { %801 = vmatpush3.bf16.xpose.msra.mxu1 %v440_v31  ;;  %802 = vmatprep.mubr.msk.bf16.mxu1 %vm869_vm0, %v868_v0 }
 0x185   : > { %812 = vmatprep.subr.bf16.mxu1 %v868_v0 }
 0x18b   : > { %803 = vmatmul.mubr.msk.bf16.vlgmr.msra.gmra.mxu1 %vm216_vm1, %v433_v30 }
 0x18c   : > { %813 = vmatpush3.bf16.xpose.msra.mxu1 %v548_v33  ;;  %814 = vmatprep.mubr.msk.bf16.mxu1 %vm869_vm0, %v868_v0 }
 0x193   : > { %815 = vmatmul.mubr.msk.bf16.vlgmr.msra.gmra.mxu1 %vm216_vm1, %v541_v34 }
 0x23b   : > { %v964_v35 = vpop.f32.mrf.mxu1 }
 0x23d   : > { %v786_v36 = vpop.f32.mrf.mxu1 }
 0x23f   : > { %v319_v37 = vpop.f32.mrf.mxu1 }
 0x241   : > { %v787_v38 = vpop.f32.mrf.mxu1 }
 0x243   : > { %v368_v39 = vpop.f32.mrf.mxu1 }
 0x244   : > { %v369_v40 = vadd.f32 %v368_v39, %v214_v13 }
 0x245   : > { %v792_v41 = vpop.f32.mrf.mxu1 }
 0x246   : > { %v374_v42 = vsel %vm263_vm3, %v369_v40, -inf }
 0x247   : > { %375 = vmax.xlane.f32.xlu1 %v374_v42  ;;  %v371_v43 = vpop.f32.mrf.mxu1 }
 0x249   : > { %v793_v44 = vpop.f32.mrf.mxu1 }
 0x24b   : > { %v476_v45 = vpop.f32.mrf.mxu1 }
 0x24c   : > { %v477_v46 = vadd.f32 %v476_v45, %v214_v13 }
 0x24d   : > { %v804_v47 = vpop.f32.mrf.mxu1 }
 0x24e   : > { %v482_v48 = vsel %vm263_vm3, %v477_v46, -inf }
 0x24f   : > { %483 = vmax.xlane.f32.xlu0 %v482_v48  ;;  %v479_v49 = vpop.f32.mrf.mxu1 }
 0x251   : > { %v805_v50 = vpop.f32.mrf.mxu1 }
 0x253   : > { %v584_v51 = vpop.f32.mrf.mxu1 }
 0x254   : > { %v585_v52 = vadd.f32 %v584_v51, %v214_v13 }
 0x255   : > { %v816_v53 = vpop.f32.mrf.mxu1 }
 0x256   : > { %v590_v54 = vsel %vm263_vm3, %v585_v52, -inf }
 0x257   : > { %591 = vmax.xlane.f32.xlu0 %v590_v54  ;;  %v587_v55 = vpop.f32.mrf.mxu1 }
 0x258   : > { %385 = vrot.lane.b32.xlu1 %v926_v4, %s874_s29 }
 0x259   : > { %v817_v56 = vpop.f32.mrf.mxu1 }
 0x25c   : > { %601 = vrot.lane.b32.xlu1 %v926_v4, %s875_s30 }
 0x26d   : > { %493 = vrot.lane.b32.xlu0 %v926_v4, %s876_s4 }
 0x2d0   : > { %v376_v57 = vpop.xlane.xlu1 %375 }
 0x2d1   : > { %v377_v58 = vsub.f32 %v369_v40, %v376_v57 }
 0x2d3   : > { %v378_v59 = vmul.f32 1.442695, %v377_v58 }
 0x2d4   : > { %v386_v60 = vpop.permute.xlu1 %385 }
 0x2d5   : > { %846 = vpow2.f32 %v378_v59  ;;  %795 = vmatpush3.bf16.msra.mxu0 %v386_v60 }
 0x2d6   : > { %806 = vmatprep.subr.bf16.mxu0 %v868_v0 }
 0x2d8   : > { %v484_v61 = vpop.xlane.xlu0 %483  ;;  %v602_v10 = vpop.permute.xlu1 %601 }
 0x2d9   : > { %v485_v62 = vsub.f32 %v477_v46, %v484_v61 }
 0x2db   : > { %v486_v63 = vmul.f32 1.442695, %v485_v62 }
 0x2dd   : > { %848 = vpow2.f32 %v486_v63 }
 0x2e0   : > { %v592_v1 = vpop.xlane.xlu0 %591 }
 0x2e1   : > { %v593_v2 = vsub.f32 %v585_v52, %v592_v1 }
 0x2e2   : > { %v847_v3 = vpop.eup %846 }
 0x2e3   : > { %v594_v5 = vmul.f32 1.442695, %v593_v2  ;;  %v380_v6 = vsel %vm263_vm3, %v847_v3, 0.0  ;;  %v384_v7 = vpack.c.bf16 %v847_v3, %v847_v3 }
 0x2e4   : > { %381 = vadd.xlane.f32.xlu1 %v380_v6  ;;  %v494_v4 = vpop.permute.xlu0 %493 }
 0x2e5   : > { %850 = vpow2.f32 %v594_v5  ;;  %797 = vmatmul.mubr.msk.bf16.vlgmr.msra.gmra.mxu0 %vm263_vm3, %v384_v7 }
 0x2e6   : > { %807 = vmatpush3.bf16.msra.mxu0 %v494_v4  ;;  %808 = vmatprep.mubr.msk.bf16.mxu0 %vm869_vm0, %v868_v0 }
 0x2e7   : > { %818 = vmatprep.subr.bf16.mxu0 %v868_v0 }
 0x2e8   : > { %271 = vadd.xlane.f32.xlu1 %v270_v8 }
 0x2ea   : > { %v849_v9 = vpop.eup %848 }
 0x2eb   : > { %v488_v11 = vsel %vm263_vm3, %v849_v9, 0.0  ;;  %v492_v12 = vpack.c.bf16 %v849_v9, %v849_v9 }
 0x2ec   : > { %489 = vadd.xlane.f32.xlu0 %v488_v11 }
 0x2ed   : > { %809 = vmatmul.mubr.msk.bf16.vlgmr.msra.gmra.mxu0 %vm263_vm3, %v492_v12 }
 0x2ee   : > { %819 = vmatpush3.bf16.msra.mxu0 %v602_v10  ;;  %820 = vmatprep.mubr.msk.bf16.mxu0 %vm869_vm0, %v868_v0 }
 0x2f2   : > { %v851_v13 = vpop.eup %850 }
 0x2f3   : > { %v596_v14 = vsel %vm263_vm3, %v851_v13, 0.0  ;;  %v600_v15 = vpack.c.bf16 %v851_v13, %v851_v13 }
 0x2f4   : > { %597 = vadd.xlane.f32.xlu0 %v596_v14 }
 0x2f5   : > { %821 = vmatmul.mubr.msk.bf16.vlgmr.msra.gmra.mxu0 %vm263_vm3, %v600_v15 }
 0x36d   : > { %v382_v16 = vpop.xlane.xlu1 %381 }
 0x36e   : > { %852 = vrcp.f32 %v382_v16 }
 0x371   : > { %v272_v37 = vpop.xlane.xlu1 %271 }
 0x375   : > { %v490_v17 = vpop.xlane.xlu0 %489 }
 0x376   : > { %854 = vrcp.f32 %v490_v17 }
 0x37b   : > { %v853_v18 = vpop.eup %852 }
 0x37d   : > { %v598_v19 = vpop.xlane.xlu0 %597 }
 0x37e   : > { %856 = vrcp.f32 %v598_v19 }
 0x37f   : > { %858 = vrcp.f32 %v272_v37 }
 0x383   : > { %v855_v24 = vpop.eup %854 }
 0x38b   : > { %v857_v30 = vpop.eup %856 }
 0x38c   : > { %v859_v38 = vpop.eup %858 }
 0x38d   : > { %v322_v41 = vmul.f32 %v859_v38, %v964_v35 }
 0x3a5   : > { %v425_v20 = vpop.f32.mrf.mxu0 }
 0x3a6   : > { %v431_v21 = vmul.f32 %v853_v18, %v425_v20 }
 0x3a7   : > { %v798_v22 = vpop.f32.mrf.mxu0 }
 0x3a8   : > { %649 = vrot.lane.b32.xlu0 %v431_v21, %s877_s5 }
 0x3a9   : > { %v428_v0 = vpop.f32.mrf.mxu0 }
 0x3ab   : > { %v799_v23 = vpop.f32.mrf.mxu0 }
 0x3ad   : > { %v533_v25 = vpop.f32.mrf.mxu0 }
 0x3ae   : > { %v539_v26 = vmul.f32 %v855_v24, %v533_v25 }
 0x3af   : > { %v810_v27 = vpop.f32.mrf.mxu0 }
 0x3b0   : > { %653 = vrot.lane.b32.xlu1 %v539_v26, %s878_s6 }
 0x3b1   : > { %v536_v28 = vpop.f32.mrf.mxu0 }
 0x3b3   : > { %v811_v29 = vpop.f32.mrf.mxu0 }
 0x3b5   : > { %v641_v31 = vpop.f32.mrf.mxu0 }
 0x3b6   : > { %v647_v32 = vmul.f32 %v857_v30, %v641_v31 }
 0x3b7   : > { %v822_v33 = vpop.f32.mrf.mxu0 }
 0x3b8   : > { %657 = vrot.lane.b32.xlu1 %v647_v32, %s879_s7 }
 0x3b9   : > { %v644_v34 = vpop.f32.mrf.mxu0 }
 0x3bb   : > { %v823_v36 = vpop.f32.mrf.mxu0 }
 0x41a   : > { %v650_v39 = vpop.permute.xlu0 %649 }
 0x41b   : > { %v660_v42 = vsel %vm216_vm1, %v322_v41, %v650_v39 }
 0x422   : > { %v654_v40 = vpop.permute.xlu1 %653 }
 0x423   : > { %v661_v43 = vsel %vm263_vm3, %v660_v42, %v654_v40 }
 0x42a   : > { %v658_v44 = vpop.permute.xlu1 %657 }
 0x42b   : > { %v663_v45 = vsel %vm662_vm4, %v661_v43, %v658_v44 }
 0x42c   : > { %665 = vst.msk [vmem:[%s199_s10] sm:$0xff] %vm664_vm5, %v663_v45 }
 0x42d PF: > { %s13_s12 = sadd.s32 1, %s866_s12  }
 0x42e   : > { %p10_p4 = scmp.ge.s32.totalorder %s13_s12, 4  }
 0x430   :  { %12 = sbr.rel (!%p10_p4) target bundleno = 1 (0x1), region = 68 }

</bundles_post_ra>
